<compile_context>
chip_gen: v5e
topology: v5e:2x2
jax: 0.10.0
libtpu: 0.0.40
codegen_flags: <defaults>
</compile_context>

<pallas_src>
import jax
import jax.numpy as jnp
from jax.experimental import pallas as pl
from jax.experimental.pallas import tpu as pltpu


def _add_conv1x1_kernel(w_hi_ref, w_lo_ref, a_ref, b_ref, o_ref):
    # w_*_ref: (tco, C_in) bf16   a_ref, b_ref: (C_in, HW) f32   o_ref: (tco, HW) f32
    x = a_ref[...] + b_ref[...]                     # exact f32 add (the fused op)
    # bf16x3 split of the activations (the weight split is done once in the wrapper).
    x_hi = x.astype(jnp.bfloat16)
    x_lo = (x - x_hi.astype(jnp.float32)).astype(jnp.bfloat16)
    w_hi = w_hi_ref[...]
    w_lo = w_lo_ref[...]
    acc = jnp.dot(w_hi, x_hi, preferred_element_type=jnp.float32)
    acc = acc + jnp.dot(w_hi, x_lo, preferred_element_type=jnp.float32)
    acc = acc + jnp.dot(w_lo, x_hi, preferred_element_type=jnp.float32)
    o_ref[...] = acc.astype(o_ref.dtype)


def _pick_cout_tile(c_out):
    # 2-4 pipeline steps; tile must be a multiple of 16 (bf16 sublane packing).
    for cand in (160, 240, 128, 120):
        if c_out % cand == 0 and cand % 16 == 0:
            return cand
    return c_out  # fall back to a single block


def add_conv1x1(x216, x202, weight):
    """x216, x202: (N, C_in, H, W) float32. weight: (C_out, C_in, 1, 1)."""
    N, C_in, H, W = x216.shape
    C_out = weight.shape[0]
    HW = H * W

    # NCHW -> (N, C_in, H*W): pure reshapes (no data movement).
    a = x216.reshape(N, C_in, HW)
    b = x202.reshape(N, C_in, HW)
    w = weight.reshape(C_out, C_in).astype(jnp.float32)

    # One-time bf16x3 split of the weight (hi + lo carry ~16 mantissa bits).
    w_hi = w.astype(jnp.bfloat16)
    w_lo = (w - w_hi.astype(jnp.float32)).astype(jnp.bfloat16)

    tco = _pick_cout_tile(C_out)
    g = C_out // tco

    # Advisory cost estimate: 3 bf16 MXU passes + all HBM traffic.
    flops = 3 * 2 * N * C_out * C_in * HW
    bytes_accessed = (
        2 * N * C_in * HW * 4          # a, b (f32 in)
        + 2 * C_out * C_in * 2         # w_hi, w_lo (bf16 in)
        + N * C_out * HW * 4           # output (f32)
    )

    out = pl.pallas_call(
        _add_conv1x1_kernel,
        out_shape=jax.ShapeDtypeStruct((N, C_out, HW), x216.dtype),
        grid_spec=pltpu.PrefetchScalarGridSpec(
            num_scalar_prefetch=0,
            grid=(N, g),
            in_specs=[
                # Weight slices: change with the C_out block index.
                pl.BlockSpec((tco, C_in), lambda n, j: (j, 0)),
                pl.BlockSpec((tco, C_in), lambda n, j: (j, 0)),
                # Activations: constant along j -> DMA'd once, VMEM-resident.
                pl.BlockSpec((None, C_in, HW), lambda n, j: (n, 0, 0)),
                pl.BlockSpec((None, C_in, HW), lambda n, j: (n, 0, 0)),
            ],
            out_specs=pl.BlockSpec((None, tco, HW), lambda n, j: (n, j, 0)),
        ),
        compiler_params=pltpu.CompilerParams(
            # Both axes are independent (no reduction): batch and C_out blocks
            # can be sharded across v7x's two TensorCores.
            dimension_semantics=("parallel", "parallel"),
        ),
        cost_estimate=pl.CostEstimate(
            flops=flops, transcendentals=0, bytes_accessed=bytes_accessed
        ),
    )(w_hi, w_lo, a, b)

    # (N, C_out, H*W) -> NCHW, again a free reshape.
    return out.reshape(N, C_out, H, W)


if __name__ == "__main__":
    key = jax.random.PRNGKey(0)
    k1, k2, k3 = jax.random.split(key, 3)

    # Shapes from the original module: add of two (1, 80, 28, 28) tensors
    # followed by Conv2d(80, 480, kernel_size=1, bias=False).
    N, C_in, H, W = 1, 80, 28, 28
    C_out = 480

    x216 = jax.random.normal(k1, (N, C_in, H, W), dtype=jnp.float32)
    x202 = jax.random.normal(k2, (N, C_in, H, W), dtype=jnp.float32)
    weight = (
        jax.random.normal(k3, (C_out, C_in, 1, 1), dtype=jnp.float32)
        * (1.0 / jnp.sqrt(C_in))
    )

    out = add_conv1x1(x216, x202, weight)
    out = jax.block_until_ready(out)

    # Reference check in plain JAX (1x1 conv == channel matmul), full f32.
    ref = jnp.einsum(
        "nchw,oc->nohw",
        x216 + x202,
        weight.reshape(C_out, C_in),
        precision=jax.lax.Precision.HIGHEST,
    )
    assert out.shape == (N, C_out, H, W)
    assert jnp.allclose(out, ref, atol=1e-4, rtol=1e-4)

    print("KERNEL_OK")
</pallas_src>

<mosaic_0001>
module attributes {stable_mosaic.version = 11 : i64} {
  func.func @_add_conv1x1_kernel(%arg0: i32, %arg1: i32, %arg2: memref<160x80xbf16, #tpu.memory_space<vmem>>, %arg3: memref<160x80xbf16, #tpu.memory_space<vmem>>, %arg4: memref<1x80x784xf32, #tpu.memory_space<vmem>>, %arg5: memref<1x80x784xf32, #tpu.memory_space<vmem>>, %arg6: memref<1x160x784xf32, #tpu.memory_space<vmem>>) attributes {dimension_semantics = [#tpu.dimension_semantics<parallel>, #tpu.dimension_semantics<parallel>], iteration_bounds = array<i64: 1, 3>, scalar_prefetch = 0 : i64, scratch_operands = 0 : i64, tpu.core_type = #tpu.core_type<tc>, window_params = [{transform_indices = @transform_0, window_bounds = array<i64: 160, 80>}, {transform_indices = @transform_1, window_bounds = array<i64: 160, 80>}, {transform_indices = @transform_2, window_bounds = array<i64: 1, 80, 784>}, {transform_indices = @transform_3, window_bounds = array<i64: 1, 80, 784>}, {transform_indices = @transform_4, window_bounds = array<i64: 1, 160, 784>}]} {
    %c0 = arith.constant 0 : index
    %c0_0 = arith.constant 0 : index
    %c0_1 = arith.constant 0 : index
    %0 = vector.load %arg4[%c0, %c0_0, %c0_1] : memref<1x80x784xf32, #tpu.memory_space<vmem>>, vector<1x80x784xf32>
    %1 = vector.shape_cast %0 : vector<1x80x784xf32> to vector<80x784xf32>
    %c0_2 = arith.constant 0 : index
    %c0_3 = arith.constant 0 : index
    %c0_4 = arith.constant 0 : index
    %2 = vector.load %arg5[%c0_2, %c0_3, %c0_4] : memref<1x80x784xf32, #tpu.memory_space<vmem>>, vector<1x80x784xf32>
    %3 = vector.shape_cast %2 : vector<1x80x784xf32> to vector<80x784xf32>
    %4 = arith.addf %1, %3 : vector<80x784xf32>
    %5 = arith.truncf %4 : vector<80x784xf32> to vector<80x784xbf16>
    %6 = arith.extf %5 : vector<80x784xbf16> to vector<80x784xf32>
    %7 = arith.subf %4, %6 : vector<80x784xf32>
    %8 = arith.truncf %7 : vector<80x784xf32> to vector<80x784xbf16>
    %c0_5 = arith.constant 0 : index
    %c0_6 = arith.constant 0 : index
    %9 = vector.load %arg2[%c0_5, %c0_6] : memref<160x80xbf16, #tpu.memory_space<vmem>>, vector<160x80xbf16>
    %c0_7 = arith.constant 0 : index
    %c0_8 = arith.constant 0 : index
    %10 = vector.load %arg3[%c0_7, %c0_8] : memref<160x80xbf16, #tpu.memory_space<vmem>>, vector<160x80xbf16>
    %cst = arith.constant dense<0.000000e+00> : vector<160x784xf32>
    %11 = tpu.matmul %9, %5, %cst {dimension_numbers = #tpu.dot_dimension_numbers<[1], [0], [0], [1], [0, 0, 1, 1], [], []>} : vector<160x80xbf16>, vector<80x784xbf16>, vector<160x784xf32> -> vector<160x784xf32>
    %cst_9 = arith.constant dense<0.000000e+00> : vector<160x784xf32>
    %12 = tpu.matmul %9, %8, %cst_9 {dimension_numbers = #tpu.dot_dimension_numbers<[1], [0], [0], [1], [0, 0, 1, 1], [], []>} : vector<160x80xbf16>, vector<80x784xbf16>, vector<160x784xf32> -> vector<160x784xf32>
    %13 = arith.addf %11, %12 : vector<160x784xf32>
    %cst_10 = arith.constant dense<0.000000e+00> : vector<160x784xf32>
    %14 = tpu.matmul %10, %5, %cst_10 {dimension_numbers = #tpu.dot_dimension_numbers<[1], [0], [0], [1], [0, 0, 1, 1], [], []>} : vector<160x80xbf16>, vector<80x784xbf16>, vector<160x784xf32> -> vector<160x784xf32>
    %15 = arith.addf %13, %14 : vector<160x784xf32>
    %c0_11 = arith.constant 0 : index
    %c0_12 = arith.constant 0 : index
    %c0_13 = arith.constant 0 : index
    %16 = vector.load %arg6[%c0_11, %c0_12, %c0_13] : memref<1x160x784xf32, #tpu.memory_space<vmem>>, vector<1x160x784xf32>
    %17 = vector.shape_cast %16 : vector<1x160x784xf32> to vector<160x784xf32>
    %18 = vector.shape_cast %15 : vector<160x784xf32> to vector<1x160x784xf32>
    tpu.vector_store %arg6[%c0_11, %c0_12, %c0_13], %18 {strides = array<i32>} : memref<1x160x784xf32, #tpu.memory_space<vmem>>, vector<1x160x784xf32>,
    return
  }
  func.func @transform_0(%arg0: i32, %arg1: i32) -> (i32, i32) {
    %c0_i32 = arith.constant 0 : i32
    %c0_i32_0 = arith.constant 0 : i32
    return %arg1, %c0_i32 : i32, i32
  }
  func.func @transform_1(%arg0: i32, %arg1: i32) -> (i32, i32) {
    %c0_i32 = arith.constant 0 : i32
    %c0_i32_0 = arith.constant 0 : i32
    return %arg1, %c0_i32 : i32, i32
  }
  func.func @transform_2(%arg0: i32, %arg1: i32) -> (i32, i32, i32) {
    %c0_i32 = arith.constant 0 : i32
    %c0_i32_0 = arith.constant 0 : i32
    %c0_i32_1 = arith.constant 0 : i32
    return %arg0, %c0_i32, %c0_i32_0 : i32, i32, i32
  }
  func.func @transform_3(%arg0: i32, %arg1: i32) -> (i32, i32, i32) {
    %c0_i32 = arith.constant 0 : i32
    %c0_i32_0 = arith.constant 0 : i32
    %c0_i32_1 = arith.constant 0 : i32
    return %arg0, %c0_i32, %c0_i32_0 : i32, i32, i32
  }
  func.func @transform_4(%arg0: i32, %arg1: i32) -> (i32, i32, i32) {
    %c0_i32 = arith.constant 0 : i32
    %c0_i32_0 = arith.constant 0 : i32
    return %arg0, %arg1, %c0_i32 : i32, i32, i32
  }
}

</mosaic_0001>

<bundles_post_ra>
// kernel: tpu_custom_call.1
= control target key start
LH: loop header
LB: loop body
LE: loop exit
PB: predicated region body
PF: predicated region fallthrough
CT: control target
= control target key end

     0   :  { %9 = vsyncpa [#allocation3], 0  ;;  %s5308_s0 = inlined_call_operand.vmem [shape: bf16[480,80], index: 0, kind: input, shape index: {}]   ;;  %s5309_s1 = inlined_call_operand.vmem [shape: bf16[480,80], index: 1, kind: input, shape index: {}]   ;;  %s5310_s2 = inlined_call_operand.hbm [shape: f32[1,80,784], index: 2, kind: input, shape index: {}]   ;;  %s5311_s3 = inlined_call_operand.hbm [shape: f32[1,80,784], index: 3, kind: input, shape index: {}]   ;;  %s5312_s4 = inlined_call_operand.vmem [shape: f32[1,480,784], index: 4, kind: output, shape index: {}]  }
   0x1   :  { %10 = vsyncpa [#allocation5], 0  ;;  %s3267_s15 = smov 0   ;;  %s3269_s16 = smov 0  }
   0x2   :  { %s3271_s17 = smov 0  }
   0x3 LB: > { %s2749_s18 = sadd.s32 4294967295, %s3236_s17   ;;  %s25_s19 = sadd.s32 1, %s3232_s16  ;;  %s3236_s17 = sphi %s3271_s17, %s16_s17   ;;  %s3232_s16 = sphi %s3269_s16, %s5829_s16   ;;  %s3228_s15 = sphi %s3267_s15, %s5828_s15  }
   0x4   : > { %p26_p0 = scmp.ge.s32.totalorder %s25_s19, 3  ;;  %p2751_p1 = scmp.ge.s32.totalorder %s3236_s17, 1 }
   0x5   : > { %p165_p2 = scmp.lt.s32.totalorder %s3236_s17, 4  ;;  %p3292_p4 = scmp.eq.s32.totalorder %s2749_s18, 0 }
   0x6   : > { %s5831_s19 = smov (%p26_p0, %s25_s19), 0  ;;  %s179_s24 = sshll.u32 %s5310_s2, 4  ;;  %s180_s24 = int_to_ptr.hbm [resolvable:$true] %s179_s24 }
   0x7   : > { %p3288_p3 = pnand %p2751_p1, %p165_p2  ;;  %s3238_s25 = smov [#allocation2]  }
   0x8   : > { %s181_s26 = sshll.u32 %s3238_s25, 4  ;;  %s196_s29 = sshll.u32 %s5311_s3, 4  ;;  %s182_s26 = int_to_ptr.vmem [resolvable:$true] %s181_s26  ;;  %s197_s29 = int_to_ptr.hbm [resolvable:$true] %s196_s29 }
   0x9   : > { %p3097_p5 = pneg %p3288_p3  ;;  %s3239_s30 = smov 896  }
   0xa   : > { %s3240_s5 = smov 56   ;;  %s3241_s6 = smov [#allocation4]  }
   0xb   : > { %p3098_p6 = pnand %p3292_p4, %p3097_p5  ;;  %s198_s7 = sshll.u32 %s3241_s6, 4  ;;  %s199_s7 = int_to_ptr.vmem [resolvable:$true] %s198_s7 }
   0xc   : > { %232 = sbr.rel (%p3288_p3) target bundleno = 1023 (0x3ff), region = 36 }
   0xd   : > { %3100 = dma.hbm_to_vmem [thread:$0]  (!%p3098_p6), %s180_s24, 8960, %s182_s26, [#allocation3], %s3239_s30, %s3239_s30, %s3240_s5  }
   0xe   : > { %3103 = dma.hbm_to_vmem [thread:$0]  (!%p3098_p6), %s197_s29, 8960, %s199_s7, [#allocation5], %s3239_s30, %s3239_s30, %s3240_s5  }
  0x11   : > { %3219 = dma.done.wait (%p3292_p4), [#allocation3], 8960  }
  0x12   : > { %3221 = vsyncadd (%p3292_p4), [#allocation3], 4294958336 }
  0x13   : > { %3223 = dma.done.wait (%p3292_p4), [#allocation5], 8960  }
  0x14   : > { %3225 = vsyncadd (%p3292_p4), [#allocation5], 4294958336  ;;  %v354_v0 = vld [vmem:[#allocation2 + $0x1c0] sm:$0xff]  ;;  %v355_v1 = vld [vmem:[#allocation2 + $0x1c8] sm:$0xff]  ;;  %s274_s8 = smul.u32 20, %s3228_s15  ;;  %vm813_vm0 = vcmask 654336  }
  0x15   : > { %v361_v2 = vld [vmem:[#allocation2 + $0x1f8] sm:$0xff]  ;;  %v362_v3 = vld [vmem:[#allocation2 + $0x200] sm:$0xff]  ;;  %v424_v4 = vld [vmem:[#allocation4 + $0x1c0] sm:$0xff]  ;;  %vm2489_vm1 = vcmask 130048  }
  0x16   : > { %v425_v5 = vld [vmem:[#allocation4 + $0x1c8] sm:$0xff]  ;;  %v431_v6 = vld [vmem:[#allocation4 + $0x1f8] sm:$0xff]  ;;  %v432_v7 = vld [vmem:[#allocation4 + $0x200] sm:$0xff]  ;;  %v494_v8 = vadd.f32 %v424_v4, %v354_v0  ;;  %p3369_p7 = scmp.lt.s32.totalorder %s274_s8, 59 }
  0x17   : > { %v495_v9 = vadd.f32 %v425_v5, %v355_v1  ;;  %v340_v10 = vld [vmem:[#allocation2 + $0x150] sm:$0xff]  ;;  %v501_v11 = vadd.f32 %v431_v6, %v361_v2  ;;  %v3316_v12 = vadd.f32 %v432_v7, %v362_v3  ;;  %v341_v13 = vld [vmem:[#allocation2 + $0x158] sm:$0xff]  ;;  %v347_v14 = vld [vmem:[#allocation2 + $0x188] sm:$0xff] }
  0x18   : > { %v348_v15 = vld [vmem:[#allocation2 + $0x190] sm:$0xff]  ;;  %v410_v17 = vld [vmem:[#allocation4 + $0x150] sm:$0xff]  ;;  %v411_v18 = vld [vmem:[#allocation4 + $0x158] sm:$0xff]  ;;  %s5833_s8 = smov (!%p3369_p7, %s274_s8), 59 }
  0x19   : > { %v3318_v16 = vpack.c.bf16 %v495_v9, %v494_v8  ;;  %v417_v19 = vld [vmem:[#allocation4 + $0x188] sm:$0xff]  ;;  %v3321_v20 = vpack.c.bf16 %v3316_v12, %v501_v11  ;;  %v418_v21 = vld [vmem:[#allocation4 + $0x190] sm:$0xff]  ;;  %v480_v22 = vadd.f32 %v410_v17, %v340_v10  ;;  %v3323_v23 = vadd.f32 %v411_v18, %v341_v13  ;;  %v327_v26 = vld [vmem:[#allocation2 + $0xe8] sm:$0xff]  ;;  %s2758_s10 = sshll.u32 %s5833_s8, 2  ;;  %s3088_s20 = smul.u32 56, %s5833_s8 }
  0x1a   : > { %v487_v24 = vadd.f32 %v417_v19, %v347_v14  ;;  %v326_v25 = vld [vmem:[#allocation2 + $0xe0] sm:$0xff]  ;;  %v3326_v28 = vadd.f32 %v418_v21, %v348_v15  ;;  %v333_v29 = vld [vmem:[#allocation2 + $0x118] sm:$0xff]  ;;  %v396_v31 = vld [vmem:[#allocation4 + $0xe0] sm:$0xff]  ;;  %s3428_s13 = scalar_lea.vmem %s5308_s0, %s2758_s10  ;;  %s4477_s18 = scalar_lea.vmem %s5309_s1, %s2758_s10 }
  0x1b   : > { %v604_v27 = vunpack.c.l.bf16 %v3318_v16  ;;  %v334_v30 = vld [vmem:[#allocation2 + $0x120] sm:$0xff]  ;;  %v605_v32 = vunpack.c.h.bf16 %v3318_v16  ;;  %v611_v33 = vunpack.c.l.bf16 %v3321_v20  ;;  %v3331_v34 = vpack.c.bf16 %v3323_v23, %v480_v22  ;;  %v397_v35 = vld [vmem:[#allocation4 + $0xe8] sm:$0xff]  ;;  %v403_v36 = vld [vmem:[#allocation4 + $0x118] sm:$0xff]  ;;  %s4722_s23 = scalar_lea.vmem %s5312_s4, %s3088_s20 }
  0x1c   : > { %v404_v37 = vld [vmem:[#allocation4 + $0x120] sm:$0xff]  ;;  %v466_v38 = vadd.f32 %v396_v31, %v326_v25  ;;  %v612_v39 = vunpack.c.h.bf16 %v3321_v20  ;;  %v3335_v41 = vpack.c.bf16 %v3326_v28, %v487_v24  ;;  %v3337_v42 = vadd.f32 %v397_v35, %v327_v26  ;;  %v313_v45 = vld [vmem:[#allocation2 + $0x78] sm:$0xff]  ;;  %v319_v46 = vld [vmem:[#allocation2 + $0xa8] sm:$0xff] }
  0x1d   : > { %v674_v40 = vsub.f32 %v494_v8, %v604_v27  ;;  %v473_v43 = vadd.f32 %v403_v36, %v333_v29  ;;  %v312_v44 = vld [vmem:[#allocation2 + $0x70] sm:$0xff]  ;;  %v681_v47 = vsub.f32 %v501_v11, %v611_v33  ;;  %v590_v48 = vunpack.c.l.bf16 %v3331_v34  ;;  %v382_v51 = vld [vmem:[#allocation4 + $0x70] sm:$0xff]  ;;  %v383_v52 = vld [vmem:[#allocation4 + $0x78] sm:$0xff] }
  0x1e   : > { %v3340_v49 = vadd.f32 %v404_v37, %v334_v30  ;;  %v320_v50 = vld [vmem:[#allocation2 + $0xb0] sm:$0xff]  ;;  %v3342_v53 = vsub.f32 %v495_v9, %v605_v32  ;;  %v597_v54 = vunpack.c.l.bf16 %v3335_v41  ;;  %v3346_v55 = vpack.c.bf16 %v3337_v42, %v466_v38  ;;  %v389_v56 = vld [vmem:[#allocation4 + $0xa8] sm:$0xff]  ;;  %v390_v57 = vld [vmem:[#allocation4 + $0xb0] sm:$0xff] }
  0x1f   : > { %v452_v58 = vadd.f32 %v382_v51, %v312_v44  ;;  %v3348_v59 = vadd.f32 %v383_v52, %v313_v45  ;;  %v298_v60 = vld [vmem:[#allocation2] sm:$0xff]  ;;  %v716_v61 = vpack.c.bf16 %v681_v47, %v674_v40  ;;  %v660_v62 = vsub.f32 %v480_v22, %v590_v48  ;;  %v299_v1 = vld [vmem:[#allocation2 + $0x8] sm:$0xff]  ;;  %v305_v2 = vld [vmem:[#allocation2 + $0x38] sm:$0xff] }
  0x20   : > { %v3352_v63 = vpack.c.bf16 %v3340_v49, %v473_v43  ;;  %v459_v0 = vadd.f32 %v389_v56, %v319_v46  ;;  %v306_v3 = vld [vmem:[#allocation2 + $0x40] sm:$0xff]  ;;  %v667_v4 = vsub.f32 %v487_v24, %v597_v54  ;;  %v576_v5 = vunpack.c.l.bf16 %v3346_v55  ;;  %v368_v8 = vld [vmem:[#allocation4] sm:$0xff]  ;;  %v369_v9 = vld [vmem:[#allocation4 + $0x8] sm:$0xff] }
  0x21   : > { %v3355_v6 = vadd.f32 %v390_v57, %v320_v50  ;;  %v3358_v7 = vpack.c.bf16 %v3348_v59, %v452_v58  ;;  %v375_v10 = vld [vmem:[#allocation4 + $0x38] sm:$0xff]  ;;  %847 = vmatpush.bf16.msra.mxu0 %v716_v61  ;;  %3073 = vmatpush.bf16.msra.mxu1 %v716_v61  ;;  %v376_v13 = vld [vmem:[#allocation4 + $0x40] sm:$0xff]  ;;  %v438_v14 = vadd.f32 %v368_v8, %v298_v60  ;;  %v358_v24 = vld [vmem:[#allocation2 + $0x1e0] sm:$0xff]  ;;  %v591_v40 = vunpack.c.h.bf16 %v3331_v34 }
  0x22   : > { %v583_v11 = vunpack.c.l.bf16 %v3352_v63  ;;  %v3361_v15 = vadd.f32 %v369_v9, %v299_v1  ;;  %v445_v17 = vadd.f32 %v375_v10, %v305_v2  ;;  %3074 = vmatpush.bf16.msra.mxu2 %v716_v61  ;;  %3075 = vmatpush.bf16.msra.mxu3 %v716_v61  ;;  %v709_v18 = vpack.c.bf16 %v667_v4, %v660_v62  ;;  %v359_v30 = vld [vmem:[#allocation2 + $0x1e8] sm:$0xff]  ;;  %v365_v31 = vld [vmem:[#allocation2 + $0x218] sm:$0xff]  ;;  %v366_v32 = vld [vmem:[#allocation2 + $0x220] sm:$0xff] }
  0x23   : > { %5351 = vst [vmem:[#allocation8_spill] sm:$0xff] %v3358_v7  ;;  %v646_v19 = vsub.f32 %v466_v38, %v576_v5  ;;  %v3364_v21 = vpack.c.bf16 %v3355_v6, %v459_v0  ;;  %v562_v22 = vunpack.c.l.bf16 %v3358_v7  ;;  %v3373_v26 = vadd.f32 %v376_v13, %v306_v3  ;;  %v428_v36 = vld [vmem:[#allocation4 + $0x1e0] sm:$0xff]  ;;  %v429_v37 = vld [vmem:[#allocation4 + $0x1e8] sm:$0xff]  ;;  %v435_v38 = vld [vmem:[#allocation4 + $0x218] sm:$0xff] }
  0x24   : > { %v653_v25 = vsub.f32 %v473_v43, %v583_v11  ;;  %v3376_v27 = vpack.c.bf16 %v3361_v15, %v438_v14  ;;  %v3379_v29 = vsub.f32 %v3316_v12, %v612_v39  ;;  %v598_v43 = vunpack.c.h.bf16 %v3335_v41  ;;  %v436_v46 = vld [vmem:[#allocation4 + $0x220] sm:$0xff]  ;;  %v357_v52 = vld [vmem:[#allocation2 + $0x1d8] sm:$0xff]  ;;  %v363_v54 = vld [vmem:[#allocation2 + $0x208] sm:$0xff] }
  0x25   : > { %5352 = vst [vmem:[#allocation9_spill] sm:$0xff] %v3364_v21  ;;  %v569_v33 = vunpack.c.l.bf16 %v3364_v21  ;;  %v632_v35 = vsub.f32 %v452_v58, %v562_v22  ;;  %848 = vmatpush.bf16.msra.mxu0 %v709_v18  ;;  %3076 = vmatpush.bf16.msra.mxu1 %v709_v18  ;;  %v3385_v12 = vpack.c.bf16 %v3373_v26, %v445_v17  ;;  %v356_v47 = vld [vmem:[#allocation2 + $0x1d0] sm:$0xff]  ;;  %v426_v56 = vld [vmem:[#allocation4 + $0x1d0] sm:$0xff]  ;;  %v427_v1 = vld [vmem:[#allocation4 + $0x1d8] sm:$0xff] }
  0x26   : > { %v702_v44 = vpack.c.bf16 %v653_v25, %v646_v19  ;;  %v548_v39 = vunpack.c.l.bf16 %v3376_v27  ;;  %3077 = vmatpush.bf16.msra.mxu2 %v709_v18  ;;  %3078 = vmatpush.bf16.msra.mxu3 %v709_v18  ;;  %v498_v50 = vadd.f32 %v428_v36, %v358_v24  ;;  %v3396_v51 = vadd.f32 %v429_v37, %v359_v30  ;;  %v364_v62 = vld [vmem:[#allocation2 + $0x210] sm:$0xff]  ;;  %v433_v2 = vld [vmem:[#allocation4 + $0x208] sm:$0xff]  ;;  %v434_v8 = vld [vmem:[#allocation4 + $0x210] sm:$0xff] }
  0x27   : > { %v639_v48 = vsub.f32 %v459_v0, %v569_v33  ;;  %v555_v57 = vunpack.c.l.bf16 %v3385_v12  ;;  %v505_v60 = vadd.f32 %v435_v38, %v365_v31  ;;  %v3399_v61 = vadd.f32 %v436_v46, %v366_v32  ;;  %v344_v9 = vld [vmem:[#allocation2 + $0x170] sm:$0xff]  ;;  %v345_v10 = vld [vmem:[#allocation2 + $0x178] sm:$0xff]  ;;  %v351_v18 = vld [vmem:[#allocation2 + $0x1a8] sm:$0xff] }
  0x28   : > { %v618_v58 = vsub.f32 %v438_v14, %v548_v39  ;;  %v3402_v3 = vpack.c.bf16 %v3396_v51, %v498_v50  ;;  %v3405_v4 = vsub.f32 %v3323_v23, %v591_v40  ;;  %v3408_v5 = vsub.f32 %v3326_v28, %v598_v43  ;;  %v414_v19 = vld [vmem:[#allocation4 + $0x170] sm:$0xff]  ;;  %v415_v22 = vld [vmem:[#allocation4 + $0x178] sm:$0xff]  ;;  %v352_v30 = vld [vmem:[#allocation2 + $0x1b0] sm:$0xff] }
  0x29   : > { %v695_v0 = vpack.c.bf16 %v639_v48, %v632_v35  ;;  %849 = vmatpush.bf16.msra.mxu0 %v702_v44  ;;  %3079 = vmatpush.bf16.msra.mxu1 %v702_v44  ;;  %v625_v11 = vsub.f32 %v445_v17, %v555_v57  ;;  %v3411_v13 = vpack.c.bf16 %v3399_v61, %v505_v60  ;;  %v421_v31 = vld [vmem:[#allocation4 + $0x1a8] sm:$0xff]  ;;  %v422_v32 = vld [vmem:[#allocation4 + $0x1b0] sm:$0xff] }
  0x2a   : > { %5354 = vst [vmem:[#allocation10_spill] sm:$0xff] %v3402_v3  ;;  %v496_v14 = vadd.f32 %v426_v56, %v356_v47  ;;  %3080 = vmatpush.bf16.msra.mxu2 %v702_v44  ;;  %3081 = vmatpush.bf16.msra.mxu3 %v702_v44  ;;  %v608_v28 = vunpack.c.l.bf16 %v3402_v3  ;;  %v497_v25 = vadd.f32 %v427_v1, %v357_v52  ;;  %v342_v39 = vld [vmem:[#allocation2 + $0x160] sm:$0xff]  ;;  %v412_v52 = vld [vmem:[#allocation4 + $0x160] sm:$0xff]  ;;  %v584_v56 = vunpack.c.h.bf16 %v3352_v63  ;;  %v419_v1 = vld [vmem:[#allocation4 + $0x198] sm:$0xff] }
  0x2b   : > { %v503_v17 = vadd.f32 %v433_v2, %v363_v54  ;;  %v688_v33 = vpack.c.bf16 %v625_v11, %v618_v58  ;;  %v615_v35 = vunpack.c.l.bf16 %v3411_v13  ;;  %v504_v36 = vadd.f32 %v434_v8, %v364_v62  ;;  %v413_v54 = vld [vmem:[#allocation4 + $0x168] sm:$0xff]  ;;  %v330_v23 = vld [vmem:[#allocation2 + $0x100] sm:$0xff] }
  0x2c   : > { %v484_v37 = vadd.f32 %v414_v19, %v344_v9  ;;  %v678_v38 = vsub.f32 %v498_v50, %v608_v28  ;;  %v3419_v40 = vpack.c.bf16 %v497_v25, %v496_v14  ;;  %v3421_v43 = vadd.f32 %v415_v22, %v345_v10  ;;  %v343_v50 = vld [vmem:[#allocation2 + $0x168] sm:$0xff]  ;;  %v3446_v19 = vld [vmem:[%s3428_s13] sm:$0xff]  ;;  %v3449_v22 = vld [vmem:[%s3428_s13 + $0x18] sm:$0xff] }
  0x2d   : > { %v491_v44 = vadd.f32 %v421_v31, %v351_v18  ;;  %850 = vmatpush.bf16.msra.mxu0 %v695_v0  ;;  %3082 = vmatpush.bf16.msra.mxu1 %v695_v0  ;;  %v685_v46 = vsub.f32 %v505_v60, %v615_v35  ;;  %v3430_v47 = vpack.c.bf16 %v504_v36, %v503_v17  ;;  %v349_v60 = vld [vmem:[#allocation2 + $0x198] sm:$0xff]  ;;  %v420_v18 = vld [vmem:[#allocation4 + $0x1a0] sm:$0xff] }
  0x2e   : > { %5355 = vst [vmem:[#allocation11_spill] sm:$0xff] %v3419_v40  ;;  %v3432_v48 = vadd.f32 %v422_v32, %v352_v30  ;;  %3083 = vmatpush.bf16.msra.mxu2 %v695_v0  ;;  %3084 = vmatpush.bf16.msra.mxu3 %v695_v0  ;;  %v606_v57 = vunpack.c.l.bf16 %v3419_v40  ;;  %v607_v58 = vunpack.c.h.bf16 %v3419_v40  ;;  %v3438_v62 = vpack.c.bf16 %v3421_v43, %v484_v37  ;;  %v350_v0 = vld [vmem:[#allocation2 + $0x1a0] sm:$0xff]  ;;  %v3453_v35 = vld [vmem:[%s3428_s13 + $0x30] sm:$0xff]  ;;  %v399_v40 = vld [vmem:[#allocation4 + $0xf8] sm:$0xff] }
  0x2f   : > { %5356 = vst [vmem:[#allocation12_spill] sm:$0xff] %v3430_v47  ;;  %v482_v2 = vadd.f32 %v412_v52, %v342_v39  ;;  %v720_v8 = vpack.c.bf16 %v685_v46, %v678_v38  ;;  %v613_v9 = vunpack.c.l.bf16 %v3430_v47  ;;  %v614_v10 = vunpack.c.h.bf16 %v3430_v47  ;;  %v3456_v38 = vld [vmem:[%s3428_s13 + $0x40] sm:$0xff] }
  0x30   : > { %v3443_v11 = vpack.c.bf16 %v3432_v48, %v491_v44  ;;  %v676_v28 = vsub.f32 %v496_v14, %v606_v57  ;;  %v677_v30 = vsub.f32 %v497_v25, %v607_v58  ;;  %v594_v31 = vunpack.c.l.bf16 %v3438_v62  ;;  %5357 = vst [vmem:[#allocation13_spill] sm:$0xff] %v3453_v35  ;;  %v331_v57 = vld [vmem:[#allocation2 + $0x108] sm:$0xff] }
  0x31   : > { %v483_v32 = vadd.f32 %v413_v54, %v343_v50  ;;  %851 = vmatpush.bf16.msra.mxu0 %v688_v33  ;;  %3085 = vmatpush.bf16.msra.mxu1 %v688_v33  ;;  %5358 = vst [vmem:[#allocation14_spill] sm:$0xff] %v3456_v38  ;;  %v683_v39 = vsub.f32 %v503_v17, %v613_v9  ;;  %v337_v50 = vld [vmem:[#allocation2 + $0x138] sm:$0xff]  ;;  %v400_v54 = vld [vmem:[#allocation4 + $0x100] sm:$0xff] }
  0x32   : > { %v684_v46 = vsub.f32 %v504_v36, %v614_v10  ;;  %v601_v52 = vunpack.c.l.bf16 %v3443_v11  ;;  %v489_v24 = vadd.f32 %v419_v1, %v349_v60  ;;  %3086 = vmatpush.bf16.msra.mxu2 %v688_v33  ;;  %3087 = vmatpush.bf16.msra.mxu3 %v688_v33  ;;  %v664_v45 = vsub.f32 %v484_v37, %v594_v31  ;;  %v338_v1 = vld [vmem:[#allocation2 + $0x140] sm:$0xff]  ;;  %v401_v9 = vld [vmem:[#allocation4 + $0x108] sm:$0xff]  ;;  %v407_v33 = vld [vmem:[#allocation4 + $0x138] sm:$0xff] }
  0x33   : > { %v490_v14 = vadd.f32 %v420_v18, %v350_v0  ;;  %v3459_v25 = vpack.c.bf16 %v483_v32, %v482_v2  ;;  %v5360_v47 = vpack.c.bf16 %v3379_v29, %v3342_v53  ;;  %v718_v17 = vpack.c.bf16 %v683_v39, %v676_v28  ;;  %v328_v0 = vld [vmem:[#allocation2 + $0xf0] sm:$0xff]  ;;  %v329_v18 = vld [vmem:[#allocation2 + $0xf8] sm:$0xff]  ;;  %v335_v39 = vld [vmem:[#allocation2 + $0x128] sm:$0xff] }
  0x34   : > { %v719_v36 = vpack.c.bf16 %v684_v46, %v677_v30  ;;  %v671_v60 = vsub.f32 %v491_v44, %v601_v52  ;;  %2801 = vmatmul.msk.bf16.vlgmr.msra.gmra.mxu0 %vm813_vm0, %v3446_v19  ;;  %2804 = vmatmul.msk.bf16.vlgmr.msra.gmra.mxu1 %vm813_vm0, %v3449_v22  ;;  %v654_v30 = vsub.f32 %v3340_v49, %v584_v56  ;;  %v336_v46 = vld [vmem:[#allocation2 + $0x130] sm:$0xff]  ;;  %v398_v52 = vld [vmem:[#allocation4 + $0xf0] sm:$0xff]  ;;  %v321_v37 = vld [vmem:[#allocation2 + $0xb8] sm:$0xff] }
  0x35   : > { %5359 = vst [vmem:[#allocation15_spill] sm:$0xff] %v3459_v25  ;;  %906 = vmatpush.bf16.msrb.mxu1 %v5360_v47  ;;  %1083 = vmatpush.bf16.msrb.mxu0 %v720_v8  ;;  %v3470_v10 = vpack.c.bf16 %v490_v14, %v489_v24  ;;  %v592_v53 = vunpack.c.l.bf16 %v3459_v25  ;;  %v593_v29 = vunpack.c.h.bf16 %v3459_v25  ;;  %v5362_v47 = vunpack.c.h.bf16 %v3346_v55  ;;  %v408_v8 = vld [vmem:[#allocation4 + $0x140] sm:$0xff] }
  0x36   : > { %2807 = vmatmul.msk.bf16.vlgmr.msra.gmra.mxu2 %vm813_vm0, %v3453_v35  ;;  %2809 = vmatmul.msk.bf16.vlgmr.msra.gmra.mxu3 %vm813_vm0, %v3456_v38  ;;  %v713_v28 = vpack.c.bf16 %v671_v60, %v664_v45  ;;  %v470_v31 = vadd.f32 %v400_v54, %v330_v23  ;;  %v405_v35 = vld [vmem:[#allocation4 + $0x128] sm:$0xff]  ;;  %v406_v38 = vld [vmem:[#allocation4 + $0x130] sm:$0xff]  ;;  %v5363_v49 = vpack.c.bf16 %v3408_v5, %v3405_v4 }
  0x37   : > { %5361 = vst [vmem:[#allocation16_spill] sm:$0xff] %v3470_v10  ;;  %v647_v44 = vsub.f32 %v3337_v42, %v5362_v47  ;;  %965 = vmatpush.bf16.msrb.mxu2 %v718_v17  ;;  %1024 = vmatpush.bf16.msrb.mxu3 %v719_v36  ;;  %v599_v42 = vunpack.c.l.bf16 %v3470_v10  ;;  %v662_v47 = vsub.f32 %v482_v2, %v592_v53  ;;  %v600_v58 = vunpack.c.h.bf16 %v3470_v10  ;;  %v314_v54 = vld [vmem:[#allocation2 + $0x80] sm:$0xff]  ;;  %v384_v17 = vld [vmem:[#allocation4 + $0x80] sm:$0xff]  ;;  %v385_v10 = vld [vmem:[#allocation4 + $0x88] sm:$0xff] }
  0x38   : > { %v663_v25 = vsub.f32 %v483_v32, %v593_v29  ;;  %v3488_v23 = vadd.f32 %v401_v9, %v331_v57  ;;  %v477_v56 = vadd.f32 %v407_v33, %v337_v50  ;;  %v3491_v53 = vadd.f32 %v408_v8, %v338_v1  ;;  %v315_v29 = vld [vmem:[#allocation2 + $0x88] sm:$0xff]  ;;  %v322_v9 = vld [vmem:[#allocation2 + $0xc0] sm:$0xff]  ;;  %v392_v33 = vld [vmem:[#allocation4 + $0xc0] sm:$0xff] }
  0x39   : > { %907 = vmatpush.bf16.msrb.mxu1 %v5363_v49  ;;  %1084 = vmatpush.bf16.msrb.mxu0 %v713_v28  ;;  %v703_v45 = vpack.c.bf16 %v654_v30, %v647_v44  ;;  %v669_v2 = vsub.f32 %v489_v24, %v599_v42  ;;  %v670_v60 = vsub.f32 %v490_v14, %v600_v58  ;;  %v391_v50 = vld [vmem:[#allocation4 + $0xb8] sm:$0xff]  ;;  %v308_v36 = vld [vmem:[#allocation2 + $0x50] sm:$0xff] }
  0x3a   : > { %5364 = vst [vmem:[#allocation17_spill] sm:$0xff] %v3488_v23  ;;  %v468_v32 = vadd.f32 %v398_v52, %v328_v0  ;;  %v3494_v4 = vpack.c.bf16 %v3488_v23, %v470_v31  ;;  %v469_v5 = vadd.f32 %v399_v40, %v329_v18  ;;  %v475_v44 = vadd.f32 %v405_v35, %v335_v39 }
  0x3b   : > { %5365 = vst [vmem:[#allocation18_spill] sm:$0xff] %v3491_v53  ;;  %v476_v57 = vadd.f32 %v406_v38, %v336_v46  ;;  %v711_v28 = vpack.c.bf16 %v669_v2, %v662_v47  ;;  %v712_v30 = vpack.c.bf16 %v670_v60, %v663_v25  ;;  %v3497_v24 = vpack.c.bf16 %v3491_v53, %v477_v56  ;;  %v3515_v47 = vld [vmem:[%s3428_s13 + $0x20] sm:$0xff] }
  0x3c   : > { %v454_v14 = vadd.f32 %v384_v17, %v314_v54  ;;  %v580_v58 = vunpack.c.l.bf16 %v3494_v4  ;;  %v3500_v1 = vpack.c.bf16 %v469_v5, %v468_v32  ;;  %v455_v40 = vadd.f32 %v385_v10, %v315_v29  ;;  %v3512_v10 = vld [vmem:[%s3428_s13 + $0x8] sm:$0xff]  ;;  %v300_v17 = vld [vmem:[#allocation2 + $0x10] sm:$0xff] }
  0x3d   : > { %908 = vmatpush.bf16.msrb.mxu1 %v703_v45  ;;  %v3502_v8 = vpack.c.bf16 %v476_v57, %v475_v44  ;;  %966 = vmatpush.bf16.msrb.mxu2 %v711_v28  ;;  %v587_v35 = vunpack.c.l.bf16 %v3497_v24  ;;  %v461_v38 = vadd.f32 %v391_v50, %v321_v37  ;;  %v462_v25 = vadd.f32 %v392_v33, %v322_v9  ;;  %v301_v33 = vld [vmem:[#allocation2 + $0x18] sm:$0xff]  ;;  %v370_v28 = vld [vmem:[#allocation4 + $0x10] sm:$0xff] }
  0x3e   : > { %5366 = vst [vmem:[#allocation19_spill] sm:$0xff] %v3500_v1  ;;  %1025 = vmatpush.bf16.msrb.mxu3 %v712_v30  ;;  %v5368_v0 = vunpack.c.h.bf16 %v3358_v7  ;;  %v650_v39 = vsub.f32 %v470_v31, %v580_v58  ;;  %v578_v46 = vunpack.c.l.bf16 %v3500_v1  ;;  %v579_v42 = vunpack.c.h.bf16 %v3500_v1  ;;  %v3526_v31 = vld [vmem:[%s3428_s13 + $0x48] sm:$0xff]  ;;  %v377_v1 = vld [vmem:[#allocation4 + $0x48] sm:$0xff] }
  0x3f   : > { %5367 = vst [vmem:[#allocation20_spill] sm:$0xff] %v3502_v8  ;;  %v585_v52 = vunpack.c.l.bf16 %v3502_v8  ;;  %v657_v49 = vsub.f32 %v477_v56, %v587_v35  ;;  %v586_v45 = vunpack.c.h.bf16 %v3502_v8  ;;  %v3518_v37 = vpack.c.bf16 %v455_v40, %v454_v14  ;;  %v307_v56 = vld [vmem:[#allocation2 + $0x48] sm:$0xff] }
  0x40   : > { %v633_v18 = vsub.f32 %v3348_v59, %v5368_v0  ;;  %v3520_v54 = vpack.c.bf16 %v462_v25, %v461_v38  ;;  %v3523_v59 = vld [vmem:[%s3428_s13 + $0x38] sm:$0xff]  ;;  %5372 = vst [vmem:[#allocation24_spill] sm:$0xff] %v3526_v31  ;;  %v648_v2 = vsub.f32 %v468_v32, %v578_v46  ;;  %v649_v29 = vsub.f32 %v469_v5, %v579_v42  ;;  %v371_v8 = vld [vmem:[#allocation4 + $0x18] sm:$0xff]  ;;  %v378_v46 = vld [vmem:[#allocation4 + $0x50] sm:$0xff] }
  0x41   : > { %5369 = vst [vmem:[#allocation21_spill] sm:$0xff] %v3518_v37  ;;  %v655_v60 = vsub.f32 %v475_v44, %v585_v52  ;;  %v5373_v9 = vunpack.c.h.bf16 %v3364_v21  ;;  %v706_v30 = vpack.c.bf16 %v657_v49, %v650_v39  ;;  %v656_v58 = vsub.f32 %v476_v57, %v586_v45  ;;  %v317_v52 = vld [vmem:[#allocation2 + $0x98] sm:$0xff]  ;;  %v323_v45 = vld [vmem:[#allocation2 + $0xc8] sm:$0xff]  ;;  %v386_v21 = vld [vmem:[#allocation4 + $0x90] sm:$0xff] }
  0x42   : > { %5370 = vst [vmem:[#allocation22_spill] sm:$0xff] %v3520_v54  ;;  %v564_v35 = vunpack.c.l.bf16 %v3518_v37  ;;  %v571_v0 = vunpack.c.l.bf16 %v3520_v54  ;;  %v565_v32 = vunpack.c.h.bf16 %v3518_v37  ;;  %v572_v5 = vunpack.c.h.bf16 %v3520_v54  ;;  %v393_v37 = vld [vmem:[#allocation4 + $0xc8] sm:$0xff]  ;;  %v394_v54 = vld [vmem:[#allocation4 + $0xd0] sm:$0xff] }
  0x43   : > { %5371 = vst [vmem:[#allocation23_spill] sm:$0xff] %v3523_v59  ;;  %v640_v50 = vsub.f32 %v3355_v6, %v5373_v9  ;;  %v704_v7 = vpack.c.bf16 %v655_v60, %v648_v2  ;;  %v316_v6 = vld [vmem:[#allocation2 + $0x90] sm:$0xff]  ;;  %1085 = vmatpush.bf16.msrb.mxu0 %v706_v30  ;;  %v705_v42 = vpack.c.bf16 %v656_v58, %v649_v29  ;;  %v387_v60 = vld [vmem:[#allocation4 + $0x98] sm:$0xff]  ;;  %v302_v29 = vld [vmem:[#allocation2 + $0x20] sm:$0xff] }
  0x44   : > { %v634_v39 = vsub.f32 %v454_v14, %v564_v35  ;;  %v641_v57 = vsub.f32 %v461_v38, %v571_v0  ;;  %v440_v49 = vadd.f32 %v370_v28, %v300_v17  ;;  %v324_v9 = vld [vmem:[#allocation2 + $0xd0] sm:$0xff]  ;;  %v635_v53 = vsub.f32 %v455_v40, %v565_v32  ;;  %2802 = vmatmul.msk.bf16.gmra.mxu0 %vm813_vm0, %v3512_v10  ;;  %v303_v28 = vld [vmem:[#allocation2 + $0x28] sm:$0xff]  ;;  %v309_v30 = vld [vmem:[#allocation2 + $0x58] sm:$0xff] }
  0x45   : > { %v696_v44 = vpack.c.bf16 %v640_v50, %v633_v18  ;;  %967 = vmatpush.bf16.msrb.mxu2 %v704_v7  ;;  %v642_v23 = vsub.f32 %v462_v25, %v572_v5  ;;  %v441_v2 = vadd.f32 %v371_v8, %v301_v33  ;;  %2805 = vmatmul.msk.bf16.gmra.mxu1 %vm813_vm0, %v3515_v47  ;;  %v1360_v7 = vunpack.c.l.b16 %v3321_v20  ;;  %v372_v58 = vld [vmem:[#allocation4 + $0x20] sm:$0xff]  ;;  %v310_v5 = vld [vmem:[#allocation2 + $0x60] sm:$0xff]  ;;  %v367_v18 = vld [vmem:[#allocation2 + $0x228] sm:$0xff] }
  0x46   : > { %v697_v14 = vpack.c.bf16 %v641_v57, %v634_v39  ;;  %v447_v38 = vadd.f32 %v377_v1, %v307_v56  ;;  %v448_v17 = vadd.f32 %v378_v46, %v308_v36  ;;  %2808 = vmatmul.msk.bf16.gmra.mxu2 %vm813_vm0, %v3523_v59  ;;  %2810 = vmatmul.msk.bf16.gmra.mxu3 %vm813_vm0, %v3526_v31  ;;  %v609_v50 = vunpack.c.h.bf16 %v3402_v3  ;;  %v360_v39 = vld [vmem:[#allocation2 + $0x1f0] sm:$0xff] }
  0x47   : > { %909 = vmatpush.bf16.msrb.mxu1 %v696_v44  ;;  %v698_v8 = vpack.c.bf16 %v642_v23, %v635_v53  ;;  %v3545_v40 = vpack.c.bf16 %v441_v2, %v440_v49  ;;  %v456_v25 = vadd.f32 %v386_v21, %v316_v6  ;;  %1026 = vmatpush.bf16.msrb.mxu3 %v705_v42  ;;  %v5376_v21 = vunpack.c.h.bf16 %v3376_v27  ;;  %v380_v42 = vld [vmem:[#allocation4 + $0x60] sm:$0xff] }
  0x48   : > { %v3548_v33 = vpack.c.bf16 %v448_v17, %v447_v38  ;;  %v3550_v1 = vadd.f32 %v387_v60, %v317_v52  ;;  %v463_v36 = vadd.f32 %v393_v37, %v323_v45  ;;  %v3552_v56 = vadd.f32 %v394_v54, %v324_v9  ;;  %v373_v37 = vld [vmem:[#allocation4 + $0x28] sm:$0xff]  ;;  %v379_v54 = vld [vmem:[#allocation4 + $0x58] sm:$0xff] }
  0x49   : > { %5374 = vst [vmem:[#allocation25_spill] sm:$0xff] %v3545_v40  ;;  %968 = vmatpush.bf16.msrb.mxu2 %v697_v14  ;;  %v550_v23 = vunpack.c.l.bf16 %v3545_v40  ;;  %v551_v53 = vunpack.c.h.bf16 %v3545_v40  ;;  %v619_v35 = vsub.f32 %v3361_v15, %v5376_v21  ;;  %v5377_v0 = vunpack.c.h.bf16 %v3385_v12  ;;  %v430_v15 = vld [vmem:[#allocation4 + $0x1f0] sm:$0xff] }
  0x4a   : > { %5375 = vst [vmem:[#allocation26_spill] sm:$0xff] %v3548_v33  ;;  %v557_v44 = vunpack.c.l.bf16 %v3548_v33  ;;  %v558_v46 = vunpack.c.h.bf16 %v3548_v33  ;;  %v3565_v6 = vpack.c.bf16 %v3550_v1, %v456_v25  ;;  %v3568_v52 = vpack.c.bf16 %v3552_v56, %v463_v36  ;;  %v437_v33 = vld [vmem:[#allocation4 + $0x228] sm:$0xff] }
  0x4b   : > { %v626_v32 = vsub.f32 %v3373_v26, %v5377_v0  ;;  %v620_v57 = vsub.f32 %v440_v49, %v550_v23  ;;  %v621_v45 = vsub.f32 %v441_v2, %v551_v53  ;;  %v442_v26 = vadd.f32 %v372_v58, %v302_v29  ;;  %1027 = vmatpush.bf16.msrb.mxu3 %v698_v8 }
  0x4c   : > { %v627_v60 = vsub.f32 %v447_v38, %v557_v44  ;;  %v628_v14 = vsub.f32 %v448_v17, %v558_v46  ;;  %v566_v21 = vunpack.c.l.bf16 %v3565_v6  ;;  %v573_v0 = vunpack.c.l.bf16 %v3568_v52 }
  0x4d   : > { %v689_v9 = vpack.c.bf16 %v626_v32, %v619_v35  ;;  %v3572_v40 = vadd.f32 %v373_v37, %v303_v28  ;;  %v449_v31 = vadd.f32 %v379_v54, %v309_v30  ;;  %v3574_v3 = vadd.f32 %v380_v42, %v310_v5  ;;  %v3599_v37 = vld [vmem:[%s3428_s13 + $0x28] sm:$0xff] }
  0x4e   : > { %v500_v59 = vadd.f32 %v430_v15, %v360_v39  ;;  %v690_v49 = vpack.c.bf16 %v627_v60, %v620_v57  ;;  %v691_v2 = vpack.c.bf16 %v628_v14, %v621_v45  ;;  %v636_v23 = vsub.f32 %v456_v25, %v566_v21 }
  0x4f   : > { %910 = vmatpush.bf16.msrb.mxu1 %v689_v9  ;;  %v643_v29 = vsub.f32 %v463_v36, %v573_v0  ;;  %v3577_v38 = vpack.c.bf16 %v3572_v40, %v442_v26  ;;  %v3580_v17 = vpack.c.bf16 %v3574_v3, %v449_v31  ;;  %v507_v8 = vadd.f32 %v437_v33, %v367_v18  ;;  %v3596_v33 = vld [vmem:[%s3428_s13 + $0x10] sm:$0xff] }
  0x50   : > { %v3582_v58 = vpack.c.bf16 %v500_v59, %v500_v59  ;;  %969 = vmatpush.bf16.msrb.mxu2 %v690_v49  ;;  %1028 = vmatpush.bf16.msrb.mxu3 %v691_v2  ;;  %v5378_v30 = vunpack.c.l.b16 %v3318_v16  ;;  %v616_v25 = vunpack.c.h.bf16 %v3411_v13  ;;  %v679_v36 = vsub.f32 %v3396_v51, %v609_v50 }
  0x51   : > { %v699_v28 = vpack.c.bf16 %v643_v29, %v636_v23  ;;  %v552_v35 = vunpack.c.l.bf16 %v3577_v38  ;;  %v559_v32 = vunpack.c.l.bf16 %v3580_v17  ;;  %v3592_v5 = vpack.c.bf16 %v507_v8, %v507_v8 }
  0x52   : > { %v3586_v53 = vpack.c.b16 %v1360_v7, %v5378_v30  ;;  %v610_v18 = vunpack.c.l.bf16 %v3582_v58  ;;  %v686_v7 = vsub.f32 %v3399_v61, %v616_v25  ;;  %v1354_v54 = vunpack.c.h.b16 %v3318_v16  ;;  %v353_v61 = vld [vmem:[#allocation2 + $0x1b8] sm:$0xff] }
  0x53   : > { %1086 = vmatpush.bf16.msrb.mxu0 %v699_v28  ;;  %v1361_v51 = vunpack.c.h.b16 %v3321_v20  ;;  %v622_v50 = vsub.f32 %v442_v26, %v552_v35  ;;  %v629_v44 = vsub.f32 %v449_v31, %v559_v32  ;;  %v617_v46 = vunpack.c.l.bf16 %v3592_v5  ;;  %v346_v20 = vld [vmem:[#allocation2 + $0x180] sm:$0xff]  ;;  %v423_v26 = vld [vmem:[#allocation4 + $0x1b8] sm:$0xff] }
  0x54   : > { %1440 = vmatpush.bf16.msra.mxu3 %v3586_v53  ;;  %v680_v42 = vsub.f32 %v500_v59, %v610_v18  ;;  %v721_v39 = vpack.c.bf16 %v686_v7, %v679_v36  ;;  %2803 = vmatmul.msk.bf16.gmra.mxu0 %vm813_vm0, %v3596_v33  ;;  %v416_v59 = vld [vmem:[#allocation4 + $0x180] sm:$0xff]  ;;  %v1339_v31 = vunpack.c.l.b16 %v3331_v34  ;;  %v1346_v9 = vunpack.c.l.b16 %v3335_v41 }
  0x55   : > { %v692_v15 = vpack.c.bf16 %v629_v44, %v622_v50  ;;  %v687_v57 = vsub.f32 %v507_v8, %v617_v46  ;;  %v3606_v45 = vpack.c.b16 %v1361_v51, %v1354_v54  ;;  %2806 = vmatmul.msk.bf16.gmra.mxu1 %vm813_vm0, %v3599_v37  ;;  %v486_v60 = vadd.f32 %v416_v59, %v346_v20  ;;  %v409_v50 = vld [vmem:[#allocation4 + $0x148] sm:$0xff] }
  0x56   : > { %2821 = vmatmul.msk.bf16.vlgmr.msrb.gmra.mxu2 %vm813_vm0, %v3446_v19  ;;  %2831 = vmatmul.msk.bf16.vlgmr.msrb.gmra.mxu3 %vm813_vm0, %v3446_v19  ;;  %v493_v14 = vadd.f32 %v423_v26, %v353_v61  ;;  %v3619_v21 = vpack.c.b16 %v1346_v9, %v1339_v31  ;;  %v595_v30 = vunpack.c.h.bf16 %v3438_v62  ;;  %v602_v25 = vunpack.c.h.bf16 %v3443_v11 }
  0x57   : > { %v722_v16 = vpack.c.bf16 %v687_v57, %v680_v42  ;;  %1087 = vmatpush.bf16.msrb.mxu0 %v692_v15  ;;  %1142 = vmatpush.bf16.msra.mxu1 %v721_v39  ;;  %v3621_v0 = vpack.c.bf16 %v486_v60, %v486_v60  ;;  %v1340_v36 = vunpack.c.h.b16 %v3331_v34  ;;  %v1347_v35 = vunpack.c.h.b16 %v3335_v41  ;;  %v332_v34 = vld [vmem:[#allocation2 + $0x110] sm:$0xff]  ;;  %v339_v41 = vld [vmem:[#allocation2 + $0x148] sm:$0xff] }
  0x58   : > { %v3623_v49 = vpack.c.bf16 %v493_v14, %v493_v14  ;;  %1441 = vmatpush.bf16.msra.mxu3 %v3619_v21  ;;  %v665_v32 = vsub.f32 %v3421_v43, %v595_v30  ;;  %v672_v18 = vsub.f32 %v3432_v48, %v602_v25  ;;  %v402_v43 = vld [vmem:[#allocation4 + $0x110] sm:$0xff]  ;;  %v1325_v48 = vunpack.c.l.b16 %v3346_v55  ;;  %v388_v30 = vld [vmem:[#allocation4 + $0xa0] sm:$0xff] }
  0x59   : > { %1201 = vmatpush.bf16.msra.mxu2 %v722_v16  ;;  %v596_v2 = vunpack.c.l.bf16 %v3621_v0  ;;  %v3642_v7 = vpack.c.b16 %v1347_v35, %v1340_v36  ;;  %v1332_v51 = vunpack.c.l.b16 %v3352_v63  ;;  %v472_v44 = vadd.f32 %v402_v43, %v332_v34  ;;  %v5381_v25 = vld [vmem:[#allocation8_spill] sm:$0xff]  ;;  %v5382_v35 = vld [vmem:[#allocation9_spill] sm:$0xff] }
  0x5a   : > { %v603_v23 = vunpack.c.l.bf16 %v3623_v49  ;;  %v714_v54 = vpack.c.bf16 %v672_v18, %v665_v32  ;;  %v479_v46 = vadd.f32 %v409_v50, %v339_v41  ;;  %v581_v31 = vunpack.c.h.bf16 %v3494_v4  ;;  %v395_v18 = vld [vmem:[#allocation4 + $0xd8] sm:$0xff] }
  0x5b   : > { %1499 = vmatpush.bf16.msra.mxu0 %v3606_v45  ;;  %v666_v29 = vsub.f32 %v486_v60, %v596_v2  ;;  %v3655_v42 = vpack.c.b16 %v1332_v51, %v1325_v48  ;;  %v3657_v39 = vpack.c.bf16 %v472_v44, %v472_v44  ;;  %v588_v9 = vunpack.c.h.bf16 %v3497_v24 }
  0x5c   : > { %v673_v8 = vsub.f32 %v493_v14, %v603_v23  ;;  %1143 = vmatpush.bf16.msra.mxu1 %v714_v54  ;;  %v3659_v15 = vpack.c.bf16 %v479_v46, %v479_v46  ;;  %v1326_v26 = vunpack.c.h.b16 %v3346_v55  ;;  %v1333_v60 = vunpack.c.h.b16 %v3352_v63  ;;  %v5379_v14 = vld [vmem:[#allocation17_spill] sm:$0xff]  ;;  %v5380_v23 = vld [vmem:[#allocation18_spill] sm:$0xff]  ;;  %v318_v55 = vld [vmem:[#allocation2 + $0xa0] sm:$0xff] }
  0x5d   : > { %1442 = vmatpush.bf16.msra.mxu3 %v3655_v42  ;;  %v582_v57 = vunpack.c.l.bf16 %v3657_v39  ;;  %v651_v2 = vsub.f32 %v5379_v14, %v581_v31  ;;  %v325_v63 = vld [vmem:[#allocation2 + $0xd8] sm:$0xff]  ;;  %v1311_v36 = vunpack.c.l.b16 %v5381_v25  ;;  %v1318_v32 = vunpack.c.l.b16 %v5382_v35 }
  0x5e   : > { %v715_v28 = vpack.c.bf16 %v673_v8, %v666_v29  ;;  %v589_v16 = vunpack.c.l.bf16 %v3659_v15  ;;  %v658_v29 = vsub.f32 %v5380_v23, %v588_v9  ;;  %v3678_v8 = vpack.c.b16 %v1333_v60, %v1326_v26  ;;  %v5384_v23 = vld [vmem:[#allocation13_spill] sm:$0xff] }
  0x5f   : > { %1500 = vmatpush.bf16.msra.mxu0 %v3642_v7  ;;  %v652_v20 = vsub.f32 %v472_v44, %v582_v57  ;;  %v458_v54 = vadd.f32 %v388_v30, %v318_v55  ;;  %v465_v34 = vadd.f32 %v395_v18, %v325_v63  ;;  %v3691_v41 = vpack.c.b16 %v1318_v32, %v1311_v36  ;;  %v304_v55 = vld [vmem:[#allocation2 + $0x30] sm:$0xff]  ;;  %v311_v63 = vld [vmem:[#allocation2 + $0x68] sm:$0xff]  ;;  %v374_v30 = vld [vmem:[#allocation4 + $0x30] sm:$0xff] }
  0x60   : > { %1202 = vmatpush.bf16.msra.mxu2 %v715_v28  ;;  %v659_v61 = vsub.f32 %v479_v46, %v589_v16  ;;  %v707_v28 = vpack.c.bf16 %v658_v29, %v651_v2  ;;  %v567_v16 = vunpack.c.h.bf16 %v3565_v6  ;;  %v1304_v36 = vunpack.c.l.b16 %v3385_v12 }
  0x61   : > { %v3693_v43 = vpack.c.bf16 %v458_v54, %v458_v54  ;;  %v3695_v48 = vpack.c.bf16 %v465_v34, %v465_v34  ;;  %1443 = vmatpush.bf16.msra.mxu3 %v3691_v41  ;;  %v444_v32 = vadd.f32 %v374_v30, %v304_v55  ;;  %v560_v55 = vunpack.c.h.bf16 %v3580_v17 }
  0x62   : > { %v708_v59 = vpack.c.bf16 %v659_v61, %v652_v20  ;;  %1144 = vmatpush.bf16.msra.mxu1 %v707_v28  ;;  %v574_v20 = vunpack.c.h.bf16 %v3568_v52  ;;  %v1312_v61 = vunpack.c.h.b16 %v5381_v25  ;;  %v637_v31 = vsub.f32 %v3550_v1, %v567_v16 }
  0x63   : > { %1501 = vmatpush.bf16.msra.mxu0 %v3678_v8  ;;  %v568_v51 = vunpack.c.l.bf16 %v3693_v43  ;;  %v575_v50 = vunpack.c.l.bf16 %v3695_v48  ;;  %v1297_v25 = vunpack.c.l.b16 %v3376_v27  ;;  %v1305_v30 = vunpack.c.h.b16 %v3385_v12 }
  0x64   : > { %2841 = vmatmul.msk.bf16.vlgmr.msrb.gmra.mxu0 %vm813_vm0, %v3446_v19  ;;  %1203 = vmatpush.bf16.msra.mxu2 %v708_v59  ;;  %v1319_v59 = vunpack.c.h.b16 %v5382_v35  ;;  %v644_v9 = vsub.f32 %v3552_v56, %v574_v20  ;;  %v381_v35 = vld [vmem:[#allocation4 + $0x68] sm:$0xff] }
  0x65   : > { %2811 = vmatmul.msk.bf16.vlgmr.msrb.gmra.mxu1 %vm813_vm0, %v3446_v19  ;;  %v638_v44 = vsub.f32 %v458_v54, %v568_v51  ;;  %v645_v46 = vsub.f32 %v465_v34, %v575_v50  ;;  %v451_v18 = vadd.f32 %v381_v35, %v311_v63  ;;  %v3739_v54 = vpack.c.b16 %v1304_v36, %v1297_v25 }
  0x66   : > { %2822 = vmatmul.msk.bf16.gmra.mxu2 %vm813_vm0, %v3512_v10  ;;  %2832 = vmatmul.msk.bf16.gmra.mxu3 %vm813_vm0, %v3512_v10  ;;  %v3714_v26 = vpack.c.b16 %v1319_v59, %v1312_v61  ;;  %v700_v60 = vpack.c.bf16 %v644_v9, %v637_v31  ;;  %v3741_v34 = vpack.c.bf16 %v444_v32, %v444_v32  ;;  %v5391_v9 = vld [vmem:[#allocation23_spill] sm:$0xff]  ;;  %v1298_v63 = vunpack.c.h.b16 %v3376_v27 }
  0x67   : > { %v701_v57 = vpack.c.bf16 %v645_v46, %v638_v44  ;;  %v3743_v51 = vpack.c.bf16 %v451_v18, %v451_v18  ;;  %1444 = vmatpush.bf16.msra.mxu3 %v3739_v54  ;;  %v630_v36 = vsub.f32 %v3574_v3, %v560_v55 }
  0x68   : > { %1502 = vmatpush.bf16.msra.mxu0 %v3714_v26  ;;  %1145 = vmatpush.bf16.msra.mxu1 %v700_v60  ;;  %v554_v50 = vunpack.c.l.bf16 %v3741_v34  ;;  %v553_v60 = vunpack.c.h.bf16 %v3577_v38 }
  0x69   : > { %1204 = vmatpush.bf16.msra.mxu2 %v701_v57  ;;  %v561_v44 = vunpack.c.l.bf16 %v3743_v51 }
  0x6a   : > { %v624_v16 = vsub.f32 %v444_v32, %v554_v50  ;;  %v623_v25 = vsub.f32 %v3572_v40, %v553_v60 }
  0x6b   : > { %v631_v59 = vsub.f32 %v451_v18, %v561_v44 }
  0x6c   : > { %v693_v44 = vpack.c.bf16 %v630_v36, %v623_v25  ;;  %v5404_v25 = vld [vmem:[#allocation12_spill] sm:$0xff] }
  0x6d   : > { %v694_v31 = vpack.c.bf16 %v631_v59, %v624_v16  ;;  %v5399_v16 = vld [vmem:[#allocation14_spill] sm:$0xff]  ;;  %v1363_v36 = vunpack.c.h.b16 %v5404_v25 }
  0x6e   : > { %1146 = vmatpush.bf16.msra.mxu1 %v693_v44  ;;  %v5405_v44 = vld [vmem:[#allocation10_spill] sm:$0xff] }
  0x6f   : > { %1205 = vmatpush.bf16.msra.mxu2 %v694_v31 }
  0x74   : > { %2842 = vmatmul.msk.bf16.gmra.mxu0 %vm813_vm0, %v3512_v10 }
  0x75   : > { %2812 = vmatmul.msk.bf16.gmra.mxu1 %vm813_vm0, %v3512_v10 }
  0x76   : > { %2823 = vmatmul.msk.bf16.gmra.mxu2 %vm813_vm0, %v3596_v33  ;;  %2833 = vmatmul.msk.bf16.gmra.mxu3 %vm813_vm0, %v3596_v33 }
  0x84   : > { %2843 = vmatmul.msk.bf16.gmra.mxu0 %vm813_vm0, %v3596_v33 }
  0x85   : > { %2813 = vmatmul.msk.bf16.gmra.mxu1 %vm813_vm0, %v3596_v33 }
  0x86   : > { %2824 = vmatmul.msk.bf16.gmra.mxu2 %vm813_vm0, %v3449_v22  ;;  %2834 = vmatmul.msk.bf16.gmra.mxu3 %vm813_vm0, %v3449_v22 }
  0x94   : > { %2844 = vmatmul.msk.bf16.gmra.mxu0 %vm813_vm0, %v3449_v22 }
  0x95   : > { %2814 = vmatmul.msk.bf16.gmra.mxu1 %vm813_vm0, %v3449_v22 }
  0x96   : > { %2825 = vmatmul.msk.bf16.gmra.mxu2 %vm813_vm0, %v3515_v47  ;;  %2835 = vmatmul.msk.bf16.gmra.mxu3 %vm813_vm0, %v3515_v47 }
  0xa4   : > { %2845 = vmatmul.msk.bf16.gmra.mxu0 %vm813_vm0, %v3515_v47 }
  0xa5   : > { %2815 = vmatmul.msk.bf16.gmra.mxu1 %vm813_vm0, %v3515_v47 }
  0xa6   : > { %2826 = vmatmul.msk.bf16.gmra.mxu2 %vm813_vm0, %v3599_v37  ;;  %2836 = vmatmul.msk.bf16.gmra.mxu3 %vm813_vm0, %v3599_v37 }
  0xb1   : > { %v3717_v14 = vpop.f32.mrf.mxu0  ;;  %v3719_v2 = vpop.f32.mrf.mxu1 }
  0xb2   : > { %5383 = vst [vmem:[#allocation17_spill] sm:$0xff] %v3719_v2 }
  0xb4   : > { %2846 = vmatmul.msk.bf16.gmra.mxu0 %vm813_vm0, %v3599_v37 }
  0xb5   : > { %2816 = vmatmul.msk.bf16.gmra.mxu1 %vm813_vm0, %v3599_v37 }
  0xb6   : > { %2827 = vmatmul.msk.bf16.gmra.mxu2 %vm813_vm0, %v5384_v23  ;;  %2837 = vmatmul.msk.bf16.gmra.mxu3 %vm813_vm0, %v5384_v23 }
  0xb9   : > { %v3729_v1 = vpop.f32.mrf.mxu2  ;;  %v3731_v56 = vpop.f32.mrf.mxu3 }
  0xba   : > { %5385 = vst [vmem:[#allocation18_spill] sm:$0xff] %v3729_v1  ;;  %v3733_v29 = vpop.f32.mrf.mxu0  ;;  %v3735_v28 = vpop.f32.mrf.mxu1 }
  0xbb   : > { %5386 = vst [vmem:[#allocation8_spill] sm:$0xff] %v3731_v56 }
  0xbc   : > { %5387 = vst [vmem:[#allocation9_spill] sm:$0xff] %v3735_v28 }
  0xc1   : > { %v3748_v46 = vpop.f32.mrf.mxu2  ;;  %v3750_v57 = vpop.f32.mrf.mxu3 }
  0xc2   : > { %5388 = vst [vmem:[#allocation13_spill] sm:$0xff] %v3748_v46  ;;  %v3752_v20 = vpop.f32.mrf.mxu0  ;;  %v3754_v61 = vpop.f32.mrf.mxu1 }
  0xc3   : > { %5389 = vst [vmem:[#allocation27_spill] sm:$0xff] %v3750_v57 }
  0xc4   : > { %5390 = vst [vmem:[#allocation28_spill] sm:$0xff] %v3754_v61  ;;  %2847 = vmatmul.msk.bf16.gmra.mxu0 %vm813_vm0, %v5384_v23  ;;  %v1350_v61 = vunpack.c.l.b16 %v3443_v11 }
  0xc5   : > { %2817 = vmatmul.msk.bf16.gmra.mxu1 %vm813_vm0, %v5384_v23  ;;  %v3770_v23 = vpack.c.b16 %v1305_v30, %v1298_v63  ;;  %v5403_v63 = vld [vmem:[#allocation11_spill] sm:$0xff] }
  0xc6   : > { %2828 = vmatmul.msk.bf16.gmra.mxu2 %vm813_vm0, %v5391_v9  ;;  %2838 = vmatmul.msk.bf16.gmra.mxu3 %vm813_vm0, %v5391_v9  ;;  %v1356_v30 = vunpack.c.h.b16 %v5403_v63 }
  0xc7   : > { %1503 = vmatpush.bf16.msra.mxu0 %v3770_v23 }
  0xc8   : > { %v3809_v57 = vpack.c.b16 %v1363_v36, %v1356_v30  ;;  %v1362_v30 = vunpack.c.l.b16 %v5404_v25  ;;  %v1358_v36 = vunpack.c.h.b16 %v5405_v44 }
  0xc9   : > { %v3772_v35 = vpop.f32.mrf.mxu2  ;;  %v3774_v32 = vpop.f32.mrf.mxu3 }
  0xca   : > { %5392 = vst [vmem:[#allocation23_spill] sm:$0xff] %v3772_v35  ;;  %v3776_v18 = vpop.f32.mrf.mxu0  ;;  %v3778_v50 = vpop.f32.mrf.mxu1  ;;  %1617 = vmatpush.bf16.msrb.mxu2 %v3809_v57 }
  0xcb   : > { %5393 = vst [vmem:[#allocation29_spill] sm:$0xff] %v3774_v32  ;;  %v1364_v32 = vunpack.c.l.b16 %v3411_v13 }
  0xcc   : > { %5394 = vst [vmem:[#allocation30_spill] sm:$0xff] %v3778_v50 }
  0xd1   : > { %v3781_v27 = vpop.f32.mrf.mxu2  ;;  %v3783_v12 = vpop.f32.mrf.mxu3 }
  0xd2   : > { %5395 = vst [vmem:[#allocation31_spill] sm:$0xff] %v3781_v27  ;;  %v3785_v40 = vpop.f32.mrf.mxu0  ;;  %v3787_v3 = vpop.f32.mrf.mxu1 }
  0xd3   : > { %5396 = vst [vmem:[#allocation32_spill] sm:$0xff] %v3783_v12  ;;  %v1357_v12 = vunpack.c.l.b16 %v5405_v44 }
  0xd4   : > { %5397 = vst [vmem:[#allocation33_spill] sm:$0xff] %v3785_v40  ;;  %2848 = vmatmul.msk.bf16.gmra.mxu0 %vm813_vm0, %v5391_v9 }
  0xd5   : > { %5398 = vst [vmem:[#allocation34_spill] sm:$0xff] %v3787_v3  ;;  %2818 = vmatmul.msk.bf16.gmra.mxu1 %vm813_vm0, %v5391_v9  ;;  %v3811_v56 = vpack.c.b16 %v1364_v32, %v1357_v12  ;;  %v5408_v32 = vld [vmem:[#allocation24_spill] sm:$0xff]  ;;  %v1355_v12 = vunpack.c.l.b16 %v5403_v63 }
  0xd6   : > { %2829 = vmatmul.msk.bf16.gmra.mxu2 %vm813_vm0, %v5399_v16  ;;  %2839 = vmatmul.msk.bf16.gmra.mxu3 %vm813_vm0, %v5399_v16 }
  0xd7   : > { %1676 = vmatpush.bf16.msrb.mxu3 %v3811_v56 }
  0xd9   : > { %v3797_v59 = vpop.f32.mrf.mxu2  ;;  %v3799_v31 = vpop.f32.mrf.mxu3 }
  0xda   : > { %5400 = vst [vmem:[#allocation14_spill] sm:$0xff] %v3799_v31  ;;  %v3801_v60 = vpop.f32.mrf.mxu0  ;;  %v3803_v55 = vpop.f32.mrf.mxu1 }
  0xdb   : > { %5401 = vst [vmem:[#allocation35_spill] sm:$0xff] %v3801_v60 }
  0xdc   : > { %5402 = vst [vmem:[#allocation36_spill] sm:$0xff] %v3803_v55 }
  0xe1   : > { %v3815_v31 = vpop.f32.mrf.mxu2  ;;  %v3817_v27 = vpop.f32.mrf.mxu3 }
  0xe2   : > { %5406 = vst [vmem:[#allocation11_spill] sm:$0xff] %v3817_v27  ;;  %v3819_v35 = vpop.f32.mrf.mxu1  ;;  %v3821_v46 = vpop.f32.mrf.mxu0  ;;  %v1365_v27 = vunpack.c.h.b16 %v3411_v13 }
  0xe3   : > { %5407 = vst [vmem:[#allocation12_spill] sm:$0xff] %v3821_v46  ;;  %v3835_v46 = vpack.c.b16 %v1362_v30, %v1355_v12 }
  0xe4   : > { %2849 = vmatmul.msk.bf16.gmra.mxu0 %vm813_vm0, %v5399_v16  ;;  %v3837_v1 = vpack.c.b16 %v1365_v27, %v1358_v36 }
  0xe5   : > { %2819 = vmatmul.msk.bf16.gmra.mxu1 %vm813_vm0, %v5399_v16 }
  0xe6   : > { %2830 = vmatmul.msk.bf16.gmra.mxu2 %vm813_vm0, %v5408_v32  ;;  %2840 = vmatmul.msk.bf16.gmra.mxu3 %vm813_vm0, %v5408_v32 }
  0xe7   : > { %1558 = vmatpush.bf16.msrb.mxu1 %v3835_v46  ;;  %1735 = vmatpush.bf16.msrb.mxu0 %v3837_v1 }
  0xe9   : > { %v3839_v55 = vpop.f32.mrf.mxu2  ;;  %v3841_v16 = vpop.f32.mrf.mxu3 }
  0xea   : > { %5409 = vst [vmem:[#allocation10_spill] sm:$0xff] %v3839_v55  ;;  %v3843_v3 = vpop.f32.mrf.mxu1  ;;  %v3845_v50 = vpop.f32.mrf.mxu0 }
  0xeb   : > { %5410 = vst [vmem:[#allocation24_spill] sm:$0xff] %v3841_v16 }
  0xec   : > { %5411 = vst [vmem:[#allocation37_spill] sm:$0xff] %v3845_v50 }
  0xf1   : > { %v3849_v63 = vpop.f32.mrf.mxu2  ;;  %v3851_v25 = vpop.f32.mrf.mxu3 }
  0xf2   : > { %5412 = vst [vmem:[#allocation38_spill] sm:$0xff] %v3849_v63  ;;  %v3853_v13 = vpop.f32.mrf.mxu1  ;;  %v3855_v27 = vpop.f32.mrf.mxu0 }
  0xf3   : > { %5413 = vst [vmem:[#allocation39_spill] sm:$0xff] %v3851_v25  ;;  %v5419_v25 = vld [vmem:[#allocation15_spill] sm:$0xff] }
  0xf4   : > { %5414 = vst [vmem:[#allocation40_spill] sm:$0xff] %v3855_v27  ;;  %2850 = vmatmul.msk.bf16.gmra.mxu0 %vm813_vm0, %v5408_v32  ;;  %v1342_v16 = vunpack.c.h.b16 %v5419_v25  ;;  %v5420_v27 = vld [vmem:[#allocation16_spill] sm:$0xff] }
  0xf5   : > { %2820 = vmatmul.msk.bf16.gmra.mxu1 %vm813_vm0, %v5408_v32  ;;  %v1349_v50 = vunpack.c.h.b16 %v5420_v27  ;;  %v1343_v32 = vunpack.c.l.b16 %v3438_v62 }
  0xf6   : > { %2861 = vmatmul.msk.bf16.vlgmr.msra.gmra.mxu2 %vm813_vm0, %v3446_v19  ;;  %2871 = vmatmul.msk.bf16.vlgmr.msra.gmra.mxu3 %vm813_vm0, %v3446_v19 }
  0xf7   : > { %v3877_v28 = vpack.c.b16 %v1349_v50, %v1342_v16  ;;  %v3879_v2 = vpack.c.b16 %v1350_v61, %v1343_v32  ;;  %v1341_v61 = vunpack.c.l.b16 %v5419_v25  ;;  %v1348_v50 = vunpack.c.l.b16 %v5420_v27 }
  0xf8   : > { %v1344_v16 = vunpack.c.h.b16 %v3438_v62  ;;  %v1351_v32 = vunpack.c.h.b16 %v3443_v11 }
  0xf9   : > { %v3865_v44 = vpop.f32.mrf.mxu2  ;;  %v3867_v12 = vpop.f32.mrf.mxu3  ;;  %1618 = vmatpush.bf16.msrb.mxu2 %v3877_v28  ;;  %1677 = vmatpush.bf16.msrb.mxu3 %v3879_v2 }
  0xfa   : > { %5415 = vst [vmem:[#allocation41_spill] sm:$0xff] %v3865_v44  ;;  %v3869_v30 = vpop.f32.mrf.mxu1  ;;  %v3871_v36 = vpop.f32.mrf.mxu0 }
  0xfb   : > { %5416 = vst [vmem:[#allocation42_spill] sm:$0xff] %v3867_v12 }
  0xfc   : > { %5417 = vst [vmem:[#allocation43_spill] sm:$0xff] %v3869_v30 }
  0xfd   : > { %5418 = vst [vmem:[#allocation44_spill] sm:$0xff] %v3871_v36 }
 0x101   : > { %v3883_v12 = vpop.f32.mrf.mxu2  ;;  %v3885_v44 = vpop.f32.mrf.mxu3 }
 0x102   : > { %5421 = vst [vmem:[#allocation15_spill] sm:$0xff] %v3883_v12  ;;  %v3887_v36 = vpop.f32.mrf.mxu1  ;;  %v3889_v60 = vpop.f32.mrf.mxu0 }
 0x103   : > { %5422 = vst [vmem:[#allocation16_spill] sm:$0xff] %v3885_v44  ;;  %v3903_v44 = vpack.c.b16 %v1348_v50, %v1341_v61 }
 0x104   : > { %5423 = vst [vmem:[#allocation45_spill] sm:$0xff] %v3887_v36  ;;  %2881 = vmatmul.msk.bf16.vlgmr.msra.gmra.mxu0 %vm813_vm0, %v3446_v19 }
 0x105   : > { %5424 = vst [vmem:[#allocation46_spill] sm:$0xff] %v3889_v60  ;;  %2851 = vmatmul.msk.bf16.vlgmr.msra.gmra.mxu1 %vm813_vm0, %v3446_v19  ;;  %v3905_v60 = vpack.c.b16 %v1351_v32, %v1344_v16 }
 0x106   : > { %2862 = vmatmul.msk.bf16.gmra.mxu2 %vm813_vm0, %v3512_v10  ;;  %2872 = vmatmul.msk.bf16.gmra.mxu3 %vm813_vm0, %v3512_v10 }
 0x107   : > { %1559 = vmatpush.bf16.msrb.mxu1 %v3903_v44  ;;  %1736 = vmatpush.bf16.msrb.mxu0 %v3905_v60 }
 0x109   : > { %v3907_v12 = vpop.f32.mrf.mxu2  ;;  %v3909_v19 = vpop.f32.mrf.mxu3 }
 0x10a   : > { %5425 = vst [vmem:[#allocation47_spill] sm:$0xff] %v3907_v12  ;;  %v3911_v63 = vpop.f32.mrf.mxu1  ;;  %v3913_v36 = vpop.f32.mrf.mxu0 }
 0x10b   : > { %5426 = vst [vmem:[#allocation48_spill] sm:$0xff] %v3909_v19 }
 0x10c   : > { %5427 = vst [vmem:[#allocation49_spill] sm:$0xff] %v3911_v63 }
 0x10d   : > { %5428 = vst [vmem:[#allocation50_spill] sm:$0xff] %v3913_v36 }
 0x111   : > { %v3917_v25 = vpop.f32.mrf.mxu2  ;;  %v3919_v62 = vpop.f32.mrf.mxu3 }
 0x112   : > { %5429 = vst [vmem:[#allocation51_spill] sm:$0xff] %v3917_v25  ;;  %v3921_v11 = vpop.f32.mrf.mxu1  ;;  %v3923_v27 = vpop.f32.mrf.mxu0  ;;  %v1336_v25 = vunpack.c.l.b16 %v3497_v24 }
 0x113   : > { %5430 = vst [vmem:[#allocation52_spill] sm:$0xff] %v3919_v62  ;;  %v5437_v62 = vld [vmem:[#allocation19_spill] sm:$0xff] }
 0x114   : > { %5431 = vst [vmem:[#allocation53_spill] sm:$0xff] %v3921_v11  ;;  %2882 = vmatmul.msk.bf16.gmra.mxu0 %vm813_vm0, %v3512_v10  ;;  %v1328_v19 = vunpack.c.h.b16 %v5437_v62 }
 0x115   : > { %5432 = vst [vmem:[#allocation54_spill] sm:$0xff] %v3923_v27  ;;  %2852 = vmatmul.msk.bf16.gmra.mxu1 %vm813_vm0, %v3512_v10  ;;  %v5438_v27 = vld [vmem:[#allocation20_spill] sm:$0xff]  ;;  %v1329_v10 = vunpack.c.l.b16 %v3494_v4 }
 0x116   : > { %2863 = vmatmul.msk.bf16.gmra.mxu2 %vm813_vm0, %v3596_v33  ;;  %2873 = vmatmul.msk.bf16.gmra.mxu3 %vm813_vm0, %v3596_v33  ;;  %v1335_v36 = vunpack.c.h.b16 %v5438_v27 }
 0x117   : > { %v3947_v11 = vpack.c.b16 %v1336_v25, %v1329_v10  ;;  %v1330_v25 = vunpack.c.h.b16 %v3494_v4  ;;  %v1337_v10 = vunpack.c.h.b16 %v3497_v24 }
 0x118   : > { %v3945_v12 = vpack.c.b16 %v1335_v36, %v1328_v19  ;;  %v1327_v36 = vunpack.c.l.b16 %v5437_v62  ;;  %v1334_v19 = vunpack.c.l.b16 %v5438_v27 }
 0x119   : > { %v3933_v61 = vpop.f32.mrf.mxu2  ;;  %v3935_v50 = vpop.f32.mrf.mxu3  ;;  %1678 = vmatpush.bf16.msrb.mxu3 %v3947_v11 }
 0x11a   : > { %5433 = vst [vmem:[#allocation55_spill] sm:$0xff] %v3933_v61  ;;  %v3937_v16 = vpop.f32.mrf.mxu1  ;;  %v3939_v32 = vpop.f32.mrf.mxu0  ;;  %1619 = vmatpush.bf16.msrb.mxu2 %v3945_v12 }
 0x11b   : > { %5434 = vst [vmem:[#allocation56_spill] sm:$0xff] %v3935_v50 }
 0x11c   : > { %5435 = vst [vmem:[#allocation57_spill] sm:$0xff] %v3937_v16 }
 0x11d   : > { %5436 = vst [vmem:[#allocation58_spill] sm:$0xff] %v3939_v32 }
 0x121   : > { %v3951_v50 = vpop.f32.mrf.mxu2  ;;  %v3953_v61 = vpop.f32.mrf.mxu3 }
 0x122   : > { %5439 = vst [vmem:[#allocation19_spill] sm:$0xff] %v3951_v50  ;;  %v3955_v32 = vpop.f32.mrf.mxu1  ;;  %v3957_v16 = vpop.f32.mrf.mxu0 }
 0x123   : > { %5440 = vst [vmem:[#allocation20_spill] sm:$0xff] %v3953_v61  ;;  %v3971_v61 = vpack.c.b16 %v1334_v19, %v1327_v36  ;;  %v3994_v36 = vld [vmem:[%s3428_s13 + $0x18] sm:$0xff] }
 0x124   : > { %5441 = vst [vmem:[#allocation59_spill] sm:$0xff] %v3955_v32  ;;  %2883 = vmatmul.msk.bf16.gmra.mxu0 %vm813_vm0, %v3596_v33 }
 0x125   : > { %5442 = vst [vmem:[#allocation60_spill] sm:$0xff] %v3957_v16  ;;  %2853 = vmatmul.msk.bf16.gmra.mxu1 %vm813_vm0, %v3596_v33  ;;  %v3973_v16 = vpack.c.b16 %v1337_v10, %v1330_v25 }
 0x126   : > { %2864 = vmatmul.msk.bf16.gmra.mxu2 %vm813_vm0, %v3449_v22  ;;  %2874 = vmatmul.msk.bf16.gmra.mxu3 %vm813_vm0, %v3449_v22 }
 0x127   : > { %1560 = vmatpush.bf16.msrb.mxu1 %v3971_v61  ;;  %1737 = vmatpush.bf16.msrb.mxu0 %v3973_v16 }
 0x129   : > { %v3975_v50 = vpop.f32.mrf.mxu2  ;;  %v3977_v32 = vpop.f32.mrf.mxu3 }
 0x12a   : > { %5443 = vst [vmem:[#allocation61_spill] sm:$0xff] %v3975_v50  ;;  %v3979_v63 = vpop.f32.mrf.mxu1  ;;  %v3981_v22 = vpop.f32.mrf.mxu0  ;;  %v1315_v50 = vunpack.c.l.b16 %v3565_v6 }
 0x12b   : > { %5444 = vst [vmem:[#allocation62_spill] sm:$0xff] %v3977_v32  ;;  %v5455_v32 = vld [vmem:[#allocation21_spill] sm:$0xff] }
 0x12c   : > { %5445 = vst [vmem:[#allocation63_spill] sm:$0xff] %v3979_v63 }
 0x12d   : > { %5446 = vst [vmem:[#allocation64_spill] sm:$0xff] %v3981_v22  ;;  %v5456_v22 = vld [vmem:[#allocation22_spill] sm:$0xff] }
 0x131   : > { %v3985_v62 = vpop.f32.mrf.mxu2  ;;  %v3987_v4 = vpop.f32.mrf.mxu3 }
 0x132   : > { %5447 = vst [vmem:[#allocation65_spill] sm:$0xff] %v3985_v62  ;;  %v3989_v24 = vpop.f32.mrf.mxu1  ;;  %v3991_v27 = vpop.f32.mrf.mxu0  ;;  %v1321_v62 = vunpack.c.h.b16 %v5456_v22 }
 0x133   : > { %5448 = vst [vmem:[#allocation66_spill] sm:$0xff] %v3987_v4 }
 0x134   : > { %5449 = vst [vmem:[#allocation67_spill] sm:$0xff] %v3989_v24  ;;  %2884 = vmatmul.msk.bf16.gmra.mxu0 %vm813_vm0, %v3994_v36  ;;  %v1322_v24 = vunpack.c.l.b16 %v3568_v52 }
 0x135   : > { %5450 = vst [vmem:[#allocation68_spill] sm:$0xff] %v3991_v27  ;;  %2854 = vmatmul.msk.bf16.gmra.mxu1 %vm813_vm0, %v3994_v36  ;;  %v1314_v27 = vunpack.c.h.b16 %v5455_v32 }
 0x136   : > { %2865 = vmatmul.msk.bf16.gmra.mxu2 %vm813_vm0, %v3515_v47  ;;  %2875 = vmatmul.msk.bf16.gmra.mxu3 %vm813_vm0, %v3515_v47  ;;  %v4018_v40 = vpack.c.b16 %v1322_v24, %v1315_v50  ;;  %v1313_v50 = vunpack.c.l.b16 %v5455_v32  ;;  %v1316_v24 = vunpack.c.h.b16 %v3565_v6 }
 0x137   : > { %v4016_v63 = vpack.c.b16 %v1321_v62, %v1314_v27  ;;  %v1320_v62 = vunpack.c.l.b16 %v5456_v22  ;;  %v1323_v27 = vunpack.c.h.b16 %v3568_v52 }
 0x138   : > { %1679 = vmatpush.bf16.msrb.mxu3 %v4018_v40 }
 0x139   : > { %v4004_v19 = vpop.f32.mrf.mxu2  ;;  %v4006_v25 = vpop.f32.mrf.mxu3  ;;  %1620 = vmatpush.bf16.msrb.mxu2 %v4016_v63 }
 0x13a   : > { %5451 = vst [vmem:[#allocation69_spill] sm:$0xff] %v4004_v19  ;;  %v4008_v10 = vpop.f32.mrf.mxu1  ;;  %v4010_v4 = vpop.f32.mrf.mxu0 }
 0x13b   : > { %5452 = vst [vmem:[#allocation70_spill] sm:$0xff] %v4006_v25 }
 0x13c   : > { %5453 = vst [vmem:[#allocation71_spill] sm:$0xff] %v4008_v10 }
 0x13d   : > { %5454 = vst [vmem:[#allocation72_spill] sm:$0xff] %v4010_v4 }
 0x141   : > { %v4022_v25 = vpop.f32.mrf.mxu2  ;;  %v4024_v19 = vpop.f32.mrf.mxu3 }
 0x142   : > { %5457 = vst [vmem:[#allocation21_spill] sm:$0xff] %v4022_v25  ;;  %v4026_v4 = vpop.f32.mrf.mxu1  ;;  %v4028_v10 = vpop.f32.mrf.mxu0 }
 0x143   : > { %5458 = vst [vmem:[#allocation22_spill] sm:$0xff] %v4024_v19  ;;  %v4042_v19 = vpack.c.b16 %v1320_v62, %v1313_v50  ;;  %v4069_v50 = vld [vmem:[%s3428_s13 + $0x30] sm:$0xff] }
 0x144   : > { %5459 = vst [vmem:[#allocation73_spill] sm:$0xff] %v4026_v4  ;;  %2885 = vmatmul.msk.bf16.gmra.mxu0 %vm813_vm0, %v3515_v47 }
 0x145   : > { %5460 = vst [vmem:[#allocation74_spill] sm:$0xff] %v4028_v10  ;;  %2855 = vmatmul.msk.bf16.gmra.mxu1 %vm813_vm0, %v3515_v47  ;;  %v4044_v10 = vpack.c.b16 %v1323_v27, %v1316_v24 }
 0x146   : > { %2866 = vmatmul.msk.bf16.gmra.mxu2 %vm813_vm0, %v3599_v37  ;;  %2876 = vmatmul.msk.bf16.gmra.mxu3 %vm813_vm0, %v3599_v37 }
 0x147   : > { %1561 = vmatpush.bf16.msrb.mxu1 %v4042_v19  ;;  %1738 = vmatpush.bf16.msrb.mxu0 %v4044_v10 }
 0x149   : > { %v4046_v47 = vpop.f32.mrf.mxu2  ;;  %v4048_v25 = vpop.f32.mrf.mxu3 }
 0x14a   : > { %5461 = vst [vmem:[#allocation75_spill] sm:$0xff] %v4046_v47  ;;  %v4050_v4 = vpop.f32.mrf.mxu1  ;;  %v4052_v55 = vpop.f32.mrf.mxu0  ;;  %v1301_v47 = vunpack.c.l.b16 %v3577_v38 }
 0x14b   : > { %5462 = vst [vmem:[#allocation76_spill] sm:$0xff] %v4048_v25  ;;  %v5473_v25 = vld [vmem:[#allocation25_spill] sm:$0xff] }
 0x14c   : > { %5463 = vst [vmem:[#allocation77_spill] sm:$0xff] %v4050_v4 }
 0x14d   : > { %5464 = vst [vmem:[#allocation78_spill] sm:$0xff] %v4052_v55  ;;  %v5474_v55 = vld [vmem:[#allocation26_spill] sm:$0xff] }
 0x151   : > { %v4056_v6 = vpop.f32.mrf.mxu2  ;;  %v4058_v32 = vpop.f32.mrf.mxu3 }
 0x152   : > { %5465 = vst [vmem:[#allocation79_spill] sm:$0xff] %v4056_v6  ;;  %v4060_v52 = vpop.f32.mrf.mxu1  ;;  %v4062_v22 = vpop.f32.mrf.mxu0  ;;  %v1307_v6 = vunpack.c.h.b16 %v5474_v55 }
 0x153   : > { %5466 = vst [vmem:[#allocation80_spill] sm:$0xff] %v4058_v32 }
 0x154   : > { %5467 = vst [vmem:[#allocation81_spill] sm:$0xff] %v4060_v52  ;;  %2886 = vmatmul.msk.bf16.gmra.mxu0 %vm813_vm0, %v3599_v37  ;;  %v1308_v52 = vunpack.c.l.b16 %v3580_v17 }
 0x155   : > { %5468 = vst [vmem:[#allocation82_spill] sm:$0xff] %v4062_v22  ;;  %2856 = vmatmul.msk.bf16.gmra.mxu1 %vm813_vm0, %v3599_v37  ;;  %v1300_v22 = vunpack.c.h.b16 %v5473_v25 }
 0x156   : > { %2867 = vmatmul.msk.bf16.gmra.mxu2 %vm813_vm0, %v4069_v50  ;;  %2877 = vmatmul.msk.bf16.gmra.mxu3 %vm813_vm0, %v4069_v50  ;;  %v4089_v30 = vpack.c.b16 %v1308_v52, %v1301_v47 }
 0x157   : > { %v4087_v4 = vpack.c.b16 %v1307_v6, %v1300_v22 }
 0x158   : > { %1680 = vmatpush.bf16.msrb.mxu3 %v4089_v30 }
 0x159   : > { %v4075_v62 = vpop.f32.mrf.mxu2  ;;  %v4077_v24 = vpop.f32.mrf.mxu3  ;;  %1621 = vmatpush.bf16.msrb.mxu2 %v4087_v4 }
 0x15a   : > { %5469 = vst [vmem:[#allocation83_spill] sm:$0xff] %v4075_v62  ;;  %v4079_v27 = vpop.f32.mrf.mxu1  ;;  %v4081_v32 = vpop.f32.mrf.mxu0 }
 0x15b   : > { %5470 = vst [vmem:[#allocation84_spill] sm:$0xff] %v4077_v24 }
 0x15c   : > { %5471 = vst [vmem:[#allocation85_spill] sm:$0xff] %v4079_v27  ;;  %1992 = vmatpush.bf16.msra.mxu3 %v3606_v45  ;;  %v1306_v45 = vunpack.c.l.b16 %v5474_v55 }
 0x15d   : > { %5472 = vst [vmem:[#allocation86_spill] sm:$0xff] %v4081_v32  ;;  %1933 = vmatpush.bf16.msra.mxu2 %v3586_v53  ;;  %v1299_v53 = vunpack.c.l.b16 %v5473_v25 }
 0x15f   : > { %v1369_v47 = vpack.c.b16 %v1306_v45, %v1299_v53  ;;  %v1359_v53 = vunpack.c.l.b16 %v3582_v58  ;;  %v1366_v45 = vunpack.c.l.b16 %v3592_v5  ;;  %v4207_v58 = vld [vmem:[%s3428_s13] sm:$0xff] }
 0x160   : > { %1993 = vmatpush.bf16.msra.mxu3 %v3642_v7  ;;  %v1309_v7 = vunpack.c.h.b16 %v3580_v17 }
 0x161   : > { %v4095_v24 = vpop.f32.mrf.mxu2  ;;  %v4097_v32 = vpop.f32.mrf.mxu3  ;;  %1934 = vmatpush.bf16.msra.mxu2 %v3619_v21  ;;  %v1302_v21 = vunpack.c.h.b16 %v3577_v38  ;;  %1562 = vmatpush.bf16.msrb.mxu1 %v1369_v47 }
 0x162   : > { %5475 = vst [vmem:[#allocation25_spill] sm:$0xff] %v4095_v24  ;;  %v4099_v62 = vpop.f32.mrf.mxu1  ;;  %v4101_v27 = vpop.f32.mrf.mxu0 }
 0x163   : > { %5476 = vst [vmem:[#allocation26_spill] sm:$0xff] %v4097_v32  ;;  %v4119_v6 = vpack.c.b16 %v1309_v7, %v1302_v21  ;;  %v1401_v21 = vpack.c.b16 %v1366_v45, %v1359_v53 }
 0x164   : > { %5477 = vst [vmem:[#allocation87_spill] sm:$0xff] %v4099_v62  ;;  %2887 = vmatmul.msk.bf16.gmra.mxu0 %vm813_vm0, %v4069_v50  ;;  %1994 = vmatpush.bf16.msra.mxu3 %v3678_v8 }
 0x165   : > { %5478 = vst [vmem:[#allocation88_spill] sm:$0xff] %v4101_v27  ;;  %2857 = vmatmul.msk.bf16.gmra.mxu1 %vm813_vm0, %v4069_v50  ;;  %1935 = vmatpush.bf16.msra.mxu2 %v3655_v42 }
 0x166   : > { %2868 = vmatmul.msk.bf16.gmra.mxu2 %vm813_vm0, %v5391_v9  ;;  %2878 = vmatmul.msk.bf16.gmra.mxu3 %vm813_vm0, %v5391_v9 }
 0x167   : > { %1739 = vmatpush.bf16.msrb.mxu0 %v4119_v6  ;;  %1794 = vmatpush.bf16.msra.mxu1 %v1401_v21 }
 0x168   : > { %1995 = vmatpush.bf16.msra.mxu3 %v3714_v26 }
 0x169   : > { %v4121_v52 = vpop.f32.mrf.mxu2  ;;  %v4123_v22 = vpop.f32.mrf.mxu3  ;;  %1936 = vmatpush.bf16.msra.mxu2 %v3691_v41  ;;  %v4150_v41 = vld [vmem:[%s3428_s13 + $0x40] sm:$0xff] }
 0x16a   : > { %5479 = vst [vmem:[#allocation89_spill] sm:$0xff] %v4121_v52  ;;  %v4125_v32 = vpop.f32.mrf.mxu1  ;;  %v4127_v25 = vpop.f32.mrf.mxu0 }
 0x16b   : > { %5480 = vst [vmem:[#allocation90_spill] sm:$0xff] %v4123_v22  ;;  %2051 = vmatpush.bf16.msra.mxu0 %v3835_v46 }
 0x16c   : > { %5481 = vst [vmem:[#allocation91_spill] sm:$0xff] %v4125_v32  ;;  %1996 = vmatpush.bf16.msra.mxu3 %v3770_v23 }
 0x16d   : > { %5482 = vst [vmem:[#allocation92_spill] sm:$0xff] %v4127_v25  ;;  %1937 = vmatpush.bf16.msra.mxu2 %v3739_v54 }
 0x16f   : > { %2052 = vmatpush.bf16.msra.mxu0 %v3903_v44 }
 0x171   : > { %v4136_v38 = vpop.f32.mrf.mxu2  ;;  %v4138_v17 = vpop.f32.mrf.mxu3 }
 0x172   : > { %5483 = vst [vmem:[#allocation93_spill] sm:$0xff] %v4136_v38  ;;  %v4140_v42 = vpop.f32.mrf.mxu1  ;;  %v4142_v8 = vpop.f32.mrf.mxu0 }
 0x173   : > { %5484 = vst [vmem:[#allocation94_spill] sm:$0xff] %v4138_v17  ;;  %2053 = vmatpush.bf16.msra.mxu0 %v3971_v61 }
 0x174   : > { %5485 = vst [vmem:[#allocation95_spill] sm:$0xff] %v4140_v42  ;;  %2888 = vmatmul.msk.bf16.gmra.mxu0 %vm813_vm0, %v5391_v9 }
 0x175   : > { %5486 = vst [vmem:[#allocation96_spill] sm:$0xff] %v4142_v8  ;;  %2858 = vmatmul.msk.bf16.gmra.mxu1 %vm813_vm0, %v5391_v9 }
 0x176   : > { %2869 = vmatmul.msk.bf16.gmra.mxu2 %vm813_vm0, %v4150_v41  ;;  %2879 = vmatmul.msk.bf16.gmra.mxu3 %vm813_vm0, %v4150_v41 }
 0x177   : > { %2054 = vmatpush.bf16.msra.mxu0 %v4042_v19  ;;  %v4178_v19 = vld [vmem:[%s3428_s13 + $0x48] sm:$0xff] }
 0x179   : > { %v4157_v26 = vpop.f32.mrf.mxu2  ;;  %v4159_v54 = vpop.f32.mrf.mxu3 }
 0x17a   : > { %5487 = vst [vmem:[#allocation97_spill] sm:$0xff] %v4157_v26  ;;  %v4161_v46 = vpop.f32.mrf.mxu1  ;;  %v4163_v23 = vpop.f32.mrf.mxu0 }
 0x17b   : > { %5488 = vst [vmem:[#allocation98_spill] sm:$0xff] %v4161_v46  ;;  %2055 = vmatpush.bf16.msra.mxu0 %v1369_v47 }
 0x17c   : > { %5489 = vst [vmem:[#allocation99_spill] sm:$0xff] %v4163_v23 }
 0x181   : > { %v4165_v9 = vpop.f32.mrf.mxu2  ;;  %v4167_v55 = vpop.f32.mrf.mxu3 }
 0x182   : > { %5490 = vst [vmem:[#allocation100_spill] sm:$0xff] %v4165_v9  ;;  %v4169_v44 = vpop.f32.mrf.mxu1  ;;  %v4171_v61 = vpop.f32.mrf.mxu0 }
 0x183   : > { %5491 = vst [vmem:[#allocation101_spill] sm:$0xff] %v4169_v44 }
 0x184   : > { %2889 = vmatmul.msk.bf16.gmra.mxu0 %vm813_vm0, %v4150_v41 }
 0x185   : > { %2859 = vmatmul.msk.bf16.gmra.mxu1 %vm813_vm0, %v4150_v41 }
 0x186   : > { %2870 = vmatmul.msk.bf16.gmra.mxu2 %vm813_vm0, %v4178_v19  ;;  %2880 = vmatmul.msk.bf16.gmra.mxu3 %vm813_vm0, %v4178_v19 }
 0x189   : > { %v4186_v7 = vpop.f32.mrf.mxu2  ;;  %v4188_v47 = vpop.f32.mrf.mxu3 }
 0x18a   : > { %5492 = vst [vmem:[#allocation102_spill] sm:$0xff] %v4186_v7  ;;  %v4190_v17 = vpop.f32.mrf.mxu1  ;;  %v4192_v22 = vpop.f32.mrf.mxu0 }
 0x18b   : > { %5493 = vst [vmem:[#allocation103_spill] sm:$0xff] %v4190_v17 }
 0x191   : > { %v4194_v23 = vpop.f32.mrf.mxu2  ;;  %v4196_v8 = vpop.f32.mrf.mxu3 }
 0x192   : > { %5494 = vst [vmem:[#allocation104_spill] sm:$0xff] %v4194_v23  ;;  %v4198_v25 = vpop.f32.mrf.mxu1  ;;  %v4200_v27 = vpop.f32.mrf.mxu0 }
 0x193   : > { %5495 = vst [vmem:[#allocation105_spill] sm:$0xff] %v4198_v25 }
 0x194   : > { %2890 = vmatmul.msk.bf16.gmra.mxu0 %vm813_vm0, %v4178_v19 }
 0x195   : > { %2860 = vmatmul.msk.bf16.gmra.mxu1 %vm813_vm0, %v4178_v19 }
 0x196   : > { %2901 = vmatmul.msk.bf16.vlgmr.msrb.gmra.mxu2 %vm813_vm0, %v4207_v58  ;;  %2911 = vmatmul.msk.bf16.vlgmr.msrb.gmra.mxu3 %vm813_vm0, %v4207_v58 }
 0x197   : > { %2169 = vmatpush.bf16.msrb.mxu2 %v3811_v56  ;;  %2228 = vmatpush.bf16.msrb.mxu3 %v3837_v1 }
 0x199   : > { %v4215_v5 = vpop.f32.mrf.mxu2  ;;  %v4217_v53 = vpop.f32.mrf.mxu3 }
 0x19a   : > { %5496 = vst [vmem:[#allocation106_spill] sm:$0xff] %v4215_v5  ;;  %v4219_v45 = vpop.f32.mrf.mxu1  ;;  %v4221_v23 = vpop.f32.mrf.mxu0 }
 0x19b   : > { %5497 = vst [vmem:[#allocation107_spill] sm:$0xff] %v4219_v45  ;;  %2170 = vmatpush.bf16.msrb.mxu2 %v3879_v2  ;;  %2229 = vmatpush.bf16.msrb.mxu3 %v3905_v60  ;;  %v4242_v2 = vld [vmem:[%s3428_s13 + $0x8] sm:$0xff]  ;;  %v1345_v60 = vunpack.c.l.b16 %v3621_v0 }
 0x19f   : > { %2171 = vmatpush.bf16.msrb.mxu2 %v3947_v11  ;;  %2230 = vmatpush.bf16.msrb.mxu3 %v3973_v16 }
 0x1a1   : > { %v4227_v56 = vpop.f32.mrf.mxu2  ;;  %v4229_v1 = vpop.f32.mrf.mxu3 }
 0x1a2   : > { %5498 = vst [vmem:[#allocation108_spill] sm:$0xff] %v4227_v56  ;;  %v4231_v5 = vpop.f32.mrf.mxu1  ;;  %v4233_v7 = vpop.f32.mrf.mxu0 }
 0x1a3   : > { %5499 = vst [vmem:[#allocation109_spill] sm:$0xff] %v4231_v5  ;;  %2172 = vmatpush.bf16.msrb.mxu2 %v4018_v40  ;;  %2231 = vmatpush.bf16.msrb.mxu3 %v4044_v10  ;;  %v1352_v40 = vunpack.c.l.b16 %v3623_v49 }
 0x1a4   : > { %2921 = vmatmul.msk.bf16.vlgmr.msrb.gmra.mxu0 %vm813_vm0, %v4207_v58 }
 0x1a5   : > { %2891 = vmatmul.msk.bf16.vlgmr.msrb.gmra.mxu1 %vm813_vm0, %v4207_v58  ;;  %2287 = vmatpush.bf16.msrb.mxu0 %v1401_v21  ;;  %v1394_v11 = vpack.c.b16 %v1352_v40, %v1345_v60 }
 0x1a6   : > { %2902 = vmatmul.msk.bf16.gmra.mxu2 %vm813_vm0, %v4242_v2  ;;  %2912 = vmatmul.msk.bf16.gmra.mxu3 %vm813_vm0, %v4242_v2 }
 0x1a7   : > { %2173 = vmatpush.bf16.msrb.mxu2 %v4089_v30  ;;  %2232 = vmatpush.bf16.msrb.mxu3 %v4119_v6 }
 0x1a8   : > { %1795 = vmatpush.bf16.msra.mxu1 %v1394_v11 }
 0x1a9   : > { %v4252_v16 = vpop.f32.mrf.mxu2  ;;  %v4254_v10 = vpop.f32.mrf.mxu3  ;;  %2288 = vmatpush.bf16.msrb.mxu0 %v1394_v11 }
 0x1aa   : > { %5500 = vst [vmem:[#allocation110_spill] sm:$0xff] %v4252_v16  ;;  %v4256_v56 = vpop.f32.mrf.mxu1  ;;  %v4258_v5 = vpop.f32.mrf.mxu0 }
 0x1ab   : > { %5501 = vst [vmem:[#allocation111_spill] sm:$0xff] %v4256_v56 }
 0x1b1   : > { %v4260_v45 = vpop.f32.mrf.mxu2  ;;  %v4262_v0 = vpop.f32.mrf.mxu3 }
 0x1b2   : > { %5502 = vst [vmem:[#allocation112_spill] sm:$0xff] %v4260_v45  ;;  %v4264_v49 = vpop.f32.mrf.mxu1  ;;  %v4266_v30 = vpop.f32.mrf.mxu0 }
 0x1b3   : > { %5503 = vst [vmem:[#allocation113_spill] sm:$0xff] %v4264_v49 }
 0x1b4   : > { %2922 = vmatmul.msk.bf16.gmra.mxu0 %vm813_vm0, %v4242_v2 }
 0x1b5   : > { %2892 = vmatmul.msk.bf16.gmra.mxu1 %vm813_vm0, %v4242_v2 }
 0x1b6   : > { %2903 = vmatmul.msk.bf16.gmra.mxu2 %vm813_vm0, %v3596_v33  ;;  %2913 = vmatmul.msk.bf16.gmra.mxu3 %vm813_vm0, %v3596_v33 }
 0x1b9   : > { %v4276_v6 = vpop.f32.mrf.mxu2  ;;  %v4278_v21 = vpop.f32.mrf.mxu3 }
 0x1ba   : > { %5504 = vst [vmem:[#allocation114_spill] sm:$0xff] %v4276_v6  ;;  %v4280_v60 = vpop.f32.mrf.mxu1  ;;  %v4282_v40 = vpop.f32.mrf.mxu0  ;;  %v1338_v6 = vunpack.c.l.b16 %v3659_v15  ;;  %v4323_v15 = vld [vmem:[%s3428_s13 + $0x20] sm:$0xff] }
 0x1bb   : > { %5505 = vst [vmem:[#allocation115_spill] sm:$0xff] %v4280_v60 }
 0x1c1   : > { %v4284_v11 = vpop.f32.mrf.mxu2  ;;  %v4286_v45 = vpop.f32.mrf.mxu3 }
 0x1c2   : > { %5506 = vst [vmem:[#allocation116_spill] sm:$0xff] %v4284_v11  ;;  %v4288_v16 = vpop.f32.mrf.mxu1  ;;  %v4290_v49 = vpop.f32.mrf.mxu0  ;;  %v1331_v11 = vunpack.c.l.b16 %v3657_v39 }
 0x1c3   : > { %5507 = vst [vmem:[#allocation117_spill] sm:$0xff] %v4288_v16 }
 0x1c4   : > { %2923 = vmatmul.msk.bf16.gmra.mxu0 %vm813_vm0, %v3596_v33  ;;  %v1387_v16 = vpack.c.b16 %v1338_v6, %v1331_v11 }
 0x1c5   : > { %2893 = vmatmul.msk.bf16.gmra.mxu1 %vm813_vm0, %v3596_v33 }
 0x1c6   : > { %2904 = vmatmul.msk.bf16.gmra.mxu2 %vm813_vm0, %v3994_v36  ;;  %2914 = vmatmul.msk.bf16.gmra.mxu3 %vm813_vm0, %v3994_v36 }
 0x1c7   : > { %1796 = vmatpush.bf16.msra.mxu1 %v1387_v16  ;;  %2289 = vmatpush.bf16.msrb.mxu0 %v1387_v16 }
 0x1c9   : > { %v4302_v60 = vpop.f32.mrf.mxu2  ;;  %v4304_v56 = vpop.f32.mrf.mxu3 }
 0x1ca   : > { %5508 = vst [vmem:[#allocation118_spill] sm:$0xff] %v4302_v60  ;;  %v4306_v9 = vpop.f32.mrf.mxu1  ;;  %v4308_v25 = vpop.f32.mrf.mxu0 }
 0x1cb   : > { %5509 = vst [vmem:[#allocation119_spill] sm:$0xff] %v4306_v9 }
 0x1d1   : > { %v4310_v33 = vpop.f32.mrf.mxu2  ;;  %v4312_v26 = vpop.f32.mrf.mxu3 }
 0x1d2   : > { %5510 = vst [vmem:[#allocation120_spill] sm:$0xff] %v4310_v33  ;;  %v4314_v17 = vpop.f32.mrf.mxu1  ;;  %v4316_v39 = vpop.f32.mrf.mxu0 }
 0x1d3   : > { %5511 = vst [vmem:[#allocation121_spill] sm:$0xff] %v4314_v17 }
 0x1d4   : > { %2924 = vmatmul.msk.bf16.gmra.mxu0 %vm813_vm0, %v3994_v36 }
 0x1d5   : > { %2894 = vmatmul.msk.bf16.gmra.mxu1 %vm813_vm0, %v3994_v36 }
 0x1d6   : > { %2905 = vmatmul.msk.bf16.gmra.mxu2 %vm813_vm0, %v4323_v15  ;;  %2915 = vmatmul.msk.bf16.gmra.mxu3 %vm813_vm0, %v4323_v15 }
 0x1d9   : > { %v4329_v16 = vpop.f32.mrf.mxu2  ;;  %v4331_v6 = vpop.f32.mrf.mxu3 }
 0x1da   : > { %5512 = vst [vmem:[#allocation122_spill] sm:$0xff] %v4329_v16  ;;  %v4333_v11 = vpop.f32.mrf.mxu1  ;;  %v4335_v33 = vpop.f32.mrf.mxu0  ;;  %v1324_v16 = vunpack.c.l.b16 %v3695_v48  ;;  %v4372_v48 = vld [vmem:[%s3428_s13 + $0x28] sm:$0xff] }
 0x1db   : > { %5513 = vst [vmem:[#allocation123_spill] sm:$0xff] %v4331_v6  ;;  %v4623_v6 = vld [vmem:[%s4477_s18 + $0x28] sm:$0xff] }
 0x1dc   : > { %5514 = vst [vmem:[#allocation124_spill] sm:$0xff] %v4333_v11 }
 0x1e1   : > { %v4337_v60 = vpop.f32.mrf.mxu2  ;;  %v4339_v17 = vpop.f32.mrf.mxu3 }
 0x1e2   : > { %5515 = vst [vmem:[#allocation125_spill] sm:$0xff] %v4337_v60  ;;  %v4341_v9 = vpop.f32.mrf.mxu1  ;;  %v4343_v38 = vpop.f32.mrf.mxu0  ;;  %v1317_v60 = vunpack.c.l.b16 %v3693_v43 }
 0x1e3   : > { %5516 = vst [vmem:[#allocation126_spill] sm:$0xff] %v4339_v17  ;;  %v4596_v17 = vld [vmem:[%s4477_s18 + $0x20] sm:$0xff] }
 0x1e4   : > { %5517 = vst [vmem:[#allocation127_spill] sm:$0xff] %v4341_v9  ;;  %2925 = vmatmul.msk.bf16.gmra.mxu0 %vm813_vm0, %v4323_v15  ;;  %v1380_v9 = vpack.c.b16 %v1324_v16, %v1317_v60 }
 0x1e5   : > { %5518 = vst [vmem:[#allocation128_spill] sm:$0xff] %v4343_v38  ;;  %2895 = vmatmul.msk.bf16.gmra.mxu1 %vm813_vm0, %v4323_v15 }
 0x1e6   : > { %2906 = vmatmul.msk.bf16.gmra.mxu2 %vm813_vm0, %v3599_v37  ;;  %2916 = vmatmul.msk.bf16.gmra.mxu3 %vm813_vm0, %v3599_v37 }
 0x1e7   : > { %1797 = vmatpush.bf16.msra.mxu1 %v1380_v9  ;;  %2290 = vmatpush.bf16.msrb.mxu0 %v1380_v9 }
 0x1e9   : > { %v4355_v11 = vpop.f32.mrf.mxu2  ;;  %v4357_v44 = vpop.f32.mrf.mxu3 }
 0x1ea   : > { %5519 = vst [vmem:[#allocation129_spill] sm:$0xff] %v4355_v11  ;;  %v4359_v52 = vpop.f32.mrf.mxu1  ;;  %v4361_v46 = vpop.f32.mrf.mxu0 }
 0x1eb   : > { %5520 = vst [vmem:[#allocation130_spill] sm:$0xff] %v4357_v44  ;;  %v3145_v44 = vld [vmem:[%s3428_s13 + $0x10] sm:$0xff] }
 0x1ec   : > { %5521 = vst [vmem:[#allocation131_spill] sm:$0xff] %v4359_v52 }
 0x1ed   : > { %5522 = vst [vmem:[#allocation132_spill] sm:$0xff] %v4361_v46 }
 0x1f1   : > { %v4363_v24 = vpop.f32.mrf.mxu2  ;;  %v4365_v42 = vpop.f32.mrf.mxu3 }
 0x1f2   : > { %5523 = vst [vmem:[#allocation133_spill] sm:$0xff] %v4363_v24  ;;  %v4367_v37 = vpop.f32.mrf.mxu1  ;;  %v4369_v43 = vpop.f32.mrf.mxu0 }
 0x1f3   : > { %5524 = vst [vmem:[#allocation134_spill] sm:$0xff] %v4365_v42 }
 0x1f4   : > { %5525 = vst [vmem:[#allocation135_spill] sm:$0xff] %v4367_v37  ;;  %2926 = vmatmul.msk.bf16.gmra.mxu0 %vm813_vm0, %v4372_v48 }
 0x1f5   : > { %5526 = vst [vmem:[#allocation136_spill] sm:$0xff] %v4369_v43  ;;  %2896 = vmatmul.msk.bf16.gmra.mxu1 %vm813_vm0, %v4372_v48  ;;  %v4569_v43 = vld [vmem:[%s4477_s18 + $0x18] sm:$0xff] }
 0x1f6   : > { %2907 = vmatmul.msk.bf16.gmra.mxu2 %vm813_vm0, %v4069_v50  ;;  %2917 = vmatmul.msk.bf16.gmra.mxu3 %vm813_vm0, %v4069_v50 }
 0x1f9   : > { %v4382_v9 = vpop.f32.mrf.mxu2  ;;  %v4384_v60 = vpop.f32.mrf.mxu3 }
 0x1fa   : > { %5527 = vst [vmem:[#allocation137_spill] sm:$0xff] %v4382_v9  ;;  %v4386_v16 = vpop.f32.mrf.mxu1  ;;  %v4388_v24 = vpop.f32.mrf.mxu0  ;;  %v4403_v9 = vld [vmem:[%s3428_s13 + $0x38] sm:$0xff] }
 0x1fb   : > { %5528 = vst [vmem:[#allocation138_spill] sm:$0xff] %v4384_v60 }
 0x1fc   : > { %5529 = vst [vmem:[#allocation139_spill] sm:$0xff] %v4386_v16 }
 0x1fd   : > { %5530 = vst [vmem:[#allocation140_spill] sm:$0xff] %v4388_v24 }
 0x201   : > { %v4390_v11 = vpop.f32.mrf.mxu2  ;;  %v4392_v37 = vpop.f32.mrf.mxu3 }
 0x202   : > { %5531 = vst [vmem:[#allocation141_spill] sm:$0xff] %v4390_v11  ;;  %v4394_v52 = vpop.f32.mrf.mxu1  ;;  %v4396_v32 = vpop.f32.mrf.mxu0  ;;  %v1303_v11 = vunpack.c.l.b16 %v3741_v34 }
 0x203   : > { %5532 = vst [vmem:[#allocation142_spill] sm:$0xff] %v4392_v37 }
 0x204   : > { %5533 = vst [vmem:[#allocation143_spill] sm:$0xff] %v4394_v52  ;;  %2927 = vmatmul.msk.bf16.gmra.mxu0 %vm813_vm0, %v4069_v50  ;;  %v1310_v52 = vunpack.c.l.b16 %v3743_v51 }
 0x205   : > { %5534 = vst [vmem:[#allocation144_spill] sm:$0xff] %v4396_v32  ;;  %2897 = vmatmul.msk.bf16.gmra.mxu1 %vm813_vm0, %v4069_v50 }
 0x206   : > { %2908 = vmatmul.msk.bf16.gmra.mxu2 %vm813_vm0, %v4403_v9  ;;  %2918 = vmatmul.msk.bf16.gmra.mxu3 %vm813_vm0, %v4403_v9  ;;  %v1373_v16 = vpack.c.b16 %v1310_v52, %v1303_v11 }
 0x208   : > { %1798 = vmatpush.bf16.msra.mxu1 %v1373_v16  ;;  %2291 = vmatpush.bf16.msrb.mxu0 %v1373_v16 }
 0x209   : > { %v4411_v37 = vpop.f32.mrf.mxu2  ;;  %v4413_v32 = vpop.f32.mrf.mxu3 }
 0x20a   : > { %5535 = vst [vmem:[#allocation145_spill] sm:$0xff] %v4411_v37  ;;  %v4415_v62 = vpop.f32.mrf.mxu1  ;;  %v4417_v60 = vpop.f32.mrf.mxu0 }
 0x20b   : > { %5536 = vst [vmem:[#allocation146_spill] sm:$0xff] %v4413_v32 }
 0x20c   : > { %5537 = vst [vmem:[#allocation147_spill] sm:$0xff] %v4415_v62  ;;  %2110 = vmatpush.bf16.msrb.mxu1 %v3809_v57 }
 0x20d   : > { %5538 = vst [vmem:[#allocation148_spill] sm:$0xff] %v4417_v60  ;;  %v4542_v60 = vld [vmem:[%s4477_s18 + $0x10] sm:$0xff] }
 0x210   : > { %2111 = vmatpush.bf16.msrb.mxu1 %v3877_v28 }
 0x211   : > { %v4421_v24 = vpop.f32.mrf.mxu2  ;;  %v4423_v34 = vpop.f32.mrf.mxu3 }
 0x212   : > { %5539 = vst [vmem:[#allocation149_spill] sm:$0xff] %v4421_v24  ;;  %v4425_v51 = vpop.f32.mrf.mxu1  ;;  %v4427_v52 = vpop.f32.mrf.mxu0 }
 0x213   : > { %5540 = vst [vmem:[#allocation150_spill] sm:$0xff] %v4423_v34 }
 0x214   : > { %5541 = vst [vmem:[#allocation151_spill] sm:$0xff] %v4425_v51  ;;  %2112 = vmatpush.bf16.msrb.mxu1 %v3945_v12  ;;  %2928 = vmatmul.msk.bf16.gmra.mxu0 %vm813_vm0, %v4403_v9 }
 0x215   : > { %5542 = vst [vmem:[#allocation152_spill] sm:$0xff] %v4427_v52  ;;  %2898 = vmatmul.msk.bf16.gmra.mxu1 %vm813_vm0, %v4403_v9  ;;  %v4515_v52 = vld [vmem:[%s4477_s18 + $0x8] sm:$0xff] }
 0x216   : > { %2909 = vmatmul.msk.bf16.gmra.mxu2 %vm813_vm0, %v4150_v41  ;;  %2919 = vmatmul.msk.bf16.gmra.mxu3 %vm813_vm0, %v4150_v41 }
 0x218   : > { %2113 = vmatpush.bf16.msrb.mxu1 %v4016_v63 }
 0x219   : > { %v4439_v28 = vpop.f32.mrf.mxu2  ;;  %v4441_v57 = vpop.f32.mrf.mxu3 }
 0x21a   : > { %5543 = vst [vmem:[#allocation153_spill] sm:$0xff] %v4439_v28  ;;  %v4443_v12 = vpop.f32.mrf.mxu1  ;;  %v4445_v11 = vpop.f32.mrf.mxu0 }
 0x21b   : > { %5544 = vst [vmem:[#allocation154_spill] sm:$0xff] %v4441_v57 }
 0x21c   : > { %5545 = vst [vmem:[#allocation155_spill] sm:$0xff] %v4443_v12  ;;  %2114 = vmatpush.bf16.msrb.mxu1 %v4087_v4 }
 0x21d   : > { %5546 = vst [vmem:[#allocation156_spill] sm:$0xff] %v4445_v11 }
 0x221   : > { %v4448_v16 = vpop.f32.mrf.mxu2  ;;  %v4450_v24 = vpop.f32.mrf.mxu3 }
 0x222   : > { %5547 = vst [vmem:[#allocation157_spill] sm:$0xff] %v4448_v16  ;;  %v4452_v37 = vpop.f32.mrf.mxu1  ;;  %v4454_v51 = vpop.f32.mrf.mxu0 }
 0x223   : > { %5548 = vst [vmem:[#allocation158_spill] sm:$0xff] %v4450_v24 }
 0x224   : > { %5549 = vst [vmem:[#allocation159_spill] sm:$0xff] %v4454_v51  ;;  %2929 = vmatmul.msk.bf16.gmra.mxu0 %vm813_vm0, %v4150_v41 }
 0x225   : > { %2899 = vmatmul.msk.bf16.gmra.mxu1 %vm813_vm0, %v4150_v41 }
 0x226   : > { %2910 = vmatmul.msk.bf16.gmra.mxu2 %vm813_vm0, %v4178_v19  ;;  %2920 = vmatmul.msk.bf16.gmra.mxu3 %vm813_vm0, %v4178_v19 }
 0x229   : > { %v4464_v63 = vpop.f32.mrf.mxu2  ;;  %v4466_v4 = vpop.f32.mrf.mxu3 }
 0x22a   : > { %5550 = vst [vmem:[#allocation160_spill] sm:$0xff] %v4464_v63  ;;  %v4468_v12 = vpop.f32.mrf.mxu1  ;;  %v4470_v62 = vpop.f32.mrf.mxu0 }
 0x22b   : > { %5551 = vst [vmem:[#allocation161_spill] sm:$0xff] %v4466_v4  ;;  %v4488_v4 = vld [vmem:[%s4477_s18] sm:$0xff] }
 0x22c   : > { %5552 = vst [vmem:[#allocation162_spill] sm:$0xff] %v4470_v62 }
 0x231   : > { %v4479_v16 = vpop.f32.mrf.mxu2  ;;  %v4481_v28 = vpop.f32.mrf.mxu3 }
 0x232   : > { %5553 = vst [vmem:[#allocation163_spill] sm:$0xff] %v4479_v16  ;;  %v4483_v24 = vpop.f32.mrf.mxu1  ;;  %v4485_v63 = vpop.f32.mrf.mxu0 }
 0x233   : > { %5554 = vst [vmem:[#allocation164_spill] sm:$0xff] %v4481_v28 }
 0x234   : > { %5555 = vst [vmem:[#allocation165_spill] sm:$0xff] %v4485_v63  ;;  %2930 = vmatmul.msk.bf16.gmra.mxu0 %vm813_vm0, %v4178_v19 }
 0x235   : > { %2900 = vmatmul.msk.bf16.gmra.mxu1 %vm813_vm0, %v4178_v19 }
 0x236   : > { %2981 = vmatmul.msk.bf16.vlgmr.msra.gmra.mxu2 %vm813_vm0, %v4488_v4  ;;  %2991 = vmatmul.msk.bf16.vlgmr.msra.gmra.mxu3 %vm813_vm0, %v4488_v4 }
 0x239   : > { %v4498_v16 = vpop.f32.mrf.mxu2  ;;  %v4500_v28 = vpop.f32.mrf.mxu3 }
 0x23a   : > { %5556 = vst [vmem:[#allocation166_spill] sm:$0xff] %v4498_v16  ;;  %v4502_v62 = vpop.f32.mrf.mxu1  ;;  %v4504_v63 = vpop.f32.mrf.mxu0 }
 0x23b   : > { %5557 = vst [vmem:[#allocation167_spill] sm:$0xff] %v4500_v28 }
 0x23c   : > { %5558 = vst [vmem:[#allocation168_spill] sm:$0xff] %v4504_v63 }
 0x241   : > { %v4506_v51 = vpop.f32.mrf.mxu2  ;;  %v4508_v57 = vpop.f32.mrf.mxu3 }
 0x242   : > { %5559 = vst [vmem:[#allocation169_spill] sm:$0xff] %v4506_v51  ;;  %v4510_v11 = vpop.f32.mrf.mxu1  ;;  %v4512_v34 = vpop.f32.mrf.mxu0 }
 0x243   : > { %5560 = vst [vmem:[#allocation170_spill] sm:$0xff] %v4508_v57 }
 0x244   : > { %5561 = vst [vmem:[#allocation171_spill] sm:$0xff] %v4512_v34  ;;  %3001 = vmatmul.msk.bf16.vlgmr.msra.gmra.mxu0 %vm813_vm0, %v4488_v4 }
 0x245   : > { %2931 = vmatmul.msk.bf16.vlgmr.msra.gmra.mxu1 %vm813_vm0, %v4207_v58 }
 0x246   : > { %2982 = vmatmul.msk.bf16.gmra.mxu2 %vm813_vm0, %v4515_v52  ;;  %2992 = vmatmul.msk.bf16.gmra.mxu3 %vm813_vm0, %v4515_v52 }
 0x249   : > { %v4525_v51 = vpop.f32.mrf.mxu2  ;;  %v4527_v16 = vpop.f32.mrf.mxu3 }
 0x24a   : > { %5562 = vst [vmem:[#allocation172_spill] sm:$0xff] %v4525_v51  ;;  %v4529_v57 = vpop.f32.mrf.mxu1  ;;  %v4531_v34 = vpop.f32.mrf.mxu0 }
 0x24b   : > { %5563 = vst [vmem:[#allocation173_spill] sm:$0xff] %v4527_v16 }
 0x24c   : > { %5564 = vst [vmem:[#allocation174_spill] sm:$0xff] %v4531_v34 }
 0x251   : > { %v4533_v28 = vpop.f32.mrf.mxu2  ;;  %v4535_v58 = vpop.f32.mrf.mxu3 }
 0x252   : > { %5565 = vst [vmem:[#allocation175_spill] sm:$0xff] %v4533_v28  ;;  %v4537_v63 = vpop.f32.mrf.mxu1  ;;  %v4539_v32 = vpop.f32.mrf.mxu0 }
 0x253   : > { %5566 = vst [vmem:[#allocation176_spill] sm:$0xff] %v4535_v58 }
 0x254   : > { %5567 = vst [vmem:[#allocation177_spill] sm:$0xff] %v4539_v32  ;;  %3002 = vmatmul.msk.bf16.gmra.mxu0 %vm813_vm0, %v4515_v52 }
 0x255   : > { %2932 = vmatmul.msk.bf16.gmra.mxu1 %vm813_vm0, %v4242_v2 }
 0x256   : > { %2983 = vmatmul.msk.bf16.gmra.mxu2 %vm813_vm0, %v4542_v60  ;;  %2993 = vmatmul.msk.bf16.gmra.mxu3 %vm813_vm0, %v4542_v60 }
 0x259   : > { %v4552_v28 = vpop.f32.mrf.mxu2  ;;  %v4554_v51 = vpop.f32.mrf.mxu3 }
 0x25a   : > { %5568 = vst [vmem:[#allocation178_spill] sm:$0xff] %v4552_v28  ;;  %v4556_v58 = vpop.f32.mrf.mxu1  ;;  %v4558_v32 = vpop.f32.mrf.mxu0 }
 0x25b   : > { %5569 = vst [vmem:[#allocation179_spill] sm:$0xff] %v4554_v51 }
 0x25c   : > { %5570 = vst [vmem:[#allocation180_spill] sm:$0xff] %v4558_v32 }
 0x261   : > { %v4560_v16 = vpop.f32.mrf.mxu2  ;;  %v4562_v2 = vpop.f32.mrf.mxu3 }
 0x262   : > { %5571 = vst [vmem:[#allocation181_spill] sm:$0xff] %v4560_v16  ;;  %v4564_v34 = vpop.f32.mrf.mxu1  ;;  %v4566_v42 = vpop.f32.mrf.mxu0 }
 0x263   : > { %5572 = vst [vmem:[#allocation182_spill] sm:$0xff] %v4562_v2 }
 0x264   : > { %5573 = vst [vmem:[#allocation183_spill] sm:$0xff] %v4566_v42  ;;  %3003 = vmatmul.msk.bf16.gmra.mxu0 %vm813_vm0, %v4542_v60 }
 0x265   : > { %2933 = vmatmul.msk.bf16.gmra.mxu1 %vm813_vm0, %v3145_v44 }
 0x266   : > { %2984 = vmatmul.msk.bf16.gmra.mxu2 %vm813_vm0, %v4569_v43  ;;  %2994 = vmatmul.msk.bf16.gmra.mxu3 %vm813_vm0, %v4569_v43 }
 0x269   : > { %v4579_v16 = vpop.f32.mrf.mxu2  ;;  %v4581_v28 = vpop.f32.mrf.mxu3 }
 0x26a   : > { %5574 = vst [vmem:[#allocation184_spill] sm:$0xff] %v4579_v16  ;;  %v4583_v2 = vpop.f32.mrf.mxu1  ;;  %v4585_v42 = vpop.f32.mrf.mxu0 }
 0x26b   : > { %5575 = vst [vmem:[#allocation185_spill] sm:$0xff] %v4581_v28 }
 0x26c   : > { %5576 = vst [vmem:[#allocation186_spill] sm:$0xff] %v4585_v42 }
 0x271   : > { %v4587_v51 = vpop.f32.mrf.mxu2  ;;  %v4589_v44 = vpop.f32.mrf.mxu3 }
 0x272   : > { %5577 = vst [vmem:[#allocation187_spill] sm:$0xff] %v4587_v51  ;;  %v4591_v32 = vpop.f32.mrf.mxu1  ;;  %v4593_v46 = vpop.f32.mrf.mxu0 }
 0x273   : > { %5578 = vst [vmem:[#allocation188_spill] sm:$0xff] %v4589_v44 }
 0x274   : > { %5579 = vst [vmem:[#allocation189_spill] sm:$0xff] %v4593_v46  ;;  %3004 = vmatmul.msk.bf16.gmra.mxu0 %vm813_vm0, %v4569_v43 }
 0x275   : > { %2934 = vmatmul.msk.bf16.gmra.mxu1 %vm813_vm0, %v3994_v36 }
 0x276   : > { %2985 = vmatmul.msk.bf16.gmra.mxu2 %vm813_vm0, %v4596_v17  ;;  %2995 = vmatmul.msk.bf16.gmra.mxu3 %vm813_vm0, %v4596_v17 }
 0x279   : > { %v4606_v51 = vpop.f32.mrf.mxu2  ;;  %v4608_v16 = vpop.f32.mrf.mxu3 }
 0x27a   : > { %5580 = vst [vmem:[#allocation190_spill] sm:$0xff] %v4606_v51  ;;  %v4610_v44 = vpop.f32.mrf.mxu1  ;;  %v4612_v46 = vpop.f32.mrf.mxu0 }
 0x27b   : > { %5581 = vst [vmem:[#allocation191_spill] sm:$0xff] %v4608_v16 }
 0x27c   : > { %5582 = vst [vmem:[#allocation192_spill] sm:$0xff] %v4610_v44  ;;  %v4650_v44 = vld [vmem:[%s4477_s18 + $0x30] sm:$0xff] }
 0x27d   : > { %5583 = vst [vmem:[#allocation193_spill] sm:$0xff] %v4612_v46 }
 0x281   : > { %v4614_v28 = vpop.f32.mrf.mxu2  ;;  %v4616_v36 = vpop.f32.mrf.mxu3 }
 0x282   : > { %5584 = vst [vmem:[#allocation194_spill] sm:$0xff] %v4614_v28  ;;  %v4618_v42 = vpop.f32.mrf.mxu1  ;;  %v4620_v38 = vpop.f32.mrf.mxu0 }
 0x283   : > { %5585 = vst [vmem:[#allocation195_spill] sm:$0xff] %v4616_v36 }
 0x284   : > { %5586 = vst [vmem:[#allocation196_spill] sm:$0xff] %v4618_v42  ;;  %3005 = vmatmul.msk.bf16.gmra.mxu0 %vm813_vm0, %v4596_v17 }
 0x285   : > { %5587 = vst [vmem:[#allocation197_spill] sm:$0xff] %v4620_v38  ;;  %2935 = vmatmul.msk.bf16.gmra.mxu1 %vm813_vm0, %v4323_v15 }
 0x286   : > { %2986 = vmatmul.msk.bf16.gmra.mxu2 %vm813_vm0, %v4623_v6  ;;  %2996 = vmatmul.msk.bf16.gmra.mxu3 %vm813_vm0, %v4623_v6 }
 0x289   : > { %v4633_v28 = vpop.f32.mrf.mxu2  ;;  %v4635_v51 = vpop.f32.mrf.mxu3 }
 0x28a   : > { %5588 = vst [vmem:[#allocation198_spill] sm:$0xff] %v4633_v28  ;;  %v4637_v36 = vpop.f32.mrf.mxu1  ;;  %v4639_v38 = vpop.f32.mrf.mxu0 }
 0x28b   : > { %5589 = vst [vmem:[#allocation199_spill] sm:$0xff] %v4635_v51 }
 0x28c   : > { %5590 = vst [vmem:[#allocation200_spill] sm:$0xff] %v4637_v36  ;;  %v4677_v36 = vld [vmem:[%s4477_s18 + $0x38] sm:$0xff] }
 0x28d   : > { %5591 = vst [vmem:[#allocation201_spill] sm:$0xff] %v4639_v38 }
 0x291   : > { %v4641_v16 = vpop.f32.mrf.mxu2  ;;  %v4643_v15 = vpop.f32.mrf.mxu3 }
 0x292   : > { %5592 = vst [vmem:[#allocation202_spill] sm:$0xff] %v4641_v16  ;;  %v4645_v46 = vpop.f32.mrf.mxu1  ;;  %v4647_v42 = vpop.f32.mrf.mxu0 }
 0x293   : > { %5593 = vst [vmem:[#allocation203_spill] sm:$0xff] %v4643_v15 }
 0x294   : > { %5594 = vst [vmem:[#allocation204_spill] sm:$0xff] %v4645_v46  ;;  %3006 = vmatmul.msk.bf16.gmra.mxu0 %vm813_vm0, %v4623_v6 }
 0x295   : > { %5595 = vst [vmem:[#allocation205_spill] sm:$0xff] %v4647_v42  ;;  %2936 = vmatmul.msk.bf16.gmra.mxu1 %vm813_vm0, %v4372_v48 }
 0x296   : > { %2987 = vmatmul.msk.bf16.gmra.mxu2 %vm813_vm0, %v4650_v44  ;;  %2997 = vmatmul.msk.bf16.gmra.mxu3 %vm813_vm0, %v4650_v44 }
 0x299   : > { %v4660_v16 = vpop.f32.mrf.mxu2  ;;  %v4662_v28 = vpop.f32.mrf.mxu3 }
 0x29a   : > { %5596 = vst [vmem:[#allocation206_spill] sm:$0xff] %v4660_v16  ;;  %v4664_v15 = vpop.f32.mrf.mxu1  ;;  %v4666_v42 = vpop.f32.mrf.mxu0 }
 0x29b   : > { %5597 = vst [vmem:[#allocation207_spill] sm:$0xff] %v4662_v28 }
 0x29c   : > { %5598 = vst [vmem:[#allocation208_spill] sm:$0xff] %v4664_v15  ;;  %v4704_v15 = vld [vmem:[%s4477_s18 + $0x40] sm:$0xff] }
 0x29d   : > { %5599 = vst [vmem:[#allocation209_spill] sm:$0xff] %v4666_v42 }
 0x2a1   : > { %v4668_v51 = vpop.f32.mrf.mxu2  ;;  %v4670_v48 = vpop.f32.mrf.mxu3 }
 0x2a2   : > { %5600 = vst [vmem:[#allocation210_spill] sm:$0xff] %v4668_v51  ;;  %v4672_v38 = vpop.f32.mrf.mxu1  ;;  %v4674_v46 = vpop.f32.mrf.mxu0 }
 0x2a3   : > { %5601 = vst [vmem:[#allocation211_spill] sm:$0xff] %v4670_v48 }
 0x2a4   : > { %5602 = vst [vmem:[#allocation212_spill] sm:$0xff] %v4672_v38  ;;  %3007 = vmatmul.msk.bf16.gmra.mxu0 %vm813_vm0, %v4650_v44 }
 0x2a5   : > { %5603 = vst [vmem:[#allocation213_spill] sm:$0xff] %v4674_v46  ;;  %2937 = vmatmul.msk.bf16.gmra.mxu1 %vm813_vm0, %v4069_v50 }
 0x2a6   : > { %2988 = vmatmul.msk.bf16.gmra.mxu2 %vm813_vm0, %v4677_v36  ;;  %2998 = vmatmul.msk.bf16.gmra.mxu3 %vm813_vm0, %v4677_v36 }
 0x2a9   : > { %v4687_v51 = vpop.f32.mrf.mxu2  ;;  %v4689_v16 = vpop.f32.mrf.mxu3 }
 0x2aa   : > { %5604 = vst [vmem:[#allocation214_spill] sm:$0xff] %v4687_v51  ;;  %v4691_v48 = vpop.f32.mrf.mxu1  ;;  %v4693_v46 = vpop.f32.mrf.mxu0  ;;  %v1506_v51 = vadd.f32 %v4171_v61, %v3819_v35  ;;  %v1449_v35 = vadd.f32 %v4167_v55, %v3733_v29  ;;  %v1565_v61 = vadd.f32 %v4452_v37, %v3797_v59  ;;  %v1452_v29 = vadd.f32 %v4188_v47, %v3752_v20 }
 0x2ab   : > { %5605 = vst [vmem:[#allocation215_spill] sm:$0xff] %v4689_v16  ;;  %v1567_v59 = vadd.f32 %v4468_v12, %v3815_v31  ;;  %v1454_v20 = vadd.f32 %v4196_v8, %v3776_v18  ;;  %v5615_v18 = vld [vmem:[#allocation33_spill] sm:$0xff] }
 0x2ac   : > { %5606 = vst [vmem:[#allocation216_spill] sm:$0xff] %v4693_v46  ;;  %v5616_v8 = vld [vmem:[#allocation45_spill] sm:$0xff] }
 0x2b1   : > { %v4695_v28 = vpop.f32.mrf.mxu2  ;;  %v4697_v50 = vpop.f32.mrf.mxu3 }
 0x2b2   : > { %5607 = vst [vmem:[#allocation217_spill] sm:$0xff] %v4695_v28  ;;  %v4699_v42 = vpop.f32.mrf.mxu1  ;;  %v4701_v38 = vpop.f32.mrf.mxu0  ;;  %v1447_v28 = vadd.f32 %v4159_v54, %v3717_v14  ;;  %v1508_v54 = vadd.f32 %v4192_v22, %v3843_v3  ;;  %v1511_v3 = vadd.f32 %v4200_v27, %v3853_v13  ;;  %v5613_v13 = vld [vmem:[#allocation43_spill] sm:$0xff]  ;;  %v5614_v27 = vld [vmem:[#allocation10_spill] sm:$0xff] }
 0x2b3   : > { %5608 = vst [vmem:[#allocation218_spill] sm:$0xff] %v4697_v50  ;;  %v1513_v31 = vadd.f32 %v4221_v23, %v5613_v13  ;;  %v1570_v47 = vadd.f32 %v4483_v24, %v5614_v27  ;;  %v1457_v24 = vadd.f32 %v4217_v53, %v5615_v18  ;;  %v1516_v23 = vadd.f32 %v4233_v7, %v5616_v8  ;;  %v5618_v53 = vld [vmem:[#allocation35_spill] sm:$0xff] }
 0x2b4   : > { %5609 = vst [vmem:[#allocation219_spill] sm:$0xff] %v4699_v42  ;;  %3008 = vmatmul.msk.bf16.gmra.mxu0 %vm813_vm0, %v4677_v36  ;;  %v1459_v7 = vadd.f32 %v4229_v1, %v5618_v53 }
 0x2b5   : > { %5610 = vst [vmem:[#allocation220_spill] sm:$0xff] %v4701_v38  ;;  %2938 = vmatmul.msk.bf16.gmra.mxu1 %vm813_vm0, %v4403_v9 }
 0x2b6   : > { %2989 = vmatmul.msk.bf16.gmra.mxu2 %vm813_vm0, %v4704_v15  ;;  %2999 = vmatmul.msk.bf16.gmra.mxu3 %vm813_vm0, %v4704_v15 }
 0x2b9   : > { %v1939_v9 = vpop.f32.mrf.mxu2  ;;  %v1998_v50 = vpop.f32.mrf.mxu3 }
 0x2ba   : > { %v2343_v38 = vadd.f32 %v1939_v9, %v1447_v28  ;;  %v2344_v16 = vadd.f32 %v1998_v50, %v1506_v51  ;;  %v4724_v46 = vpop.f32.mrf.mxu1  ;;  %v4726_v14 = vpop.f32.mrf.mxu0 }
 0x2bb   : > { %5611 = vst [vmem:[#allocation221_spill] sm:$0xff] %v4724_v46 }
 0x2bc   : > { %5612 = vst [vmem:[#allocation222_spill] sm:$0xff] %v4726_v14  ;;  %v4739_v14 = vld [vmem:[%s4477_s18 + $0x48] sm:$0xff] }
 0x2bd   : > { %2483 = vst [vmem:[%s4722_s23] sm:$0xff] %v2343_v38 }
 0x2be   : > { %2484 = vst [vmem:[%s4722_s23 + $0x8] sm:$0xff] %v2344_v16 }
 0x2c1   : > { %v1941_v28 = vpop.f32.mrf.mxu2  ;;  %v2000_v51 = vpop.f32.mrf.mxu3 }
 0x2c2   : > { %v2350_v50 = vadd.f32 %v1941_v28, %v1449_v35  ;;  %v2351_v9 = vadd.f32 %v2000_v51, %v1508_v54  ;;  %v4736_v46 = vpop.f32.mrf.mxu1  ;;  %v2057_v42 = vpop.f32.mrf.mxu0 }
 0x2c3   : > { %v2345_v38 = vadd.f32 %v2057_v42, %v1565_v61 }
 0x2c4   : > { %2491 = vst [vmem:[%s4722_s23 + $0x38] sm:$0xff] %v2350_v50  ;;  %3009 = vmatmul.msk.bf16.gmra.mxu0 %vm813_vm0, %v4704_v15 }
 0x2c5   : > { %2492 = vst [vmem:[%s4722_s23 + $0x40] sm:$0xff] %v2351_v9  ;;  %2939 = vmatmul.msk.bf16.gmra.mxu1 %vm813_vm0, %v4150_v41 }
 0x2c6   : > { %2485 = vst [vmem:[%s4722_s23 + $0x10] sm:$0xff] %v2345_v38  ;;  %2990 = vmatmul.msk.bf16.gmra.mxu2 %vm813_vm0, %v4739_v14  ;;  %3000 = vmatmul.msk.bf16.gmra.mxu3 %vm813_vm0, %v4739_v14  ;;  %v5617_v38 = vld [vmem:[#allocation38_spill] sm:$0xff] }
 0x2c9   : > { %v1944_v22 = vpop.f32.mrf.mxu2  ;;  %v2003_v42 = vpop.f32.mrf.mxu3 }
 0x2ca   : > { %v2357_v41 = vadd.f32 %v1944_v22, %v1452_v29  ;;  %v2358_v55 = vadd.f32 %v2003_v42, %v1511_v3  ;;  %v4758_v37 = vpop.f32.mrf.mxu1  ;;  %v2059_v16 = vpop.f32.mrf.mxu0 }
 0x2cb   : > { %v2352_v35 = vadd.f32 %v2059_v16, %v1567_v59  ;;  %v5619_v16 = vld [vmem:[#allocation49_spill] sm:$0xff] }
 0x2cc   : > { %2498 = vst [vmem:[%s4722_s23 + $0x70] sm:$0xff] %v2357_v41 }
 0x2cd   : > { %2499 = vst [vmem:[%s4722_s23 + $0x78] sm:$0xff] %v2358_v55 }
 0x2ce   : > { %2493 = vst [vmem:[%s4722_s23 + $0x48] sm:$0xff] %v2352_v35  ;;  %v5620_v35 = vld [vmem:[#allocation41_spill] sm:$0xff] }
 0x2d1   : > { %v1946_v12 = vpop.f32.mrf.mxu2  ;;  %v2005_v54 = vpop.f32.mrf.mxu3 }
 0x2d2   : > { %v2364_v61 = vadd.f32 %v1946_v12, %v1454_v20  ;;  %v2365_v28 = vadd.f32 %v2005_v54, %v1513_v31  ;;  %v4769_v51 = vpop.f32.mrf.mxu1  ;;  %v2062_v50 = vpop.f32.mrf.mxu0  ;;  %v1575_v20 = vadd.f32 %v4510_v11, %v5620_v35  ;;  %v5622_v11 = vld [vmem:[#allocation53_spill] sm:$0xff] }
 0x2d3   : > { %v2359_v9 = vadd.f32 %v2062_v50, %v1570_v47  ;;  %v5623_v50 = vld [vmem:[#allocation15_spill] sm:$0xff] }
 0x2d4   : > { %2505 = vst [vmem:[%s4722_s23 + $0xa8] sm:$0xff] %v2364_v61  ;;  %3010 = vmatmul.msk.bf16.gmra.mxu0 %vm813_vm0, %v4739_v14 }
 0x2d5   : > { %2506 = vst [vmem:[%s4722_s23 + $0xb0] sm:$0xff] %v2365_v28  ;;  %2940 = vmatmul.msk.bf16.gmra.mxu1 %vm813_vm0, %v4178_v19  ;;  %v1572_v19 = vadd.f32 %v4502_v62, %v5617_v38  ;;  %v1518_v62 = vadd.f32 %v4258_v5, %v5619_v16  ;;  %v5621_v5 = vld [vmem:[#allocation17_spill] sm:$0xff]  ;;  %v1521_v28 = vadd.f32 %v4266_v30, %v5622_v11  ;;  %v5632_v11 = vld [vmem:[#allocation55_spill] sm:$0xff] }
 0x2d6   : > { %2500 = vst [vmem:[%s4722_s23 + $0x80] sm:$0xff] %v2359_v9  ;;  %3021 = vmatmul.msk.bf16.vlgmr.msrb.gmra.mxu2 %vm813_vm0, %v4488_v4  ;;  %3031 = vmatmul.msk.bf16.vlgmr.msrb.gmra.mxu3 %vm813_vm0, %v4488_v4  ;;  %v1462_v1 = vadd.f32 %v4254_v10, %v5621_v5  ;;  %v1577_v9 = vadd.f32 %v4529_v57, %v5623_v50  ;;  %v5624_v10 = vld [vmem:[#allocation9_spill] sm:$0xff] }
 0x2d7   : > { %v1464_v30 = vadd.f32 %v4262_v0, %v5624_v10  ;;  %v5627_v0 = vld [vmem:[#allocation28_spill] sm:$0xff]  ;;  %v5635_v10 = vld [vmem:[#allocation19_spill] sm:$0xff] }
 0x2d9   : > { %v1949_v29 = vpop.f32.mrf.mxu2  ;;  %v2008_v3 = vpop.f32.mrf.mxu3 }
 0x2da   : > { %v2371_v59 = vadd.f32 %v1949_v29, %v1457_v24  ;;  %v2372_v22 = vadd.f32 %v2008_v3, %v1516_v23  ;;  %v4788_v42 = vpop.f32.mrf.mxu1  ;;  %v2064_v41 = vpop.f32.mrf.mxu0  ;;  %v5625_v29 = vld [vmem:[#allocation57_spill] sm:$0xff]  ;;  %v5626_v3 = vld [vmem:[#allocation47_spill] sm:$0xff] }
 0x2db   : > { %v2366_v55 = vadd.f32 %v2064_v41, %v1572_v19  ;;  %v1523_v57 = vadd.f32 %v4282_v40, %v5625_v29  ;;  %v1467_v40 = vadd.f32 %v4278_v21, %v5627_v0  ;;  %v5630_v21 = vld [vmem:[#allocation30_spill] sm:$0xff] }
 0x2dc   : > { %2512 = vst [vmem:[%s4722_s23 + $0xe0] sm:$0xff] %v2371_v59  ;;  %v1580_v59 = vadd.f32 %v4537_v63, %v5626_v3  ;;  %v5628_v63 = vld [vmem:[#allocation59_spill] sm:$0xff] }
 0x2dd   : > { %2513 = vst [vmem:[%s4722_s23 + $0xe8] sm:$0xff] %v2372_v22  ;;  %v1526_v35 = vadd.f32 %v4290_v49, %v5628_v63  ;;  %v1469_v49 = vadd.f32 %v4286_v45, %v5630_v21 }
 0x2de   : > { %2507 = vst [vmem:[%s4722_s23 + $0xb8] sm:$0xff] %v2366_v55 }
 0x2e1   : > { %v1951_v13 = vpop.f32.mrf.mxu2  ;;  %v2010_v31 = vpop.f32.mrf.mxu3 }
 0x2e2   : > { %v2378_v27 = vadd.f32 %v1951_v13, %v1459_v7  ;;  %v2379_v47 = vadd.f32 %v2010_v31, %v1518_v62  ;;  %v4799_v12 = vpop.f32.mrf.mxu1  ;;  %v2067_v54 = vpop.f32.mrf.mxu0 }
 0x2e3   : > { %v2373_v61 = vadd.f32 %v2067_v54, %v1575_v20  ;;  %v5629_v20 = vld [vmem:[#allocation51_spill] sm:$0xff] }
 0x2e4   : > { %2519 = vst [vmem:[%s4722_s23 + $0x118] sm:$0xff] %v2378_v27  ;;  %3041 = vmatmul.msk.bf16.vlgmr.msrb.gmra.mxu0 %vm813_vm0, %v4488_v4  ;;  %v1582_v13 = vadd.f32 %v4556_v58, %v5629_v20 }
 0x2e5   : > { %2520 = vst [vmem:[%s4722_s23 + $0x120] sm:$0xff] %v2379_v47  ;;  %3011 = vmatmul.msk.bf16.vlgmr.msrb.gmra.mxu1 %vm813_vm0, %v4488_v4 }
 0x2e6   : > { %2514 = vst [vmem:[%s4722_s23 + $0xf0] sm:$0xff] %v2373_v61  ;;  %3022 = vmatmul.msk.bf16.gmra.mxu2 %vm813_vm0, %v4515_v52  ;;  %3032 = vmatmul.msk.bf16.gmra.mxu3 %vm813_vm0, %v4515_v52 }
 0x2e9   : > { %v1954_v18 = vpop.f32.mrf.mxu2  ;;  %v2013_v24 = vpop.f32.mrf.mxu3 }
 0x2ea   : > { %v2385_v4 = vadd.f32 %v1954_v18, %v1462_v1  ;;  %v2386_v8 = vadd.f32 %v2013_v24, %v1521_v28  ;;  %v4818_v23 = vpop.f32.mrf.mxu1  ;;  %v2069_v38 = vpop.f32.mrf.mxu0  ;;  %v5631_v1 = vld [vmem:[#allocation63_spill] sm:$0xff]  ;;  %v1585_v28 = vadd.f32 %v4564_v34, %v5632_v11 }
 0x2eb   : > { %v2380_v19 = vadd.f32 %v2069_v38, %v1577_v9  ;;  %v1528_v58 = vadd.f32 %v4308_v25, %v5631_v1  ;;  %v5633_v25 = vld [vmem:[#allocation34_spill] sm:$0xff]  ;;  %v5634_v34 = vld [vmem:[#allocation67_spill] sm:$0xff] }
 0x2ec   : > { %2526 = vst [vmem:[%s4722_s23 + $0x150] sm:$0xff] %v2385_v4  ;;  %v1472_v45 = vadd.f32 %v4304_v56, %v5633_v25  ;;  %v5636_v56 = vld [vmem:[#allocation36_spill] sm:$0xff]  ;;  %v5649_v25 = vld [vmem:[#allocation69_spill] sm:$0xff] }
 0x2ed   : > { %2527 = vst [vmem:[%s4722_s23 + $0x158] sm:$0xff] %v2386_v8 }
 0x2ee   : > { %2521 = vst [vmem:[%s4722_s23 + $0x128] sm:$0xff] %v2380_v19  ;;  %v1531_v19 = vadd.f32 %v4316_v39, %v5634_v34  ;;  %v1474_v39 = vadd.f32 %v4312_v26, %v5636_v56  ;;  %v5640_v26 = vld [vmem:[#allocation123_spill] sm:$0xff] }
 0x2f1   : > { %v1956_v22 = vpop.f32.mrf.mxu2  ;;  %v2015_v41 = vpop.f32.mrf.mxu3 }
 0x2f2   : > { %v2392_v55 = vadd.f32 %v1956_v22, %v1464_v30  ;;  %v2393_v53 = vadd.f32 %v2015_v41, %v1523_v57  ;;  %v4829_v7 = vpop.f32.mrf.mxu1  ;;  %v2072_v16 = vpop.f32.mrf.mxu0  ;;  %v1587_v30 = vadd.f32 %v4583_v2, %v5635_v10 }
 0x2f3   : > { %v2387_v62 = vadd.f32 %v2072_v16, %v1580_v59 }
 0x2f4   : > { %2533 = vst [vmem:[%s4722_s23 + $0x188] sm:$0xff] %v2392_v55  ;;  %3042 = vmatmul.msk.bf16.gmra.mxu0 %vm813_vm0, %v4515_v52  ;;  %v5637_v55 = vld [vmem:[#allocation71_spill] sm:$0xff] }
 0x2f5   : > { %2534 = vst [vmem:[%s4722_s23 + $0x190] sm:$0xff] %v2393_v53  ;;  %3012 = vmatmul.msk.bf16.gmra.mxu1 %vm813_vm0, %v4515_v52  ;;  %v1533_v2 = vadd.f32 %v4335_v33, %v5637_v55  ;;  %v5638_v53 = vld [vmem:[#allocation61_spill] sm:$0xff]  ;;  %v5654_v55 = vld [vmem:[#allocation136_spill] sm:$0xff] }
 0x2f6   : > { %2528 = vst [vmem:[%s4722_s23 + $0x160] sm:$0xff] %v2387_v62  ;;  %3023 = vmatmul.msk.bf16.gmra.mxu2 %vm813_vm0, %v4542_v60  ;;  %3033 = vmatmul.msk.bf16.gmra.mxu3 %vm813_vm0, %v4542_v60  ;;  %v1590_v16 = vadd.f32 %v4591_v32, %v5638_v53  ;;  %v5639_v32 = vld [vmem:[#allocation18_spill] sm:$0xff]  ;;  %v5655_v53 = vld [vmem:[#allocation21_spill] sm:$0xff] }
 0x2f7   : > { %v1477_v33 = vadd.f32 %v5640_v26, %v5639_v32  ;;  %v5657_v26 = vld [vmem:[#allocation31_spill] sm:$0xff] }
 0x2f9   : > { %v1959_v31 = vpop.f32.mrf.mxu2  ;;  %v2018_v27 = vpop.f32.mrf.mxu3 }
 0x2fa   : > { %v2399_v52 = vadd.f32 %v1959_v31, %v1467_v40  ;;  %v2400_v47 = vadd.f32 %v2018_v27, %v1526_v35  ;;  %v4848_v54 = vpop.f32.mrf.mxu1  ;;  %v2074_v61 = vpop.f32.mrf.mxu0  ;;  %v5641_v31 = vld [vmem:[#allocation73_spill] sm:$0xff]  ;;  %v5642_v27 = vld [vmem:[#allocation128_spill] sm:$0xff] }
 0x2fb   : > { %v2394_v5 = vadd.f32 %v2074_v61, %v1582_v13  ;;  %v5644_v61 = vld [vmem:[#allocation192_spill] sm:$0xff] }
 0x2fc   : > { %2540 = vst [vmem:[%s4722_s23 + $0x1c0] sm:$0xff] %v2399_v52  ;;  %v1536_v52 = vadd.f32 %v5642_v27, %v5641_v31  ;;  %v5659_v27 = vld [vmem:[#allocation85_spill] sm:$0xff] }
 0x2fd   : > { %2541 = vst [vmem:[%s4722_s23 + $0x1c8] sm:$0xff] %v2400_v47  ;;  %v5643_v47 = vld [vmem:[#allocation65_spill] sm:$0xff] }
 0x2fe   : > { %2535 = vst [vmem:[%s4722_s23 + $0x198] sm:$0xff] %v2394_v5  ;;  %v1592_v5 = vadd.f32 %v5644_v61, %v5643_v47  ;;  %v5661_v61 = vld [vmem:[#allocation75_spill] sm:$0xff] }
 0x301   : > { %v1961_v50 = vpop.f32.mrf.mxu2  ;;  %v2020_v9 = vpop.f32.mrf.mxu3 }
 0x302   : > { %v2406_v18 = vadd.f32 %v1961_v50, %v1469_v49  ;;  %v2407_v24 = vadd.f32 %v2020_v9, %v1528_v58  ;;  %v4859_v4 = vpop.f32.mrf.mxu1  ;;  %v2077_v8 = vpop.f32.mrf.mxu0  ;;  %v5645_v50 = vld [vmem:[#allocation13_spill] sm:$0xff]  ;;  %v5646_v9 = vld [vmem:[#allocation126_spill] sm:$0xff] }
 0x303   : > { %v2401_v38 = vadd.f32 %v2077_v8, %v1585_v28  ;;  %v5648_v8 = vld [vmem:[#allocation132_spill] sm:$0xff] }
 0x304   : > { %2547 = vst [vmem:[%s4722_s23 + $0x1f8] sm:$0xff] %v2406_v18  ;;  %3043 = vmatmul.msk.bf16.gmra.mxu0 %vm813_vm0, %v4542_v60  ;;  %v1479_v18 = vadd.f32 %v5646_v9, %v5645_v50 }
 0x305   : > { %2548 = vst [vmem:[%s4722_s23 + $0x200] sm:$0xff] %v2407_v24  ;;  %3013 = vmatmul.msk.bf16.gmra.mxu1 %vm813_vm0, %v4542_v60  ;;  %v5647_v24 = vld [vmem:[#allocation77_spill] sm:$0xff] }
 0x306   : > { %2542 = vst [vmem:[%s4722_s23 + $0x1d0] sm:$0xff] %v2401_v38  ;;  %3024 = vmatmul.msk.bf16.gmra.mxu2 %vm813_vm0, %v4569_v43  ;;  %3034 = vmatmul.msk.bf16.gmra.mxu3 %vm813_vm0, %v4569_v43  ;;  %v1538_v38 = vadd.f32 %v5648_v8, %v5647_v24  ;;  %v5664_v24 = vld [vmem:[#allocation138_spill] sm:$0xff] }
 0x309   : > { %v1964_v29 = vpop.f32.mrf.mxu2  ;;  %v2023_v57 = vpop.f32.mrf.mxu3 }
 0x30a   : > { %v2413_v60 = vadd.f32 %v1964_v29, %v1472_v45  ;;  %v2414_v3 = vadd.f32 %v2023_v57, %v1531_v19  ;;  %v4878_v59 = vpop.f32.mrf.mxu1  ;;  %v2079_v22 = vpop.f32.mrf.mxu0  ;;  %v5650_v45 = vld [vmem:[#allocation196_spill] sm:$0xff] }
 0x30b   : > { %v2408_v41 = vadd.f32 %v2079_v22, %v1587_v30  ;;  %v1595_v34 = vadd.f32 %v5650_v45, %v5649_v25  ;;  %v5651_v22 = vld [vmem:[#allocation23_spill] sm:$0xff]  ;;  %v5666_v25 = vld [vmem:[#allocation144_spill] sm:$0xff] }
 0x30c   : > { %2554 = vst [vmem:[%s4722_s23 + $0x230] sm:$0xff] %v2413_v60 }
 0x30d   : > { %2555 = vst [vmem:[%s4722_s23 + $0x238] sm:$0xff] %v2414_v3 }
 0x30e   : > { %2549 = vst [vmem:[%s4722_s23 + $0x208] sm:$0xff] %v2408_v41  ;;  %v5652_v41 = vld [vmem:[#allocation130_spill] sm:$0xff] }
 0x30f   : > { %v1482_v56 = vadd.f32 %v5652_v41, %v5651_v22 }
 0x311   : > { %v1966_v62 = vpop.f32.mrf.mxu2  ;;  %v2025_v0 = vpop.f32.mrf.mxu3 }
 0x312   : > { %v2420_v40 = vadd.f32 %v1966_v62, %v1474_v39  ;;  %v2421_v63 = vadd.f32 %v2025_v0, %v1533_v2  ;;  %v4889_v35 = vpop.f32.mrf.mxu1  ;;  %v2082_v20 = vpop.f32.mrf.mxu0  ;;  %v5653_v39 = vld [vmem:[#allocation81_spill] sm:$0xff] }
 0x313   : > { %v2415_v13 = vadd.f32 %v2082_v20, %v1590_v16  ;;  %v1541_v2 = vadd.f32 %v5654_v55, %v5653_v39  ;;  %v5656_v16 = vld [vmem:[#allocation200_spill] sm:$0xff]  ;;  %v5670_v39 = vld [vmem:[#allocation142_spill] sm:$0xff] }
 0x314   : > { %2561 = vst [vmem:[%s4722_s23 + $0x268] sm:$0xff] %v2420_v40  ;;  %3044 = vmatmul.msk.bf16.gmra.mxu0 %vm813_vm0, %v4569_v43  ;;  %v1597_v62 = vadd.f32 %v5656_v16, %v5655_v53  ;;  %v5672_v53 = vld [vmem:[#allocation148_spill] sm:$0xff] }
 0x315   : > { %2562 = vst [vmem:[%s4722_s23 + $0x270] sm:$0xff] %v2421_v63  ;;  %3014 = vmatmul.msk.bf16.gmra.mxu1 %vm813_vm0, %v4569_v43 }
 0x316   : > { %2556 = vst [vmem:[%s4722_s23 + $0x240] sm:$0xff] %v2415_v13  ;;  %3025 = vmatmul.msk.bf16.gmra.mxu2 %vm813_vm0, %v4596_v17  ;;  %3035 = vmatmul.msk.bf16.gmra.mxu3 %vm813_vm0, %v4596_v17 }
 0x319   : > { %v1969_v21 = vpop.f32.mrf.mxu2  ;;  %v2028_v49 = vpop.f32.mrf.mxu3 }
 0x31a   : > { %v2427_v43 = vadd.f32 %v1969_v21, %v1477_v33  ;;  %v2428_v1 = vadd.f32 %v2028_v49, %v1536_v52  ;;  %v4908_v58 = vpop.f32.mrf.mxu1  ;;  %v2084_v11 = vpop.f32.mrf.mxu0  ;;  %v5658_v33 = vld [vmem:[#allocation134_spill] sm:$0xff]  ;;  %v5660_v52 = vld [vmem:[#allocation140_spill] sm:$0xff] }
 0x31b   : > { %v2422_v28 = vadd.f32 %v2084_v11, %v1592_v5  ;;  %v1484_v31 = vadd.f32 %v5658_v33, %v5657_v26  ;;  %v1543_v47 = vadd.f32 %v5660_v52, %v5659_v27  ;;  %v5662_v5 = vld [vmem:[#allocation204_spill] sm:$0xff]  ;;  %v5675_v27 = vld [vmem:[#allocation29_spill] sm:$0xff]  ;;  %v5676_v52 = vld [vmem:[#allocation146_spill] sm:$0xff] }
 0x31c   : > { %2568 = vst [vmem:[%s4722_s23 + $0x2a0] sm:$0xff] %v2427_v43  ;;  %v1600_v21 = vadd.f32 %v5662_v5, %v5661_v61  ;;  %v5677_v61 = vld [vmem:[#allocation95_spill] sm:$0xff]  ;;  %v5678_v5 = vld [vmem:[#allocation152_spill] sm:$0xff] }
 0x31d   : > { %2569 = vst [vmem:[%s4722_s23 + $0x2a8] sm:$0xff] %v2428_v1 }
 0x31e   : > { %2563 = vst [vmem:[%s4722_s23 + $0x278] sm:$0xff] %v2422_v28 }
 0x321   : > { %v1971_v19 = vpop.f32.mrf.mxu2  ;;  %v2030_v10 = vpop.f32.mrf.mxu3 }
 0x322   : > { %v2434_v30 = vadd.f32 %v1971_v19, %v1479_v18  ;;  %v2435_v29 = vadd.f32 %v2030_v10, %v1538_v38  ;;  %v4919_v57 = vpop.f32.mrf.mxu1  ;;  %v2087_v60 = vpop.f32.mrf.mxu0  ;;  %v5663_v18 = vld [vmem:[#allocation8_spill] sm:$0xff]  ;;  %v5665_v38 = vld [vmem:[#allocation87_spill] sm:$0xff] }
 0x323   : > { %v2429_v3 = vadd.f32 %v2087_v60, %v1595_v34  ;;  %v1487_v8 = vadd.f32 %v5664_v24, %v5663_v18  ;;  %v1546_v45 = vadd.f32 %v5666_v25, %v5665_v38  ;;  %v5667_v34 = vld [vmem:[#allocation79_spill] sm:$0xff]  ;;  %v5668_v19 = vld [vmem:[#allocation208_spill] sm:$0xff]  ;;  %v5681_v38 = vld [vmem:[#allocation150_spill] sm:$0xff] }
 0x324   : > { %2575 = vst [vmem:[%s4722_s23 + $0x2d8] sm:$0xff] %v2434_v30  ;;  %3045 = vmatmul.msk.bf16.gmra.mxu0 %vm813_vm0, %v4596_v17  ;;  %v1602_v10 = vadd.f32 %v5668_v19, %v5667_v34  ;;  %v5683_v34 = vld [vmem:[#allocation156_spill] sm:$0xff]  ;;  %v5684_v19 = vld [vmem:[#allocation89_spill] sm:$0xff] }
 0x325   : > { %2576 = vst [vmem:[%s4722_s23 + $0x2e0] sm:$0xff] %v2435_v29  ;;  %3015 = vmatmul.msk.bf16.gmra.mxu1 %vm813_vm0, %v4596_v17 }
 0x326   : > { %2570 = vst [vmem:[%s4722_s23 + $0x2b0] sm:$0xff] %v2429_v3  ;;  %3026 = vmatmul.msk.bf16.gmra.mxu2 %vm813_vm0, %v4623_v6  ;;  %3036 = vmatmul.msk.bf16.gmra.mxu3 %vm813_vm0, %v4623_v6 }
 0x329   : > { %v1974_v0 = vpop.f32.mrf.mxu2  ;;  %v2033_v40 = vpop.f32.mrf.mxu3 }
 0x32a   : > { %v2441_v17 = vadd.f32 %v1974_v0, %v1482_v56  ;;  %v2442_v63 = vadd.f32 %v2033_v40, %v1541_v2  ;;  %v4938_v20 = vpop.f32.mrf.mxu1  ;;  %v2089_v13 = vpop.f32.mrf.mxu0  ;;  %v5669_v56 = vld [vmem:[#allocation27_spill] sm:$0xff]  ;;  %v5674_v0 = vld [vmem:[#allocation212_spill] sm:$0xff] }
 0x32b   : > { %v2436_v32 = vadd.f32 %v2089_v13, %v1597_v62  ;;  %v1489_v55 = vadd.f32 %v5670_v39, %v5669_v56  ;;  %v5671_v2 = vld [vmem:[#allocation91_spill] sm:$0xff] }
 0x32c   : > { %2582 = vst [vmem:[%s4722_s23 + $0x310] sm:$0xff] %v2441_v17  ;;  %v1548_v16 = vadd.f32 %v5672_v53, %v5671_v2  ;;  %v5673_v62 = vld [vmem:[#allocation83_spill] sm:$0xff]  ;;  %v5687_v2 = vld [vmem:[#allocation154_spill] sm:$0xff] }
 0x32d   : > { %2583 = vst [vmem:[%s4722_s23 + $0x318] sm:$0xff] %v2442_v63  ;;  %v1605_v40 = vadd.f32 %v5674_v0, %v5673_v62  ;;  %v5689_v62 = vld [vmem:[#allocation159_spill] sm:$0xff] }
 0x32e   : > { %2577 = vst [vmem:[%s4722_s23 + $0x2e8] sm:$0xff] %v2436_v32 }
 0x331   : > { %v1976_v49 = vpop.f32.mrf.mxu2  ;;  %v2035_v43 = vpop.f32.mrf.mxu3 }
 0x332   : > { %v2448_v1 = vadd.f32 %v1976_v49, %v1484_v31  ;;  %v2449_v11 = vadd.f32 %v2035_v43, %v1543_v47  ;;  %v4949_v28 = vpop.f32.mrf.mxu1  ;;  %v2092_v50 = vpop.f32.mrf.mxu0  ;;  %v1492_v47 = vadd.f32 %v5676_v52, %v5675_v27  ;;  %v5679_v49 = vld [vmem:[#allocation25_spill] sm:$0xff] }
 0x333   : > { %v2443_v9 = vadd.f32 %v2092_v50, %v1600_v21  ;;  %v1551_v21 = vadd.f32 %v5678_v5, %v5677_v61  ;;  %v1607_v43 = vadd.f32 %v4691_v48, %v5679_v49  ;;  %v5693_v61 = vld [vmem:[#allocation158_spill] sm:$0xff] }
 0x334   : > { %2589 = vst [vmem:[%s4722_s23 + $0x348] sm:$0xff] %v2448_v1  ;;  %3046 = vmatmul.msk.bf16.gmra.mxu0 %vm813_vm0, %v4623_v6  ;;  %v5695_v49 = vld [vmem:[#allocation162_spill] sm:$0xff] }
 0x335   : > { %2590 = vst [vmem:[%s4722_s23 + $0x350] sm:$0xff] %v2449_v11  ;;  %3016 = vmatmul.msk.bf16.gmra.mxu1 %vm813_vm0, %v4623_v6 }
 0x336   : > { %2584 = vst [vmem:[%s4722_s23 + $0x320] sm:$0xff] %v2443_v9  ;;  %3027 = vmatmul.msk.bf16.gmra.mxu2 %vm813_vm0, %v4650_v44  ;;  %3037 = vmatmul.msk.bf16.gmra.mxu3 %vm813_vm0, %v4650_v44 }
 0x339   : > { %v1979_v30 = vpop.f32.mrf.mxu2  ;;  %v2038_v29 = vpop.f32.mrf.mxu3 }
 0x33a   : > { %v2455_v6 = vadd.f32 %v1979_v30, %v1487_v8  ;;  %v2456_v60 = vadd.f32 %v2038_v29, %v1546_v45  ;;  %v4968_v3 = vpop.f32.mrf.mxu1  ;;  %v2094_v22 = vpop.f32.mrf.mxu0  ;;  %v5680_v8 = vld [vmem:[#allocation32_spill] sm:$0xff]  ;;  %v5682_v45 = vld [vmem:[#allocation98_spill] sm:$0xff] }
 0x33b   : > { %v2450_v41 = vadd.f32 %v2094_v22, %v1602_v10  ;;  %v1494_v25 = vadd.f32 %v5681_v38, %v5680_v8  ;;  %v1553_v48 = vadd.f32 %v5683_v34, %v5682_v45  ;;  %v5685_v10 = vld [vmem:[#allocation219_spill] sm:$0xff] }
 0x33c   : > { %2596 = vst [vmem:[%s4722_s23 + $0x380] sm:$0xff] %v2455_v6  ;;  %v1610_v30 = vadd.f32 %v5685_v10, %v5684_v19  ;;  %v5700_v10 = vld [vmem:[#allocation161_spill] sm:$0xff] }
 0x33d   : > { %2597 = vst [vmem:[%s4722_s23 + $0x388] sm:$0xff] %v2456_v60 }
 0x33e   : > { %2591 = vst [vmem:[%s4722_s23 + $0x358] sm:$0xff] %v2450_v41 }
 0x341   : > { %v1981_v17 = vpop.f32.mrf.mxu2  ;;  %v2040_v63 = vpop.f32.mrf.mxu3 }
 0x342   : > { %v2462_v13 = vadd.f32 %v1981_v17, %v1489_v55  ;;  %v2463_v32 = vadd.f32 %v2040_v63, %v1548_v16  ;;  %v4979_v26 = vpop.f32.mrf.mxu1  ;;  %v2097_v33 = vpop.f32.mrf.mxu0  ;;  %v5686_v55 = vld [vmem:[#allocation12_spill] sm:$0xff]  ;;  %v5688_v16 = vld [vmem:[#allocation101_spill] sm:$0xff] }
 0x343   : > { %v2457_v31 = vadd.f32 %v2097_v33, %v1605_v40  ;;  %v1683_v53 = vadd.f32 %v5687_v2, %v5686_v55  ;;  %v1742_v0 = vadd.f32 %v5689_v62, %v5688_v16  ;;  %v5690_v40 = vld [vmem:[#allocation93_spill] sm:$0xff] }
 0x344   : > { %2603 = vst [vmem:[%s4722_s23 + $0x3b8] sm:$0xff] %v2462_v13  ;;  %3047 = vmatmul.msk.bf16.gmra.mxu0 %vm813_vm0, %v4650_v44  ;;  %v5691_v17 = vld [vmem:[#allocation221_spill] sm:$0xff] }
 0x345   : > { %2604 = vst [vmem:[%s4722_s23 + $0x3c0] sm:$0xff] %v2463_v32  ;;  %3017 = vmatmul.msk.bf16.gmra.mxu1 %vm813_vm0, %v4650_v44  ;;  %v1612_v63 = vadd.f32 %v5691_v17, %v5690_v40 }
 0x346   : > { %2598 = vst [vmem:[%s4722_s23 + $0x390] sm:$0xff] %v2457_v31  ;;  %3028 = vmatmul.msk.bf16.gmra.mxu2 %vm813_vm0, %v4677_v36  ;;  %3038 = vmatmul.msk.bf16.gmra.mxu3 %vm813_vm0, %v4677_v36 }
 0x349   : > { %v1984_v1 = vpop.f32.mrf.mxu2  ;;  %v2043_v11 = vpop.f32.mrf.mxu3 }
 0x34a   : > { %v2469_v44 = vadd.f32 %v1984_v1, %v1492_v47  ;;  %v2470_v50 = vadd.f32 %v2043_v11, %v1551_v21  ;;  %v4998_v9 = vpop.f32.mrf.mxu1  ;;  %v2099_v18 = vpop.f32.mrf.mxu0  ;;  %v5692_v47 = vld [vmem:[#allocation37_spill] sm:$0xff]  ;;  %v5694_v21 = vld [vmem:[#allocation103_spill] sm:$0xff]  ;;  %v5696_v1 = vld [vmem:[#allocation14_spill] sm:$0xff] }
 0x34b   : > { %v2464_v24 = vadd.f32 %v2099_v18, %v1607_v43  ;;  %v1685_v5 = vadd.f32 %v5693_v61, %v5692_v47  ;;  %v1744_v43 = vadd.f32 %v5695_v49, %v5694_v21  ;;  %v5697_v11 = vld [vmem:[#allocation153_spill] sm:$0xff]  ;;  %v5711_v47 = vld [vmem:[#allocation160_spill] sm:$0xff] }
 0x34c   : > { %2610 = vst [vmem:[%s4722_s23 + $0x3f0] sm:$0xff] %v2469_v44  ;;  %v1624_v44 = vadd.f32 %v5697_v11, %v5696_v1 }
 0x34d   : > { %2611 = vst [vmem:[%s4722_s23 + $0x3f8] sm:$0xff] %v2470_v50  ;;  %v5698_v50 = vld [vmem:[#allocation97_spill] sm:$0xff] }
 0x34e   : > { %2605 = vst [vmem:[%s4722_s23 + $0x3c8] sm:$0xff] %v2464_v24  ;;  %v1801_v18 = vadd.f32 %v4736_v46, %v5698_v50  ;;  %v5699_v46 = vld [vmem:[#allocation40_spill] sm:$0xff] }
 0x351   : > { %v1986_v29 = vpop.f32.mrf.mxu2  ;;  %v2045_v6 = vpop.f32.mrf.mxu3 }
 0x352   : > { %v2476_v60 = vadd.f32 %v1986_v29, %v1494_v25  ;;  %v2477_v22 = vadd.f32 %v2045_v6, %v1553_v48  ;;  %v5009_v41 = vpop.f32.mrf.mxu1  ;;  %v2102_v56 = vpop.f32.mrf.mxu0  ;;  %v5701_v29 = vld [vmem:[#allocation105_spill] sm:$0xff] }
 0x353   : > { %v2471_v39 = vadd.f32 %v2102_v56, %v1610_v30  ;;  %v1688_v30 = vadd.f32 %v5700_v10, %v5699_v46  ;;  %v5702_v6 = vld [vmem:[#allocation165_spill] sm:$0xff]  ;;  %v5719_v10 = vld [vmem:[#allocation104_spill] sm:$0xff] }
 0x354   : > { %2617 = vst [vmem:[%s4722_s23 + $0x428] sm:$0xff] %v2476_v60  ;;  %3048 = vmatmul.msk.bf16.gmra.mxu0 %vm813_vm0, %v4677_v36  ;;  %v1747_v60 = vadd.f32 %v5702_v6, %v5701_v29 }
 0x355   : > { %2618 = vst [vmem:[%s4722_s23 + $0x430] sm:$0xff] %v2477_v22  ;;  %3018 = vmatmul.msk.bf16.gmra.mxu1 %vm813_vm0, %v4677_v36  ;;  %v5704_v22 = vld [vmem:[#allocation157_spill] sm:$0xff] }
 0x356   : > { %2612 = vst [vmem:[%s4722_s23 + $0x400] sm:$0xff] %v2471_v39  ;;  %3029 = vmatmul.msk.bf16.gmra.mxu2 %vm813_vm0, %v4704_v15  ;;  %3039 = vmatmul.msk.bf16.gmra.mxu3 %vm813_vm0, %v4704_v15  ;;  %v5705_v39 = vld [vmem:[#allocation100_spill] sm:$0xff] }
 0x357   : > { %v1803_v55 = vadd.f32 %v4758_v37, %v5705_v39  ;;  %v5709_v37 = vld [vmem:[#allocation168_spill] sm:$0xff] }
 0x359   : > { %v2175_v13 = vpop.f32.mrf.mxu2  ;;  %v2234_v32 = vpop.f32.mrf.mxu3 }
 0x35a   : > { %v2347_v36 = vadd.f32 %v2175_v13, %v1683_v53  ;;  %v2348_v33 = vadd.f32 %v2234_v32, %v1742_v0  ;;  %v5028_v31 = vpop.f32.mrf.mxu1  ;;  %v2104_v27 = vpop.f32.mrf.mxu0  ;;  %v5706_v13 = vld [vmem:[#allocation44_spill] sm:$0xff] }
 0x35b   : > { %v2478_v52 = vadd.f32 %v2104_v27, %v1612_v63  ;;  %v5707_v32 = vld [vmem:[#allocation164_spill] sm:$0xff] }
 0x35c   : > { %2487 = vst [vmem:[%s4722_s23 + $0x20] sm:$0xff] %v2347_v36  ;;  %v1690_v36 = vadd.f32 %v5707_v32, %v5706_v13 }
 0x35d   : > { %2488 = vst [vmem:[%s4722_s23 + $0x28] sm:$0xff] %v2348_v33  ;;  %v5708_v33 = vld [vmem:[#allocation107_spill] sm:$0xff] }
 0x35e   : > { %2619 = vst [vmem:[%s4722_s23 + $0x438] sm:$0xff] %v2478_v52  ;;  %v1749_v27 = vadd.f32 %v5709_v37, %v5708_v33  ;;  %v5710_v52 = vld [vmem:[#allocation24_spill] sm:$0xff] }
 0x35f   : > { %v1629_v61 = vadd.f32 %v5711_v47, %v5710_v52 }
 0x361   : > { %v2177_v24 = vpop.f32.mrf.mxu2  ;;  %v2236_v8 = vpop.f32.mrf.mxu3 }
 0x362   : > { %v2354_v38 = vadd.f32 %v2177_v24, %v1685_v5  ;;  %v2355_v25 = vadd.f32 %v2236_v8, %v1744_v43  ;;  %v2116_v45 = vpop.f32.mrf.mxu1  ;;  %v2293_v34 = vpop.f32.mrf.mxu0  ;;  %v5712_v5 = vld [vmem:[#allocation102_spill] sm:$0xff]  ;;  %v5714_v8 = vld [vmem:[#allocation167_spill] sm:$0xff] }
 0x363   : > { %v2346_v48 = vadd.f32 %v2116_v45, %v1624_v44  ;;  %v2349_v19 = vadd.f32 %v2293_v34, %v1801_v18  ;;  %v1806_v21 = vadd.f32 %v4769_v51, %v5712_v5  ;;  %v5713_v51 = vld [vmem:[#allocation46_spill] sm:$0xff]  ;;  %v5716_v45 = vld [vmem:[#allocation171_spill] sm:$0xff] }
 0x364   : > { %2495 = vst [vmem:[%s4722_s23 + $0x58] sm:$0xff] %v2354_v38  ;;  %3049 = vmatmul.msk.bf16.gmra.mxu0 %vm813_vm0, %v4704_v15  ;;  %v1693_v38 = vadd.f32 %v5714_v8, %v5713_v51  ;;  %v5727_v5 = vld [vmem:[#allocation54_spill] sm:$0xff] }
 0x365   : > { %2496 = vst [vmem:[%s4722_s23 + $0x60] sm:$0xff] %v2355_v25  ;;  %3019 = vmatmul.msk.bf16.gmra.mxu1 %vm813_vm0, %v4704_v15  ;;  %v5703_v15 = vld [vmem:[#allocation11_spill] sm:$0xff]  ;;  %v5715_v25 = vld [vmem:[#allocation109_spill] sm:$0xff] }
 0x366   : > { %2486 = vst [vmem:[%s4722_s23 + $0x18] sm:$0xff] %v2346_v48  ;;  %3030 = vmatmul.msk.bf16.gmra.mxu2 %vm813_vm0, %v4739_v14  ;;  %3040 = vmatmul.msk.bf16.gmra.mxu3 %vm813_vm0, %v4739_v14  ;;  %v1626_v56 = vadd.f32 %v5704_v22, %v5703_v15  ;;  %v1752_v34 = vadd.f32 %v5716_v45, %v5715_v25  ;;  %v5717_v48 = vld [vmem:[#allocation39_spill] sm:$0xff] }
 0x367   : > { %2490 = vst.msk [vmem:[%s4722_s23 + $0x30] sm:$0xff] %vm2489_vm1, %v2349_v19  ;;  %v5718_v19 = vld [vmem:[#allocation163_spill] sm:$0xff] }
 0x368   : > { %v1631_v46 = vadd.f32 %v5718_v19, %v5717_v48 }
 0x369   : > { %v2180_v2 = vpop.f32.mrf.mxu2  ;;  %v2239_v53 = vpop.f32.mrf.mxu3 }
 0x36a   : > { %v2361_v16 = vadd.f32 %v2180_v2, %v1688_v30  ;;  %v2362_v62 = vadd.f32 %v2239_v53, %v1747_v60  ;;  %v2118_v0 = vpop.f32.mrf.mxu1  ;;  %v2295_v40 = vpop.f32.mrf.mxu0  ;;  %v1808_v30 = vadd.f32 %v4788_v42, %v5719_v10  ;;  %v5721_v2 = vld [vmem:[#allocation170_spill] sm:$0xff]  ;;  %v5722_v53 = vld [vmem:[#allocation111_spill] sm:$0xff]  ;;  %v5735_v10 = vld [vmem:[#allocation176_spill] sm:$0xff] }
 0x36b   : > { %v2353_v17 = vadd.f32 %v2118_v0, %v1626_v56  ;;  %v2356_v63 = vadd.f32 %v2295_v40, %v1803_v55  ;;  %v5720_v55 = vld [vmem:[#allocation50_spill] sm:$0xff] }
 0x36c   : > { %2502 = vst [vmem:[%s4722_s23 + $0x90] sm:$0xff] %v2361_v16  ;;  %v1695_v42 = vadd.f32 %v5721_v2, %v5720_v55  ;;  %v5723_v16 = vld [vmem:[#allocation174_spill] sm:$0xff] }
 0x36d   : > { %2503 = vst [vmem:[%s4722_s23 + $0x98] sm:$0xff] %v2362_v62  ;;  %v1754_v62 = vadd.f32 %v5723_v16, %v5722_v53  ;;  %v5724_v0 = vld [vmem:[#allocation42_spill] sm:$0xff] }
 0x36e   : > { %2494 = vst [vmem:[%s4722_s23 + $0x50] sm:$0xff] %v2353_v17  ;;  %v5725_v40 = vld [vmem:[#allocation166_spill] sm:$0xff] }
 0x36f   : > { %2497 = vst.msk [vmem:[%s4722_s23 + $0x68] sm:$0xff] %vm2489_vm1, %v2356_v63  ;;  %v1634_v17 = vadd.f32 %v5725_v40, %v5724_v0  ;;  %v5726_v63 = vld [vmem:[#allocation106_spill] sm:$0xff]  ;;  %v5741_v40 = vld [vmem:[#allocation60_spill] sm:$0xff] }
 0x370   : > { %v1811_v13 = vadd.f32 %v4799_v12, %v5726_v63  ;;  %v5743_v63 = vld [vmem:[#allocation117_spill] sm:$0xff] }
 0x371   : > { %v2182_v49 = vpop.f32.mrf.mxu2  ;;  %v2241_v43 = vpop.f32.mrf.mxu3 }
 0x372   : > { %v2368_v1 = vadd.f32 %v2182_v49, %v1690_v36  ;;  %v2369_v11 = vadd.f32 %v2241_v43, %v1749_v27  ;;  %v2121_v44 = vpop.f32.mrf.mxu1  ;;  %v2298_v50 = vpop.f32.mrf.mxu0  ;;  %v5729_v49 = vld [vmem:[#allocation113_spill] sm:$0xff] }
 0x373   : > { %v2360_v18 = vadd.f32 %v2121_v44, %v1629_v61  ;;  %v2363_v24 = vadd.f32 %v2298_v50, %v1806_v21  ;;  %v5728_v21 = vld [vmem:[#allocation173_spill] sm:$0xff] }
 0x374   : > { %2509 = vst [vmem:[%s4722_s23 + $0xc8] sm:$0xff] %v2368_v1  ;;  %3050 = vmatmul.msk.bf16.gmra.mxu0 %vm813_vm0, %v4739_v14  ;;  %v1698_v12 = vadd.f32 %v5728_v21, %v5727_v5  ;;  %v5730_v43 = vld [vmem:[#allocation177_spill] sm:$0xff] }
 0x375   : > { %2510 = vst [vmem:[%s4722_s23 + $0xd0] sm:$0xff] %v2369_v11  ;;  %3020 = vmatmul.msk.bf16.gmra.mxu1 %vm813_vm0, %v4739_v14  ;;  %v1757_v1 = vadd.f32 %v5730_v43, %v5729_v49  ;;  %v5731_v11 = vld [vmem:[#allocation16_spill] sm:$0xff]  ;;  %v5732_v44 = vld [vmem:[#allocation169_spill] sm:$0xff] }
 0x376   : > { %2501 = vst [vmem:[%s4722_s23 + $0x88] sm:$0xff] %v2360_v18  ;;  %v1636_v50 = vadd.f32 %v5732_v44, %v5731_v11  ;;  %v5733_v18 = vld [vmem:[#allocation108_spill] sm:$0xff]  ;;  %v5749_v44 = vld [vmem:[#allocation182_spill] sm:$0xff] }
 0x377   : > { %2504 = vst.msk [vmem:[%s4722_s23 + $0xa0] sm:$0xff] %vm2489_vm1, %v2363_v24  ;;  %v1813_v24 = vadd.f32 %v4818_v23, %v5733_v18  ;;  %v5748_v11 = vld [vmem:[#allocation64_spill] sm:$0xff]  ;;  %v5751_v18 = vld [vmem:[#allocation186_spill] sm:$0xff] }
 0x379   : > { %v2185_v29 = vpop.f32.mrf.mxu2  ;;  %v2244_v14 = vpop.f32.mrf.mxu3 }
 0x37a   : > { %v2375_v6 = vadd.f32 %v2185_v29, %v1693_v38  ;;  %v2376_v60 = vadd.f32 %v2244_v14, %v1752_v34  ;;  %v2123_v15 = vpop.f32.mrf.mxu1  ;;  %v2300_v22 = vpop.f32.mrf.mxu0  ;;  %v5737_v29 = vld [vmem:[#allocation180_spill] sm:$0xff] }
 0x37b   : > { %v2367_v56 = vadd.f32 %v2123_v15, %v1631_v46  ;;  %v2370_v39 = vadd.f32 %v2300_v22, %v1808_v30  ;;  %v5734_v46 = vld [vmem:[#allocation58_spill] sm:$0xff]  ;;  %v5736_v30 = vld [vmem:[#allocation115_spill] sm:$0xff] }
 0x37c   : > { %2516 = vst [vmem:[%s4722_s23 + $0x100] sm:$0xff] %v2375_v6  ;;  %v1700_v23 = vadd.f32 %v5735_v10, %v5734_v46  ;;  %v1759_v14 = vadd.f32 %v5737_v29, %v5736_v30  ;;  %v5738_v6 = vld [vmem:[#allocation48_spill] sm:$0xff]  ;;  %v5740_v22 = vld [vmem:[#allocation110_spill] sm:$0xff] }
 0x37d   : > { %2517 = vst [vmem:[%s4722_s23 + $0x108] sm:$0xff] %v2376_v60  ;;  %v5739_v60 = vld [vmem:[#allocation172_spill] sm:$0xff] }
 0x37e   : > { %2508 = vst [vmem:[%s4722_s23 + $0xc0] sm:$0xff] %v2367_v56  ;;  %v1639_v15 = vadd.f32 %v5739_v60, %v5738_v6  ;;  %v1816_v56 = vadd.f32 %v4829_v7, %v5740_v22  ;;  %v5756_v6 = vld [vmem:[#allocation185_spill] sm:$0xff] }
 0x37f   : > { %2511 = vst.msk [vmem:[%s4722_s23 + $0xd8] sm:$0xff] %vm2489_vm1, %v2370_v39  ;;  %v5757_v60 = vld [vmem:[#allocation121_spill] sm:$0xff] }
 0x381   : > { %v2187_v32 = vpop.f32.mrf.mxu2  ;;  %v2246_v36 = vpop.f32.mrf.mxu3 }
 0x382   : > { %v2382_v33 = vadd.f32 %v2187_v32, %v1695_v42  ;;  %v2383_v37 = vadd.f32 %v2246_v36, %v1754_v62  ;;  %v2126_v27 = vpop.f32.mrf.mxu1  ;;  %v2303_v52 = vpop.f32.mrf.mxu0  ;;  %v5745_v36 = vld [vmem:[#allocation52_spill] sm:$0xff] }
 0x383   : > { %v2374_v47 = vadd.f32 %v2126_v27, %v1634_v17  ;;  %v2377_v61 = vadd.f32 %v2303_v52, %v1811_v13  ;;  %v5742_v17 = vld [vmem:[#allocation179_spill] sm:$0xff]  ;;  %v5747_v27 = vld [vmem:[#allocation112_spill] sm:$0xff] }
 0x384   : > { %2523 = vst [vmem:[%s4722_s23 + $0x138] sm:$0xff] %v2382_v33  ;;  %v1703_v7 = vadd.f32 %v5742_v17, %v5741_v40  ;;  %v5744_v13 = vld [vmem:[#allocation183_spill] sm:$0xff]  ;;  %v1818_v52 = vadd.f32 %v4848_v54, %v5747_v27  ;;  %v1705_v54 = vadd.f32 %v5749_v44, %v5748_v11  ;;  %v5766_v27 = vld [vmem:[#allocation62_spill] sm:$0xff] }
 0x385   : > { %2524 = vst [vmem:[%s4722_s23 + $0x140] sm:$0xff] %v2383_v37  ;;  %v1762_v32 = vadd.f32 %v5744_v13, %v5743_v63  ;;  %v5746_v33 = vld [vmem:[#allocation175_spill] sm:$0xff]  ;;  %v5762_v13 = vld [vmem:[#allocation72_spill] sm:$0xff] }
 0x386   : > { %2515 = vst [vmem:[%s4722_s23 + $0xf8] sm:$0xff] %v2374_v47  ;;  %v1641_v37 = vadd.f32 %v5746_v33, %v5745_v36  ;;  %v5764_v36 = vld [vmem:[#allocation124_spill] sm:$0xff]  ;;  %v5765_v33 = vld [vmem:[#allocation193_spill] sm:$0xff] }
 0x387   : > { %2518 = vst.msk [vmem:[%s4722_s23 + $0x110] sm:$0xff] %vm2489_vm1, %v2377_v61 }
 0x389   : > { %v2190_v51 = vpop.f32.mrf.mxu2  ;;  %v2249_v8 = vpop.f32.mrf.mxu3 }
 0x38a   : > { %v2389_v38 = vadd.f32 %v2190_v51, %v1698_v12  ;;  %v2390_v25 = vadd.f32 %v2249_v8, %v1757_v1  ;;  %v2128_v45 = vpop.f32.mrf.mxu1  ;;  %v2305_v34 = vpop.f32.mrf.mxu0  ;;  %v5752_v51 = vld [vmem:[#allocation56_spill] sm:$0xff]  ;;  %v5753_v8 = vld [vmem:[#allocation178_spill] sm:$0xff] }
 0x38b   : > { %v2381_v48 = vadd.f32 %v2128_v45, %v1636_v50  ;;  %v2384_v19 = vadd.f32 %v2305_v34, %v1813_v24  ;;  %v5750_v50 = vld [vmem:[#allocation119_spill] sm:$0xff] }
 0x38c   : > { %2530 = vst [vmem:[%s4722_s23 + $0x170] sm:$0xff] %v2389_v38  ;;  %v1764_v24 = vadd.f32 %v5751_v18, %v5750_v50  ;;  %v1644_v38 = vadd.f32 %v5753_v8, %v5752_v51  ;;  %v5769_v50 = vld [vmem:[#allocation74_spill] sm:$0xff]  ;;  %v5770_v18 = vld [vmem:[#allocation191_spill] sm:$0xff]  ;;  %v5772_v51 = vld [vmem:[#allocation197_spill] sm:$0xff] }
 0x38d   : > { %2531 = vst [vmem:[%s4722_s23 + $0x178] sm:$0xff] %v2390_v25  ;;  %v5754_v25 = vld [vmem:[#allocation114_spill] sm:$0xff] }
 0x38e   : > { %2522 = vst [vmem:[%s4722_s23 + $0x130] sm:$0xff] %v2381_v48  ;;  %v1821_v45 = vadd.f32 %v4859_v4, %v5754_v25  ;;  %v5774_v25 = vld [vmem:[#allocation187_spill] sm:$0xff] }
 0x38f   : > { %2525 = vst.msk [vmem:[%s4722_s23 + $0x148] sm:$0xff] %vm2489_vm1, %v2384_v19 }
 0x391   : > { %v2192_v39 = vpop.f32.mrf.mxu2  ;;  %v2251_v55 = vpop.f32.mrf.mxu3 }
 0x392   : > { %v2396_v2 = vadd.f32 %v2192_v39, %v1700_v23  ;;  %v2397_v42 = vadd.f32 %v2251_v55, %v1759_v14  ;;  %v2131_v53 = vpop.f32.mrf.mxu1  ;;  %v2308_v16 = vpop.f32.mrf.mxu0  ;;  %v5755_v14 = vld [vmem:[#allocation68_spill] sm:$0xff]  ;;  %v5760_v39 = vld [vmem:[#allocation181_spill] sm:$0xff] }
 0x393   : > { %v2388_v62 = vadd.f32 %v2131_v53, %v1639_v15  ;;  %v2391_v0 = vadd.f32 %v2308_v16, %v1816_v56  ;;  %v1708_v4 = vadd.f32 %v5756_v6, %v5755_v14  ;;  %v5758_v15 = vld [vmem:[#allocation189_spill] sm:$0xff]  ;;  %v5759_v56 = vld [vmem:[#allocation20_spill] sm:$0xff] }
 0x394   : > { %2537 = vst [vmem:[%s4722_s23 + $0x1a8] sm:$0xff] %v2396_v2  ;;  %v1767_v22 = vadd.f32 %v5758_v15, %v5757_v60  ;;  %v1646_v55 = vadd.f32 %v5760_v39, %v5759_v56  ;;  %v5761_v2 = vld [vmem:[#allocation116_spill] sm:$0xff]  ;;  %v5777_v60 = vld [vmem:[#allocation195_spill] sm:$0xff]  ;;  %v5780_v39 = vld [vmem:[#allocation70_spill] sm:$0xff] }
 0x395   : > { %2538 = vst [vmem:[%s4722_s23 + $0x1b0] sm:$0xff] %v2397_v42  ;;  %v1823_v42 = vadd.f32 %v4878_v59, %v5761_v2  ;;  %v5778_v15 = vld [vmem:[#allocation131_spill] sm:$0xff] }
 0x396   : > { %2529 = vst [vmem:[%s4722_s23 + $0x168] sm:$0xff] %v2388_v62 }
 0x397   : > { %2532 = vst.msk [vmem:[%s4722_s23 + $0x180] sm:$0xff] %vm2489_vm1, %v2391_v0 }
 0x399   : > { %v2195_v47 = vpop.f32.mrf.mxu2  ;;  %v2254_v61 = vpop.f32.mrf.mxu3 }
 0x39a   : > { %v2403_v5 = vadd.f32 %v2195_v47, %v1703_v7  ;;  %v2404_v21 = vadd.f32 %v2254_v61, %v1762_v32  ;;  %v2133_v12 = vpop.f32.mrf.mxu1  ;;  %v2310_v49 = vpop.f32.mrf.mxu0  ;;  %v5763_v32 = vld [vmem:[#allocation188_spill] sm:$0xff]  ;;  %v5768_v61 = vld [vmem:[#allocation118_spill] sm:$0xff] }
 0x39b   : > { %v2395_v43 = vadd.f32 %v2133_v12, %v1641_v37  ;;  %v2398_v1 = vadd.f32 %v2310_v49, %v1818_v52  ;;  %v1710_v59 = vadd.f32 %v5763_v32, %v5762_v13  ;;  %v1769_v37 = vadd.f32 %v5765_v33, %v5764_v36  ;;  %v5767_v52 = vld [vmem:[#allocation184_spill] sm:$0xff]  ;;  %v5783_v32 = vld [vmem:[#allocation82_spill] sm:$0xff]  ;;  %v5785_v36 = vld [vmem:[#allocation135_spill] sm:$0xff] }
 0x39c   : > { %2544 = vst [vmem:[%s4722_s23 + $0x1e0] sm:$0xff] %v2403_v5  ;;  %v1649_v47 = vadd.f32 %v5767_v52, %v5766_v27  ;;  %v1826_v5 = vadd.f32 %v4889_v35, %v5768_v61  ;;  %v1713_v35 = vadd.f32 %v5770_v18, %v5769_v50  ;;  %v5786_v33 = vld [vmem:[#allocation205_spill] sm:$0xff]  ;;  %v5787_v27 = vld [vmem:[#allocation22_spill] sm:$0xff]  ;;  %v5791_v18 = vld [vmem:[#allocation203_spill] sm:$0xff] }
 0x39d   : > { %2545 = vst [vmem:[%s4722_s23 + $0x1e8] sm:$0xff] %v2404_v21  ;;  %v5788_v52 = vld [vmem:[#allocation194_spill] sm:$0xff]  ;;  %v5789_v61 = vld [vmem:[#allocation125_spill] sm:$0xff] }
 0x39e   : > { %2536 = vst [vmem:[%s4722_s23 + $0x1a0] sm:$0xff] %v2395_v43  ;;  %v5790_v50 = vld [vmem:[#allocation86_spill] sm:$0xff] }
 0x39f   : > { %2539 = vst.msk [vmem:[%s4722_s23 + $0x1b8] sm:$0xff] %vm2489_vm1, %v2398_v1 }
 0x3a1   : > { %v2197_v34 = vpop.f32.mrf.mxu2  ;;  %v2256_v48 = vpop.f32.mrf.mxu3 }
 0x3a2   : > { %v2410_v19 = vadd.f32 %v2197_v34, %v1705_v54  ;;  %v2411_v46 = vadd.f32 %v2256_v48, %v1764_v24  ;;  %v2136_v10 = vpop.f32.mrf.mxu1  ;;  %v2313_v23 = vpop.f32.mrf.mxu0  ;;  %v5771_v24 = vld [vmem:[#allocation127_spill] sm:$0xff]  ;;  %v5775_v34 = vld [vmem:[#allocation120_spill] sm:$0xff] }
 0x3a3   : > { %v2402_v30 = vadd.f32 %v2136_v10, %v1644_v38  ;;  %v2405_v29 = vadd.f32 %v2313_v23, %v1821_v45  ;;  %v1772_v8 = vadd.f32 %v5772_v51, %v5771_v24  ;;  %v5773_v38 = vld [vmem:[#allocation66_spill] sm:$0xff]  ;;  %v1828_v48 = vadd.f32 %v4908_v58, %v5775_v34  ;;  %v5793_v24 = vld [vmem:[#allocation209_spill] sm:$0xff] }
 0x3a4   : > { %2551 = vst [vmem:[%s4722_s23 + $0x218] sm:$0xff] %v2410_v19  ;;  %v1651_v45 = vadd.f32 %v5774_v25, %v5773_v38  ;;  %v5795_v38 = vld [vmem:[#allocation198_spill] sm:$0xff] }
 0x3a5   : > { %2552 = vst [vmem:[%s4722_s23 + $0x220] sm:$0xff] %v2411_v46 }
 0x3a6   : > { %2543 = vst [vmem:[%s4722_s23 + $0x1d8] sm:$0xff] %v2402_v30 }
 0x3a7   : > { %2546 = vst.msk [vmem:[%s4722_s23 + $0x1f0] sm:$0xff] %vm2489_vm1, %v2405_v29 }
 0x3a9   : > { %v2200_v53 = vpop.f32.mrf.mxu2  ;;  %v2259_v16 = vpop.f32.mrf.mxu3 }
 0x3aa   : > { %v2417_v62 = vadd.f32 %v2200_v53, %v1708_v4  ;;  %v2418_v0 = vadd.f32 %v2259_v16, %v1767_v22  ;;  %v2138_v40 = vpop.f32.mrf.mxu1  ;;  %v2315_v17 = vpop.f32.mrf.mxu0  ;;  %v5776_v4 = vld [vmem:[#allocation78_spill] sm:$0xff]  ;;  %v5779_v22 = vld [vmem:[#allocation201_spill] sm:$0xff] }
 0x3ab   : > { %v2409_v7 = vadd.f32 %v2138_v40, %v1646_v55  ;;  %v2412_v63 = vadd.f32 %v2315_v17, %v1823_v42  ;;  %v1715_v58 = vadd.f32 %v5777_v60, %v5776_v4  ;;  %v1774_v56 = vadd.f32 %v5779_v22, %v5778_v15  ;;  %v5781_v55 = vld [vmem:[#allocation190_spill] sm:$0xff]  ;;  %v5798_v4 = vld [vmem:[#allocation207_spill] sm:$0xff]  ;;  %v5801_v22 = vld [vmem:[#allocation80_spill] sm:$0xff] }
 0x3ac   : > { %2558 = vst [vmem:[%s4722_s23 + $0x250] sm:$0xff] %v2417_v62  ;;  %v1654_v2 = vadd.f32 %v5781_v55, %v5780_v39  ;;  %v5782_v42 = vld [vmem:[#allocation122_spill] sm:$0xff]  ;;  %v5799_v60 = vld [vmem:[#allocation143_spill] sm:$0xff]  ;;  %v5803_v55 = vld [vmem:[#allocation133_spill] sm:$0xff] }
 0x3ad   : > { %2559 = vst [vmem:[%s4722_s23 + $0x258] sm:$0xff] %v2418_v0  ;;  %v1831_v53 = vadd.f32 %v4919_v57, %v5782_v42 }
 0x3ae   : > { %2550 = vst [vmem:[%s4722_s23 + $0x210] sm:$0xff] %v2409_v7 }
 0x3af   : > { %2553 = vst.msk [vmem:[%s4722_s23 + $0x228] sm:$0xff] %vm2489_vm1, %v2412_v63 }
 0x3b1   : > { %v2202_v21 = vpop.f32.mrf.mxu2  ;;  %v2261_v12 = vpop.f32.mrf.mxu3 }
 0x3b2   : > { %v2424_v49 = vadd.f32 %v2202_v21, %v1710_v59  ;;  %v2425_v43 = vadd.f32 %v2261_v12, %v1769_v37  ;;  %v2141_v1 = vpop.f32.mrf.mxu1  ;;  %v2318_v11 = vpop.f32.mrf.mxu0  ;;  %v5784_v59 = vld [vmem:[#allocation199_spill] sm:$0xff]  ;;  %v1777_v37 = vadd.f32 %v5786_v33, %v5785_v36  ;;  %v5808_v36 = vld [vmem:[#allocation84_spill] sm:$0xff]  ;;  %v5809_v33 = vld [vmem:[#allocation206_spill] sm:$0xff] }
 0x3b3   : > { %v2416_v44 = vadd.f32 %v2141_v1, %v1649_v47  ;;  %v2419_v54 = vadd.f32 %v2318_v11, %v1826_v5  ;;  %v1718_v57 = vadd.f32 %v5784_v59, %v5783_v32  ;;  %v1656_v47 = vadd.f32 %v5788_v52, %v5787_v27  ;;  %v5806_v32 = vld [vmem:[#allocation147_spill] sm:$0xff]  ;;  %v5807_v59 = vld [vmem:[#allocation216_spill] sm:$0xff]  ;;  %v5810_v27 = vld [vmem:[#allocation137_spill] sm:$0xff] }
 0x3b4   : > { %2565 = vst [vmem:[%s4722_s23 + $0x288] sm:$0xff] %v2424_v49  ;;  %v1833_v5 = vadd.f32 %v4938_v20, %v5789_v61  ;;  %v1720_v20 = vadd.f32 %v5791_v18, %v5790_v50  ;;  %v1841_v52 = vadd.f32 %v4979_v26, %v5810_v27  ;;  %v5814_v50 = vld [vmem:[#allocation220_spill] sm:$0xff] }
 0x3b5   : > { %2566 = vst [vmem:[%s4722_s23 + $0x290] sm:$0xff] %v2425_v43 }
 0x3b6   : > { %2557 = vst [vmem:[%s4722_s23 + $0x248] sm:$0xff] %v2416_v44 }
 0x3b7   : > { %2560 = vst.msk [vmem:[%s4722_s23 + $0x260] sm:$0xff] %vm2489_vm1, %v2419_v54 }
 0x3b9   : > { %v2205_v19 = vpop.f32.mrf.mxu2  ;;  %v2264_v46 = vpop.f32.mrf.mxu3 }
 0x3ba   : > { %v2431_v10 = vadd.f32 %v2205_v19, %v1713_v35  ;;  %v2432_v23 = vadd.f32 %v2264_v46, %v1772_v8  ;;  %v2143_v30 = vpop.f32.mrf.mxu1  ;;  %v2320_v29 = vpop.f32.mrf.mxu0  ;;  %v5792_v35 = vld [vmem:[#allocation139_spill] sm:$0xff]  ;;  %v5794_v8 = vld [vmem:[#allocation76_spill] sm:$0xff] }
 0x3bb   : > { %v2423_v14 = vadd.f32 %v2143_v30, %v1651_v45  ;;  %v2426_v6 = vadd.f32 %v2320_v29, %v1828_v48  ;;  %v1779_v51 = vadd.f32 %v5793_v24, %v5792_v35  ;;  %v1659_v25 = vadd.f32 %v5795_v38, %v5794_v8  ;;  %v5796_v45 = vld [vmem:[#allocation129_spill] sm:$0xff]  ;;  %v5816_v35 = vld [vmem:[#allocation210_spill] sm:$0xff] }
 0x3bc   : > { %2572 = vst [vmem:[%s4722_s23 + $0x2c0] sm:$0xff] %v2431_v10  ;;  %v1836_v34 = vadd.f32 %v4949_v28, %v5796_v45 }
 0x3bd   : > { %2573 = vst [vmem:[%s4722_s23 + $0x2c8] sm:$0xff] %v2432_v23 }
 0x3be   : > { %2564 = vst [vmem:[%s4722_s23 + $0x280] sm:$0xff] %v2423_v14 }
 0x3bf   : > { %2567 = vst.msk [vmem:[%s4722_s23 + $0x298] sm:$0xff] %vm2489_vm1, %v2426_v6  ;;  %v5797_v6 = vld [vmem:[#allocation88_spill] sm:$0xff] }
 0x3c0   : > { %v1723_v28 = vadd.f32 %v5798_v4, %v5797_v6  ;;  %v5822_v4 = vld [vmem:[#allocation90_spill] sm:$0xff] }
 0x3c1   : > { %v2207_v16 = vpop.f32.mrf.mxu2  ;;  %v2266_v62 = vpop.f32.mrf.mxu3 }
 0x3c2   : > { %v2438_v0 = vadd.f32 %v2207_v16, %v1715_v58  ;;  %v2439_v40 = vadd.f32 %v2266_v62, %v1774_v56  ;;  %v2146_v17 = vpop.f32.mrf.mxu1  ;;  %v2323_v7 = vpop.f32.mrf.mxu0  ;;  %v5800_v58 = vld [vmem:[#allocation213_spill] sm:$0xff]  ;;  %v5802_v56 = vld [vmem:[#allocation202_spill] sm:$0xff] }
 0x3c3   : > { %v2430_v63 = vadd.f32 %v2146_v17, %v1654_v2  ;;  %v2433_v13 = vadd.f32 %v2323_v7, %v1831_v53  ;;  %v1782_v15 = vadd.f32 %v5800_v58, %v5799_v60  ;;  %v1661_v39 = vadd.f32 %v5802_v56, %v5801_v22  ;;  %v5824_v58 = vld [vmem:[#allocation145_spill] sm:$0xff] }
 0x3c4   : > { %2579 = vst [vmem:[%s4722_s23 + $0x2f8] sm:$0xff] %v2438_v0  ;;  %v1838_v2 = vadd.f32 %v4968_v3, %v5803_v55 }
 0x3c5   : > { %2580 = vst [vmem:[%s4722_s23 + $0x300] sm:$0xff] %v2439_v40 }
 0x3c6   : > { %2571 = vst [vmem:[%s4722_s23 + $0x2b8] sm:$0xff] %v2430_v63  ;;  %v5804_v63 = vld [vmem:[#allocation92_spill] sm:$0xff] }
 0x3c7   : > { %2574 = vst.msk [vmem:[%s4722_s23 + $0x2d0] sm:$0xff] %vm2489_vm1, %v2433_v13  ;;  %v5805_v13 = vld [vmem:[#allocation211_spill] sm:$0xff] }
 0x3c8   : > { %v1725_v3 = vadd.f32 %v5805_v13, %v5804_v63 }
 0x3c9   : > { %v2210_v21 = vpop.f32.mrf.mxu2  ;;  %v2269_v12 = vpop.f32.mrf.mxu3 }
 0x3ca   : > { %v2445_v49 = vadd.f32 %v2210_v21, %v1718_v57  ;;  %v2446_v43 = vadd.f32 %v2269_v12, %v1777_v37  ;;  %v2148_v1 = vpop.f32.mrf.mxu1  ;;  %v2325_v11 = vpop.f32.mrf.mxu0  ;;  %v1784_v57 = vadd.f32 %v5807_v59, %v5806_v32  ;;  %v1664_v37 = vadd.f32 %v5809_v33, %v5808_v36 }
 0x3cb   : > { %v2437_v44 = vadd.f32 %v2148_v1, %v1656_v47  ;;  %v2440_v54 = vadd.f32 %v2325_v11, %v1833_v5  ;;  %v5811_v11 = vld [vmem:[#allocation96_spill] sm:$0xff] }
 0x3cc   : > { %2586 = vst [vmem:[%s4722_s23 + $0x330] sm:$0xff] %v2445_v49 }
 0x3cd   : > { %2587 = vst [vmem:[%s4722_s23 + $0x338] sm:$0xff] %v2446_v43 }
 0x3ce   : > { %2578 = vst [vmem:[%s4722_s23 + $0x2f0] sm:$0xff] %v2437_v44  ;;  %v5812_v44 = vld [vmem:[#allocation215_spill] sm:$0xff] }
 0x3cf   : > { %2581 = vst.msk [vmem:[%s4722_s23 + $0x308] sm:$0xff] %vm2489_vm1, %v2440_v54  ;;  %v1728_v26 = vadd.f32 %v5812_v44, %v5811_v11  ;;  %v5813_v54 = vld [vmem:[#allocation151_spill] sm:$0xff] }
 0x3d0   : > { %v1787_v18 = vadd.f32 %v5814_v50, %v5813_v54 }
 0x3d1   : > { %v2212_v48 = vpop.f32.mrf.mxu2  ;;  %v2271_v19 = vpop.f32.mrf.mxu3 }
 0x3d2   : > { %v2452_v46 = vadd.f32 %v2212_v48, %v1720_v20  ;;  %v2453_v10 = vadd.f32 %v2271_v19, %v1779_v51  ;;  %v2151_v23 = vpop.f32.mrf.mxu1  ;;  %v2328_v30 = vpop.f32.mrf.mxu0  ;;  %v5815_v20 = vld [vmem:[#allocation26_spill] sm:$0xff]  ;;  %v5817_v51 = vld [vmem:[#allocation141_spill] sm:$0xff] }
 0x3d3   : > { %v2444_v29 = vadd.f32 %v2151_v23, %v1659_v25  ;;  %v2447_v14 = vadd.f32 %v2328_v30, %v1836_v34  ;;  %v1666_v24 = vadd.f32 %v5816_v35, %v5815_v20  ;;  %v1843_v8 = vadd.f32 %v4998_v9, %v5817_v51  ;;  %v5818_v23 = vld [vmem:[#allocation99_spill] sm:$0xff]  ;;  %v5819_v30 = vld [vmem:[#allocation218_spill] sm:$0xff] }
 0x3d4   : > { %2593 = vst [vmem:[%s4722_s23 + $0x368] sm:$0xff] %v2452_v46  ;;  %v1730_v9 = vadd.f32 %v5819_v30, %v5818_v23 }
 0x3d5   : > { %2594 = vst [vmem:[%s4722_s23 + $0x370] sm:$0xff] %v2453_v10 }
 0x3d6   : > { %2585 = vst [vmem:[%s4722_s23 + $0x328] sm:$0xff] %v2444_v29  ;;  %v5820_v29 = vld [vmem:[#allocation155_spill] sm:$0xff] }
 0x3d7   : > { %2588 = vst.msk [vmem:[%s4722_s23 + $0x340] sm:$0xff] %vm2489_vm1, %v2447_v14  ;;  %v5821_v14 = vld [vmem:[#allocation222_spill] sm:$0xff] }
 0x3d8   : > { %v1789_v6 = vadd.f32 %v5821_v14, %v5820_v29 }
 0x3d9   : > { %v2215_v42 = vpop.f32.mrf.mxu2  ;;  %v2274_v53 = vpop.f32.mrf.mxu3 }
 0x3da   : > { %v2459_v16 = vadd.f32 %v2215_v42, %v1723_v28  ;;  %v2460_v62 = vadd.f32 %v2274_v53, %v1782_v15  ;;  %v2153_v0 = vpop.f32.mrf.mxu1  ;;  %v2330_v40 = vpop.f32.mrf.mxu0  ;;  %v5823_v28 = vld [vmem:[#allocation214_spill] sm:$0xff]  ;;  %v1846_v15 = vadd.f32 %v5009_v41, %v5824_v58 }
 0x3db   : > { %v2451_v17 = vadd.f32 %v2153_v0, %v1661_v39  ;;  %v2454_v7 = vadd.f32 %v2330_v40, %v1838_v2  ;;  %v1669_v60 = vadd.f32 %v5823_v28, %v5822_v4  ;;  %v5826_v0 = vld [vmem:[#allocation217_spill] sm:$0xff] }
 0x3dc   : > { %2600 = vst [vmem:[%s4722_s23 + $0x3a0] sm:$0xff] %v2459_v16 }
 0x3dd   : > { %2601 = vst [vmem:[%s4722_s23 + $0x3a8] sm:$0xff] %v2460_v62  ;;  %v5825_v62 = vld [vmem:[#allocation94_spill] sm:$0xff] }
 0x3de   : > { %2592 = vst [vmem:[%s4722_s23 + $0x360] sm:$0xff] %v2451_v17  ;;  %v1671_v40 = vadd.f32 %v5826_v0, %v5825_v62  ;;  %v5827_v17 = vld [vmem:[#allocation149_spill] sm:$0xff] }
 0x3df   : > { %2595 = vst.msk [vmem:[%s4722_s23 + $0x378] sm:$0xff] %vm2489_vm1, %v2454_v7  ;;  %v1848_v41 = vadd.f32 %v5028_v31, %v5827_v17 }
 0x3e1   : > { %v2217_v47 = vpop.f32.mrf.mxu2  ;;  %v2276_v61 = vpop.f32.mrf.mxu3 }
 0x3e2   : > { %v2466_v5 = vadd.f32 %v2217_v47, %v1725_v3  ;;  %v2467_v21 = vadd.f32 %v2276_v61, %v1784_v57  ;;  %v2156_v12 = vpop.f32.mrf.mxu1  ;;  %v2333_v49 = vpop.f32.mrf.mxu0 }
 0x3e3   : > { %v2458_v43 = vadd.f32 %v2156_v12, %v1664_v37  ;;  %v2461_v1 = vadd.f32 %v2333_v49, %v1841_v52 }
 0x3e4   : > { %2607 = vst [vmem:[%s4722_s23 + $0x3d8] sm:$0xff] %v2466_v5 }
 0x3e5   : > { %2608 = vst [vmem:[%s4722_s23 + $0x3e0] sm:$0xff] %v2467_v21 }
 0x3e6   : > { %2599 = vst [vmem:[%s4722_s23 + $0x398] sm:$0xff] %v2458_v43 }
 0x3e7   : > { %2602 = vst.msk [vmem:[%s4722_s23 + $0x3b0] sm:$0xff] %vm2489_vm1, %v2461_v1 }
 0x3e9   : > { %v2220_v38 = vpop.f32.mrf.mxu2  ;;  %v2279_v25 = vpop.f32.mrf.mxu3 }
 0x3ea   : > { %v2473_v45 = vadd.f32 %v2220_v38, %v1728_v26  ;;  %v2474_v34 = vadd.f32 %v2279_v25, %v1787_v18  ;;  %v2158_v48 = vpop.f32.mrf.mxu1  ;;  %v2335_v19 = vpop.f32.mrf.mxu0 }
 0x3eb   : > { %v2465_v46 = vadd.f32 %v2158_v48, %v1666_v24  ;;  %v2468_v10 = vadd.f32 %v2335_v19, %v1843_v8 }
 0x3ec   : > { %2614 = vst [vmem:[%s4722_s23 + $0x410] sm:$0xff] %v2473_v45 }
 0x3ed   : > { %2615 = vst [vmem:[%s4722_s23 + $0x418] sm:$0xff] %v2474_v34 }
 0x3ee   : > { %2606 = vst [vmem:[%s4722_s23 + $0x3d0] sm:$0xff] %v2465_v46 }
 0x3ef   : > { %2609 = vst.msk [vmem:[%s4722_s23 + $0x3e8] sm:$0xff] %vm2489_vm1, %v2468_v10 }
 0x3f1   : > { %v2222_v22 = vpop.f32.mrf.mxu2  ;;  %v2281_v56 = vpop.f32.mrf.mxu3 }
 0x3f2   : > { %v2480_v39 = vadd.f32 %v2222_v22, %v1730_v9  ;;  %v2481_v55 = vadd.f32 %v2281_v56, %v1789_v6  ;;  %v2161_v2 = vpop.f32.mrf.mxu1  ;;  %v2338_v42 = vpop.f32.mrf.mxu0 }
 0x3f3   : > { %v2472_v53 = vadd.f32 %v2161_v2, %v1669_v60  ;;  %v2475_v16 = vadd.f32 %v2338_v42, %v1846_v15 }
 0x3f4   : > { %2621 = vst [vmem:[%s4722_s23 + $0x448] sm:$0xff] %v2480_v39 }
 0x3f5   : > { %2622 = vst [vmem:[%s4722_s23 + $0x450] sm:$0xff] %v2481_v55 }
 0x3f6   : > { %2613 = vst [vmem:[%s4722_s23 + $0x408] sm:$0xff] %v2472_v53 }
 0x3f7   : > { %2616 = vst.msk [vmem:[%s4722_s23 + $0x420] sm:$0xff] %vm2489_vm1, %v2475_v16 }
 0x3fa   : > { %v2163_v7 = vpop.f32.mrf.mxu1  ;;  %v2340_v63 = vpop.f32.mrf.mxu0 }
 0x3fb   : > { %v2479_v13 = vadd.f32 %v2163_v7, %v1671_v40  ;;  %v2482_v3 = vadd.f32 %v2340_v63, %v1848_v41 }
 0x3fd   : > { %2620 = vst [vmem:[%s4722_s23 + $0x440] sm:$0xff] %v2479_v13 }
 0x3fe   : > { %2623 = vst.msk [vmem:[%s4722_s23 + $0x458] sm:$0xff] %vm2489_vm1, %v2482_v3 }
 0x3ff PF: > { %s16_s17 = sadd.s32 1, %s3236_s17   ;;  %s5828_s15 = smov %s3232_s16 }
 0x400   : > { %p13_p8 = scmp.ge.s32.totalorder %s16_s17, 5   ;;  %s5829_s16 = smov %s5831_s19 }
 0x402   :  { %15 = sbr.rel (!%p13_p8) target bundleno = 3 (0x3), region = 80 }
 0x407   :  { %2656 = vsyncpa [#allocation3], 1 }
 0x408   :  { %2658 = vsyncpa [#allocation3 + $0x1], 1 }
 0x409   :  { %2659 = vsyncpa [#allocation5], 1 }

</bundles_post_ra>
